<compile_context>
chip_gen: v7x
topology: tpu7x:2x2x1
jax: 0.10.0
libtpu: 0.0.40
codegen_flags: <defaults>
</compile_context>

<pallas_src>
import functools

import jax
import jax.numpy as jnp
import numpy as np
from jax.experimental import pallas as pl
from jax.experimental.pallas import tpu as pltpu

NUM_ROUTING_ITERATIONS = 3


def _ceil_to(n, m):
    return ((n + m - 1) // m) * m


def _vmem_bytes(shape, itemsize):
    """Rough padded-VMEM footprint of an array ((sublane, lane) tiling)."""
    if len(shape) < 2:
        return _ceil_to(int(np.prod(shape)) * itemsize, 512)
    lead = 1
    for d in shape[:-2]:
        lead *= int(d)
    sub = _ceil_to(int(shape[-2]), max(8, 32 // itemsize))
    lane = _ceil_to(int(shape[-1]), 128)
    return lead * sub * lane * itemsize


def _pick_r_tile(R, IN, OUT, itemsize, budget_bytes=10 * 2**20, max_tile=576):
    """Largest divisor of R whose double-buffered weight block fits the budget."""
    divisors = [d for d in range(1, R + 1)
                if R % d == 0 and (d % 8 == 0 or d == R)]
    for d in sorted(divisors, reverse=True):
        if d <= max_tile and 2 * _vmem_bytes((d, OUT, IN), itemsize) <= budget_bytes:
            return d
    return divisors[0]


def _pick_r_chunk(R, cap=256):
    """Routing-epilogue chunk: largest divisor of R <= cap (sublane aligned)."""
    for d in range(min(R, cap), 0, -1):
        if R % d == 0 and (d % 8 == 0 or d == R):
            return d
    return R


def _pick_r_sub(r_tile, cap=32):
    """Matmul sub-tile: bounds live-value size / unrolled matmul count."""
    for d in range(min(r_tile, cap), 0, -1):
        if r_tile % d == 0:
            return d
    return r_tile


def _routing_kernel(x_ref, w_ref, o_ref,
                    priors_ref, s0_ref, logits_ref, m_ref, l_ref, sacc_ref,
                    *, num_iterations, r_chunk, r_sub, precision):
    """One grid step = one (capsule, R-tile).

    x_ref:      [R, IN, B]         resident for the whole grid (input dtype)
    w_ref:      [r_tile, OUT, IN]  this capsule's weight tile (input dtype)
    o_ref:      [OUT, B]           written on the last R step of the capsule
    priors_ref: [R, OUT, B]  f32   per-capsule priors, resident across R steps
    s0_ref:     [OUT, B]     f32   fused iteration-0 accumulator (sum_r priors)
    logits_ref: [R, B]       f32   routing-logit carry (exact: reference delta
                                   keeps dim=-1 -> logits constant along OUT)
    m_ref/l_ref:[1, B]       f32   online-softmax running max / denominator
    sacc_ref:   [OUT, B]     f32   online-softmax weighted-sum accumulator
    """
    ri = pl.program_id(1)
    n_ri = pl.num_programs(1)
    r_tile = w_ref.shape[0]
    n_sub = r_tile // r_sub

    @pl.when(ri == 0)
    def _():
        s0_ref[...] = jnp.zeros_like(s0_ref)

    r_base = ri * r_tile

    # ---- priors (MXU) phase, sub-tiled so live values stay small ----------
    def mm_body(si, carry):
        off = pl.multiple_of(si * r_sub, r_sub)
        rs = pl.multiple_of(r_base + off, r_sub)
        xs = x_ref[pl.ds(rs, r_sub), :, :]                    # [r_sub, IN, B]
        ws = w_ref[pl.ds(off, r_sub), :, :]                   # [r_sub, OUT, IN]
        # pr[t, o, b] = sum_i w[t, o, i] * x[t, i, b]   (canonical batched dot)
        pr = jax.lax.dot_general(
            ws, xs,
            dimension_numbers=(((2,), (1,)), ((0,), (0,))),
            preferred_element_type=jnp.float32,
            precision=precision)                              # [r_sub, OUT, B]
        priors_ref[pl.ds(rs, r_sub), :, :] = pr
        # Fused iteration 0: softmax over zero logits is uniform, so the first
        # weighted sum is just sum_r(priors)/R; accumulate it here (overlapped
        # with the MXU/DMA phase) instead of re-reading the scratch later.
        s0_ref[...] += jnp.sum(pr, axis=0)
        return carry

    jax.lax.fori_loop(0, n_sub, mm_body, 0)

    # ---- routing epilogue: runs once per capsule, on the last R step -------
    @pl.when(ri == n_ri - 1)
    def _():
        R = priors_ref.shape[0]
        n_chunks = R // r_chunk

        def squash(s):
            # NOTE: no epsilon, matching the PyTorch reference (it also divides
            # by sqrt(squared_norm)); s == 0 would produce NaN there too.
            sq = jnp.sum(s * s, axis=0, keepdims=True)        # [1, B]
            return (sq / (1.0 + sq)) * s * jax.lax.rsqrt(sq)

        outputs = squash(s0_ref[...] * (1.0 / R))             # iteration 0

        for it in range(1, num_iterations):
            last_it = it == num_iterations - 1

            m_ref[...] = jnp.full(m_ref.shape, -jnp.inf, jnp.float32)
            l_ref[...] = jnp.zeros(l_ref.shape, jnp.float32)
            sacc_ref[...] = jnp.zeros(sacc_ref.shape, jnp.float32)

            prev_outputs = outputs

            def chunk_body(ci, carry):
                cs = pl.multiple_of(ci * r_chunk, r_chunk)
                pr_c = priors_ref[pl.ds(cs, r_chunk), :, :]   # [Rc, OUT, B]
                # delta_logits of the *previous* iteration
                delta = jnp.sum(pr_c * prev_outputs[None, :, :], axis=1)  # [Rc, B]
                if it == 1:
                    logit = delta                      # initial logits are zero
                else:
                    logit = logits_ref[pl.ds(cs, r_chunk), :] + delta
                if not last_it:                        # no later iteration reads it
                    logits_ref[pl.ds(cs, r_chunk), :] = logit
                # online softmax over R, fused with the weighted prior sum
                m_old = m_ref[...]
                m_new = jnp.maximum(m_old, jnp.max(logit, axis=0, keepdims=True))
                alpha = jnp.exp(m_old - m_new)                 # [1, B]
                e = jnp.exp(logit - m_new)                     # [Rc, B]
                l_ref[...] = alpha * l_ref[...] + jnp.sum(e, axis=0, keepdims=True)
                sacc_ref[...] = (alpha * sacc_ref[...]
                                 + jnp.sum(e[:, None, :] * pr_c, axis=0))
                m_ref[...] = m_new
                return carry

            jax.lax.fori_loop(0, n_chunks, chunk_body, 0)

            outputs = squash(sacc_ref[...] / l_ref[...])

        o_ref[...] = outputs.astype(o_ref.dtype)


def capsule_layer_forward(x, route_weights, *,
                          num_iterations=NUM_ROUTING_ITERATIONS,
                          r_tile=None, r_chunk=None,
                          compute_dtype=None, precision=None):
    """Dynamic-routing CapsuleLayer forward.

    x:             [B, R, IN]
    route_weights: [C, R, IN, OUT]
    returns        [C, B, 1, 1, OUT]   (same as the PyTorch module)
    """
    B, R, IN = x.shape
    C, R2, IN2, OUT = route_weights.shape
    assert R == R2 and IN == IN2

    out_dtype = x.dtype
    if compute_dtype is not None:
        # bf16 (or other) matmul inputs; accumulation and routing math stay f32.
        x = x.astype(compute_dtype)
        route_weights = route_weights.astype(compute_dtype)
    in_item = jnp.dtype(x.dtype).itemsize

    if r_tile is None:
        r_tile = _pick_r_tile(R, IN, OUT, in_item)
    assert R % r_tile == 0, "R must be divisible by r_tile"
    n_r_tiles = R // r_tile

    if r_chunk is None:
        r_chunk = _pick_r_chunk(R)
    assert R % r_chunk == 0, "R must be divisible by r_chunk"

    r_sub = _pick_r_sub(r_tile)

    # Lane-dense layouts for the kernel (one-time XLA transposes, cheap):
    #   x -> [R, IN, B]       (B on lanes; per-tile slice is on the leading dim)
    #   w -> [C, R, OUT, IN]  (canonical batched-matmul LHS layout)
    x_t = jnp.transpose(x, (1, 2, 0))
    w_t = jnp.transpose(route_weights, (0, 1, 3, 2))

    # VMEM budget (padded sizes): resident x (pipeline may double-buffer it),
    # double-buffered weight tiles, priors/logits/accumulator scratches, the
    # output block and the per-chunk routing temporaries.
    need = (2 * _vmem_bytes((R, IN, B), in_item)
            + 2 * _vmem_bytes((r_tile, OUT, IN), in_item)
            + _vmem_bytes((R, OUT, B), 4)
            + _vmem_bytes((R, B), 4)
            + 3 * _vmem_bytes((OUT, B), 4)
            + 2 * _vmem_bytes((OUT, B), jnp.dtype(out_dtype).itemsize)
            + 4 * _vmem_bytes((r_chunk, OUT, B), 4))
    vmem_limit = None
    if need > 12 * 2**20:
        # Stay within a v7x-friendly (<= ~40 MiB) envelope when possible, but
        # never under-provision relative to the estimate.
        vmem_limit = int(min(max(need + 4 * 2**20, 16 * 2**20), 40 * 2**20))
        vmem_limit = max(vmem_limit, int(need) + 2 * 2**20)

    kernel = functools.partial(_routing_kernel,
                               num_iterations=num_iterations,
                               r_chunk=r_chunk,
                               r_sub=r_sub,
                               precision=precision)

    out = pl.pallas_call(
        kernel,
        out_shape=jax.ShapeDtypeStruct((C, OUT, B), out_dtype),
        grid=(C, n_r_tiles),
        in_specs=[
            # x: full-array block, constant index map -> fetched once, resident.
            pl.BlockSpec((R, IN, B), lambda c, r: (0, 0, 0)),
            pl.BlockSpec((None, r_tile, OUT, IN), lambda c, r: (c, r, 0, 0)),
        ],
        out_specs=pl.BlockSpec((None, OUT, B), lambda c, r: (c, 0, 0)),
        scratch_shapes=[
            pltpu.VMEM((R, OUT, B), jnp.float32),    # priors
            pltpu.VMEM((OUT, B), jnp.float32),       # fused iteration-0 sum
            pltpu.VMEM((R, B), jnp.float32),         # logits carry
            pltpu.VMEM((1, B), jnp.float32),         # online-softmax max
            pltpu.VMEM((1, B), jnp.float32),         # online-softmax denom
            pltpu.VMEM((OUT, B), jnp.float32),       # online-softmax weighted sum
        ],
        compiler_params=pltpu.CompilerParams(
            dimension_semantics=("parallel", "arbitrary"),
            vmem_limit_bytes=vmem_limit,
        ),
    )(x_t, w_t)

    # [C, OUT, B] (lane-dense in-kernel) -> [C, B, 1, 1, OUT] (PyTorch shape)
    return jnp.transpose(out, (0, 2, 1)).reshape(C, B, 1, 1, OUT)


# ----------------------------- pure-JAX reference -----------------------------

def _squash_ref(t, axis=-1):
    sn = jnp.sum(t * t, axis=axis, keepdims=True)
    return (sn / (1.0 + sn)) * t / jnp.sqrt(sn)


def reference_forward(x, route_weights, num_iterations=NUM_ROUTING_ITERATIONS):
    """Pure-JAX mirror of the PyTorch forward (routing branch)."""
    priors = jnp.einsum('bri,crio->cbro', x, route_weights,
                        precision=jax.lax.Precision.HIGHEST)[:, :, :, None, :]
    logits = jnp.zeros_like(priors)
    outputs = None
    for i in range(num_iterations):
        probs = jax.nn.softmax(logits, axis=2)
        outputs = _squash_ref(jnp.sum(probs * priors, axis=2, keepdims=True),
                              axis=-1)
        if i != num_iterations - 1:
            delta = jnp.sum(priors * outputs, axis=-1, keepdims=True)
            logits = logits + delta
    return outputs  # [C, B, 1, 1, OUT]


if __name__ == "__main__":
    key = jax.random.PRNGKey(0)
    kx, kw = jax.random.split(key)

    # Small shapes consistent with a digit-capsule layer.
    B, C, R, IN, OUT = 2, 4, 32, 8, 16
    x = jax.random.normal(kx, (B, R, IN), dtype=jnp.float32)
    route_weights = jax.random.normal(kw, (C, R, IN, OUT), dtype=jnp.float32)

    ref = reference_forward(x, route_weights)

    # 1) f32, exact matmul precision, single R tile & single routing chunk.
    out_hi = jax.block_until_ready(
        capsule_layer_forward(x, route_weights,
                              precision=jax.lax.Precision.HIGHEST))
    np.testing.assert_allclose(np.asarray(out_hi), np.asarray(ref),
                               rtol=1e-3, atol=1e-3)

    # 2) f32, exact precision, multi-tile R + chunked online-softmax routing.
    out_tiled = jax.block_until_ready(
        capsule_layer_forward(x, route_weights, r_tile=8, r_chunk=8,
                              precision=jax.lax.Precision.HIGHEST))
    np.testing.assert_allclose(np.asarray(out_tiled), np.asarray(ref),
                               rtol=1e-3, atol=1e-3)

    # 3) default (fast) matmul precision — the production path; bf16-level
    #    rounding inside the MXU, so compare loosely against the exact ref.
    out_fast = jax.block_until_ready(capsule_layer_forward(x, route_weights))
    np.testing.assert_allclose(np.asarray(out_fast), np.asarray(ref),
                               rtol=1e-1, atol=1e-1)

    # 4) bf16 matmul inputs (f32 accumulate + f32 routing); compare against a
    #    reference fed the same bf16-rounded operands.
    out_bf16 = jax.block_until_ready(
        capsule_layer_forward(x, route_weights, compute_dtype=jnp.bfloat16))
    ref_bf16 = reference_forward(
        x.astype(jnp.bfloat16).astype(jnp.float32),
        route_weights.astype(jnp.bfloat16).astype(jnp.float32))
    np.testing.assert_allclose(np.asarray(out_bf16), np.asarray(ref_bf16),
                               rtol=2e-2, atol=2e-2)

    print("KERNEL_OK")
</pallas_src>

<mosaic_0001>
module attributes {stable_mosaic.version = 11 : i64} {
  func.func @_routing_kernel(%arg0: i32, %arg1: i32, %arg2: memref<32x8x2xf32, #tpu.memory_space<vmem>>, %arg3: memref<1x32x16x8xf32, #tpu.memory_space<vmem>>, %arg4: memref<1x16x2xf32, #tpu.memory_space<vmem>>, %arg5: memref<32x16x2xf32, #tpu.memory_space<vmem>>, %arg6: memref<16x2xf32, #tpu.memory_space<vmem>>, %arg7: memref<32x2xf32, #tpu.memory_space<vmem>>, %arg8: memref<1x2xf32, #tpu.memory_space<vmem>>, %arg9: memref<1x2xf32, #tpu.memory_space<vmem>>, %arg10: memref<16x2xf32, #tpu.memory_space<vmem>>) attributes {dimension_semantics = [#tpu.dimension_semantics<parallel>, #tpu.dimension_semantics<arbitrary>], iteration_bounds = array<i64: 4, 1>, scalar_prefetch = 0 : i64, scratch_operands = 6 : i64, tpu.core_type = #tpu.core_type<tc>, window_params = [{pipeline_mode = #tpu.pipeline_mode<synchronous>, transform_indices = @transform_0, window_bounds = array<i64: 32, 8, 2>}, {transform_indices = @transform_1, window_bounds = array<i64: 1, 32, 16, 8>}, {transform_indices = @transform_2, window_bounds = array<i64: 1, 16, 2>}]} {
    %c0_i32 = arith.constant 0 : i32
    %0 = arith.cmpi eq, %arg1, %c0_i32 : i32
    %1 = arith.extui %0 : i1 to i32
    %c0_i32_0 = arith.constant 0 : i32
    %2 = arith.cmpi ne, %1, %c0_i32_0 : i32
    scf.if %2 {
      %cst_16 = arith.constant 0.000000e+00 : f32
      %23 = vector.broadcast %cst_16 : f32 to vector<16x2xf32>
      %c0_17 = arith.constant 0 : index
      %c0_18 = arith.constant 0 : index
      %24 = vector.load %arg6[%c0_17, %c0_18] : memref<16x2xf32, #tpu.memory_space<vmem>>, vector<16x2xf32>
      tpu.vector_store %arg6[%c0_17, %c0_18], %23 {strides = array<i32>} : memref<16x2xf32, #tpu.memory_space<vmem>>, vector<16x2xf32>,
    } else {
    }
    %c32_i32 = arith.constant 32 : i32
    %3 = arith.muli %arg1, %c32_i32 : i32
    %c0_i32_1 = arith.constant 0 : i32
    %c32_i32_2 = arith.constant 32 : i32
    %4 = arith.muli %c0_i32_1, %c32_i32_2 : i32
    %5 = tpu.assume_multiple %4, 32 : i32
    %6 = arith.addi %3, %5 : i32
    %7 = tpu.assume_multiple %6, 32 : i32
    %8 = arith.index_cast %7 : i32 to index
    %c0 = arith.constant 0 : index
    %c0_3 = arith.constant 0 : index
    %9 = vector.load %arg2[%8, %c0, %c0_3] : memref<32x8x2xf32, #tpu.memory_space<vmem>>, vector<32x8x2xf32>
    %c0_4 = arith.constant 0 : index
    %10 = arith.index_cast %5 : i32 to index
    %c0_5 = arith.constant 0 : index
    %c0_6 = arith.constant 0 : index
    %11 = vector.load %arg3[%c0_4, %10, %c0_5, %c0_6] : memref<1x32x16x8xf32, #tpu.memory_space<vmem>>, vector<1x32x16x8xf32>
    %12 = vector.shape_cast %11 : vector<1x32x16x8xf32> to vector<32x16x8xf32>
    %cst = arith.constant dense<0.000000e+00> : vector<32x16x2xf32>
    %13 = tpu.matmul %12, %9, %cst {dimension_numbers = #tpu.dot_dimension_numbers<[2], [1], [1], [2], [0, 0, 0, 1, 1, 2], [0], [0]>, precision = #tpu.contract_precision<fp32>} : vector<32x16x8xf32>, vector<32x8x2xf32>, vector<32x16x2xf32> -> vector<32x16x2xf32>
    %14 = arith.index_cast %7 : i32 to index
    %c0_7 = arith.constant 0 : index
    %c0_8 = arith.constant 0 : index
    %15 = vector.load %arg5[%14, %c0_7, %c0_8] : memref<32x16x2xf32, #tpu.memory_space<vmem>>, vector<32x16x2xf32>
    tpu.vector_store %arg5[%14, %c0_7, %c0_8], %13 {strides = array<i32>} : memref<32x16x2xf32, #tpu.memory_space<vmem>>, vector<32x16x2xf32>,
    %c0_9 = arith.constant 0 : index
    %c0_10 = arith.constant 0 : index
    %16 = vector.load %arg6[%c0_9, %c0_10] : memref<16x2xf32, #tpu.memory_space<vmem>>, vector<16x2xf32>
    %cst_11 = arith.constant dense<0.000000e+00> : vector<16x2xf32>
    %17 = vector.multi_reduction <add>, %13, %cst_11 [0] : vector<32x16x2xf32> to vector<16x2xf32>
    %18 = arith.addf %16, %17 : vector<16x2xf32>
    %c0_12 = arith.constant 0 : index
    %c0_13 = arith.constant 0 : index
    %19 = vector.load %arg6[%c0_12, %c0_13] : memref<16x2xf32, #tpu.memory_space<vmem>>, vector<16x2xf32>
    tpu.vector_store %arg6[%c0_12, %c0_13], %18 {strides = array<i32>} : memref<16x2xf32, #tpu.memory_space<vmem>>, vector<16x2xf32>,
    %c1_i32 = arith.constant 1 : i32
    %c0_i32_14 = arith.constant 0 : i32
    %20 = arith.cmpi eq, %arg1, %c0_i32_14 : i32
    %21 = arith.extui %20 : i1 to i32
    %c0_i32_15 = arith.constant 0 : i32
    %22 = arith.cmpi ne, %21, %c0_i32_15 : i32
    scf.if %22 {
      %c0_16 = arith.constant 0 : index
      %c0_17 = arith.constant 0 : index
      %23 = vector.load %arg6[%c0_16, %c0_17] : memref<16x2xf32, #tpu.memory_space<vmem>>, vector<16x2xf32>
      %cst_18 = arith.constant 3.125000e-02 : f32
      %24 = vector.broadcast %cst_18 : f32 to vector<16x2xf32>
      %25 = arith.mulf %23, %24 : vector<16x2xf32>
      %26 = arith.mulf %25, %25 : vector<16x2xf32>
      %cst_19 = arith.constant dense<0.000000e+00> : vector<2xf32>
      %27 = vector.multi_reduction <add>, %26, %cst_19 [0] : vector<16x2xf32> to vector<2xf32>
      %28 = vector.shape_cast %27 : vector<2xf32> to vector<1x2xf32>
      %cst_20 = arith.constant 1.000000e+00 : f32
      %29 = vector.broadcast %cst_20 : f32 to vector<1x2xf32>
      %30 = arith.addf %29, %28 : vector<1x2xf32>
      %31 = arith.divf %28, %30 : vector<1x2xf32>
      %32 = vector.broadcast %31 : vector<1x2xf32> to vector<16x2xf32>
      %33 = arith.mulf %32, %25 : vector<16x2xf32>
      %34 = math.rsqrt %28 : vector<1x2xf32>
      %35 = vector.broadcast %34 : vector<1x2xf32> to vector<16x2xf32>
      %36 = arith.mulf %33, %35 : vector<16x2xf32>
      %cst_21 = arith.constant 0xFF800000 : f32
      %37 = vector.broadcast %cst_21 : f32 to vector<1x2xf32>
      %c0_22 = arith.constant 0 : index
      %c0_23 = arith.constant 0 : index
      %38 = vector.load %arg8[%c0_22, %c0_23] : memref<1x2xf32, #tpu.memory_space<vmem>>, vector<1x2xf32>
      tpu.vector_store %arg8[%c0_22, %c0_23], %37 {strides = array<i32>} : memref<1x2xf32, #tpu.memory_space<vmem>>, vector<1x2xf32>,
      %cst_24 = arith.constant 0.000000e+00 : f32
      %39 = vector.broadcast %cst_24 : f32 to vector<1x2xf32>
      %c0_25 = arith.constant 0 : index
      %c0_26 = arith.constant 0 : index
      %40 = vector.load %arg9[%c0_25, %c0_26] : memref<1x2xf32, #tpu.memory_space<vmem>>, vector<1x2xf32>
      tpu.vector_store %arg9[%c0_25, %c0_26], %39 {strides = array<i32>} : memref<1x2xf32, #tpu.memory_space<vmem>>, vector<1x2xf32>,
      %cst_27 = arith.constant 0.000000e+00 : f32
      %41 = vector.broadcast %cst_27 : f32 to vector<16x2xf32>
      %c0_28 = arith.constant 0 : index
      %c0_29 = arith.constant 0 : index
      %42 = vector.load %arg10[%c0_28, %c0_29] : memref<16x2xf32, #tpu.memory_space<vmem>>, vector<16x2xf32>
      tpu.vector_store %arg10[%c0_28, %c0_29], %41 {strides = array<i32>} : memref<16x2xf32, #tpu.memory_space<vmem>>, vector<16x2xf32>,
      %c0_i32_30 = arith.constant 0 : i32
      %c32_i32_31 = arith.constant 32 : i32
      %43 = arith.muli %c0_i32_30, %c32_i32_31 : i32
      %44 = tpu.assume_multiple %43, 32 : i32
      %45 = arith.index_cast %44 : i32 to index
      %c0_32 = arith.constant 0 : index
      %c0_33 = arith.constant 0 : index
      %46 = vector.load %arg5[%45, %c0_32, %c0_33] : memref<32x16x2xf32, #tpu.memory_space<vmem>>, vector<32x16x2xf32>
      %47 = vector.shape_cast %36 : vector<16x2xf32> to vector<1x16x2xf32>
      %48 = vector.broadcast %47 : vector<1x16x2xf32> to vector<32x16x2xf32>
      %49 = arith.mulf %46, %48 : vector<32x16x2xf32>
      %cst_34 = arith.constant dense<0.000000e+00> : vector<32x2xf32>
      %50 = vector.multi_reduction <add>, %49, %cst_34 [1] : vector<32x16x2xf32> to vector<32x2xf32>
      %51 = arith.index_cast %44 : i32 to index
      %c0_35 = arith.constant 0 : index
      %52 = vector.load %arg7[%51, %c0_35] : memref<32x2xf32, #tpu.memory_space<vmem>>, vector<32x2xf32>
      tpu.vector_store %arg7[%51, %c0_35], %50 {strides = array<i32>} : memref<32x2xf32, #tpu.memory_space<vmem>>, vector<32x2xf32>,
      %c0_36 = arith.constant 0 : index
      %c0_37 = arith.constant 0 : index
      %53 = vector.load %arg8[%c0_36, %c0_37] : memref<1x2xf32, #tpu.memory_space<vmem>>, vector<1x2xf32>
      %cst_38 = arith.constant dense<0xFF800000> : vector<2xf32>
      %54 = vector.multi_reduction <maximumf>, %50, %cst_38 [0] : vector<32x2xf32> to vector<2xf32>
      %55 = vector.shape_cast %54 : vector<2xf32> to vector<1x2xf32>
      %56 = arith.maximumf %53, %55 : vector<1x2xf32>
      %57 = arith.subf %53, %56 : vector<1x2xf32>
      %58 = math.exp %57 : vector<1x2xf32>
      %59 = vector.broadcast %56 : vector<1x2xf32> to vector<32x2xf32>
      %60 = arith.subf %50, %59 : vector<32x2xf32>
      %61 = math.exp %60 : vector<32x2xf32>
      %c0_39 = arith.constant 0 : index
      %c0_40 = arith.constant 0 : index
      %62 = vector.load %arg9[%c0_39, %c0_40] : memref<1x2xf32, #tpu.memory_space<vmem>>, vector<1x2xf32>
      %63 = arith.mulf %58, %62 : vector<1x2xf32>
      %cst_41 = arith.constant dense<0.000000e+00> : vector<2xf32>
      %64 = vector.multi_reduction <add>, %61, %cst_41 [0] : vector<32x2xf32> to vector<2xf32>
      %65 = vector.shape_cast %64 : vector<2xf32> to vector<1x2xf32>
      %66 = arith.addf %63, %65 : vector<1x2xf32>
      %c0_42 = arith.constant 0 : index
      %c0_43 = arith.constant 0 : index
      %67 = vector.load %arg9[%c0_42, %c0_43] : memref<1x2xf32, #tpu.memory_space<vmem>>, vector<1x2xf32>
      tpu.vector_store %arg9[%c0_42, %c0_43], %66 {strides = array<i32>} : memref<1x2xf32, #tpu.memory_space<vmem>>, vector<1x2xf32>,
      %c0_44 = arith.constant 0 : index
      %c0_45 = arith.constant 0 : index
      %68 = vector.load %arg10[%c0_44, %c0_45] : memref<16x2xf32, #tpu.memory_space<vmem>>, vector<16x2xf32>
      %69 = vector.broadcast %58 : vector<1x2xf32> to vector<16x2xf32>
      %70 = arith.mulf %69, %68 : vector<16x2xf32>
      %71 = vector.shape_cast %61 : vector<32x2xf32> to vector<32x1x2xf32>
      %72 = vector.broadcast %71 : vector<32x1x2xf32> to vector<32x16x2xf32>
      %73 = arith.mulf %72, %46 : vector<32x16x2xf32>
      %cst_46 = arith.constant dense<0.000000e+00> : vector<16x2xf32>
      %74 = vector.multi_reduction <add>, %73, %cst_46 [0] : vector<32x16x2xf32> to vector<16x2xf32>
      %75 = arith.addf %70, %74 : vector<16x2xf32>
      %c0_47 = arith.constant 0 : index
      %c0_48 = arith.constant 0 : index
      %76 = vector.load %arg10[%c0_47, %c0_48] : memref<16x2xf32, #tpu.memory_space<vmem>>, vector<16x2xf32>
      tpu.vector_store %arg10[%c0_47, %c0_48], %75 {strides = array<i32>} : memref<16x2xf32, #tpu.memory_space<vmem>>, vector<16x2xf32>,
      %c0_49 = arith.constant 0 : index
      %c0_50 = arith.constant 0 : index
      %77 = vector.load %arg8[%c0_49, %c0_50] : memref<1x2xf32, #tpu.memory_space<vmem>>, vector<1x2xf32>
      tpu.vector_store %arg8[%c0_49, %c0_50], %56 {strides = array<i32>} : memref<1x2xf32, #tpu.memory_space<vmem>>, vector<1x2xf32>,
      %c1_i32_51 = arith.constant 1 : i32
      %c0_52 = arith.constant 0 : index
      %c0_53 = arith.constant 0 : index
      %78 = vector.load %arg10[%c0_52, %c0_53] : memref<16x2xf32, #tpu.memory_space<vmem>>, vector<16x2xf32>
      %c0_54 = arith.constant 0 : index
      %c0_55 = arith.constant 0 : index
      %79 = vector.load %arg9[%c0_54, %c0_55] : memref<1x2xf32, #tpu.memory_space<vmem>>, vector<1x2xf32>
      %80 = vector.broadcast %79 : vector<1x2xf32> to vector<16x2xf32>
      %81 = arith.divf %78, %80 : vector<16x2xf32>
      %82 = arith.mulf %81, %81 : vector<16x2xf32>
      %cst_56 = arith.constant dense<0.000000e+00> : vector<2xf32>
      %83 = vector.multi_reduction <add>, %82, %cst_56 [0] : vector<16x2xf32> to vector<2xf32>
      %84 = vector.shape_cast %83 : vector<2xf32> to vector<1x2xf32>
      %cst_57 = arith.constant 1.000000e+00 : f32
      %85 = vector.broadcast %cst_57 : f32 to vector<1x2xf32>
      %86 = arith.addf %85, %84 : vector<1x2xf32>
      %87 = arith.divf %84, %86 : vector<1x2xf32>
      %88 = vector.broadcast %87 : vector<1x2xf32> to vector<16x2xf32>
      %89 = arith.mulf %88, %81 : vector<16x2xf32>
      %90 = math.rsqrt %84 : vector<1x2xf32>
      %91 = vector.broadcast %90 : vector<1x2xf32> to vector<16x2xf32>
      %92 = arith.mulf %89, %91 : vector<16x2xf32>
      %cst_58 = arith.constant 0xFF800000 : f32
      %93 = vector.broadcast %cst_58 : f32 to vector<1x2xf32>
      %c0_59 = arith.constant 0 : index
      %c0_60 = arith.constant 0 : index
      %94 = vector.load %arg8[%c0_59, %c0_60] : memref<1x2xf32, #tpu.memory_space<vmem>>, vector<1x2xf32>
      tpu.vector_store %arg8[%c0_59, %c0_60], %93 {strides = array<i32>} : memref<1x2xf32, #tpu.memory_space<vmem>>, vector<1x2xf32>,
      %cst_61 = arith.constant 0.000000e+00 : f32
      %95 = vector.broadcast %cst_61 : f32 to vector<1x2xf32>
      %c0_62 = arith.constant 0 : index
      %c0_63 = arith.constant 0 : index
      %96 = vector.load %arg9[%c0_62, %c0_63] : memref<1x2xf32, #tpu.memory_space<vmem>>, vector<1x2xf32>
      tpu.vector_store %arg9[%c0_62, %c0_63], %95 {strides = array<i32>} : memref<1x2xf32, #tpu.memory_space<vmem>>, vector<1x2xf32>,
      %cst_64 = arith.constant 0.000000e+00 : f32
      %97 = vector.broadcast %cst_64 : f32 to vector<16x2xf32>
      %c0_65 = arith.constant 0 : index
      %c0_66 = arith.constant 0 : index
      %98 = vector.load %arg10[%c0_65, %c0_66] : memref<16x2xf32, #tpu.memory_space<vmem>>, vector<16x2xf32>
      tpu.vector_store %arg10[%c0_65, %c0_66], %97 {strides = array<i32>} : memref<16x2xf32, #tpu.memory_space<vmem>>, vector<16x2xf32>,
      %c0_i32_67 = arith.constant 0 : i32
      %c32_i32_68 = arith.constant 32 : i32
      %99 = arith.muli %c0_i32_67, %c32_i32_68 : i32
      %100 = tpu.assume_multiple %99, 32 : i32
      %101 = arith.index_cast %100 : i32 to index
      %c0_69 = arith.constant 0 : index
      %c0_70 = arith.constant 0 : index
      %102 = vector.load %arg5[%101, %c0_69, %c0_70] : memref<32x16x2xf32, #tpu.memory_space<vmem>>, vector<32x16x2xf32>
      %103 = vector.shape_cast %92 : vector<16x2xf32> to vector<1x16x2xf32>
      %104 = vector.broadcast %103 : vector<1x16x2xf32> to vector<32x16x2xf32>
      %105 = arith.mulf %102, %104 : vector<32x16x2xf32>
      %cst_71 = arith.constant dense<0.000000e+00> : vector<32x2xf32>
      %106 = vector.multi_reduction <add>, %105, %cst_71 [1] : vector<32x16x2xf32> to vector<32x2xf32>
      %107 = arith.index_cast %100 : i32 to index
      %c0_72 = arith.constant 0 : index
      %108 = vector.load %arg7[%107, %c0_72] : memref<32x2xf32, #tpu.memory_space<vmem>>, vector<32x2xf32>
      %109 = arith.addf %108, %106 : vector<32x2xf32>
      %c0_73 = arith.constant 0 : index
      %c0_74 = arith.constant 0 : index
      %110 = vector.load %arg8[%c0_73, %c0_74] : memref<1x2xf32, #tpu.memory_space<vmem>>, vector<1x2xf32>
      %cst_75 = arith.constant dense<0xFF800000> : vector<2xf32>
      %111 = vector.multi_reduction <maximumf>, %109, %cst_75 [0] : vector<32x2xf32> to vector<2xf32>
      %112 = vector.shape_cast %111 : vector<2xf32> to vector<1x2xf32>
      %113 = arith.maximumf %110, %112 : vector<1x2xf32>
      %114 = arith.subf %110, %113 : vector<1x2xf32>
      %115 = math.exp %114 : vector<1x2xf32>
      %116 = vector.broadcast %113 : vector<1x2xf32> to vector<32x2xf32>
      %117 = arith.subf %109, %116 : vector<32x2xf32>
      %118 = math.exp %117 : vector<32x2xf32>
      %c0_76 = arith.constant 0 : index
      %c0_77 = arith.constant 0 : index
      %119 = vector.load %arg9[%c0_76, %c0_77] : memref<1x2xf32, #tpu.memory_space<vmem>>, vector<1x2xf32>
      %120 = arith.mulf %115, %119 : vector<1x2xf32>
      %cst_78 = arith.constant dense<0.000000e+00> : vector<2xf32>
      %121 = vector.multi_reduction <add>, %118, %cst_78 [0] : vector<32x2xf32> to vector<2xf32>
      %122 = vector.shape_cast %121 : vector<2xf32> to vector<1x2xf32>
      %123 = arith.addf %120, %122 : vector<1x2xf32>
      %c0_79 = arith.constant 0 : index
      %c0_80 = arith.constant 0 : index
      %124 = vector.load %arg9[%c0_79, %c0_80] : memref<1x2xf32, #tpu.memory_space<vmem>>, vector<1x2xf32>
      tpu.vector_store %arg9[%c0_79, %c0_80], %123 {strides = array<i32>} : memref<1x2xf32, #tpu.memory_space<vmem>>, vector<1x2xf32>,
      %c0_81 = arith.constant 0 : index
      %c0_82 = arith.constant 0 : index
      %125 = vector.load %arg10[%c0_81, %c0_82] : memref<16x2xf32, #tpu.memory_space<vmem>>, vector<16x2xf32>
      %126 = vector.broadcast %115 : vector<1x2xf32> to vector<16x2xf32>
      %127 = arith.mulf %126, %125 : vector<16x2xf32>
      %128 = vector.shape_cast %118 : vector<32x2xf32> to vector<32x1x2xf32>
      %129 = vector.broadcast %128 : vector<32x1x2xf32> to vector<32x16x2xf32>
      %130 = arith.mulf %129, %102 : vector<32x16x2xf32>
      %cst_83 = arith.constant dense<0.000000e+00> : vector<16x2xf32>
      %131 = vector.multi_reduction <add>, %130, %cst_83 [0] : vector<32x16x2xf32> to vector<16x2xf32>
      %132 = arith.addf %127, %131 : vector<16x2xf32>
      %c0_84 = arith.constant 0 : index
      %c0_85 = arith.constant 0 : index
      %133 = vector.load %arg10[%c0_84, %c0_85] : memref<16x2xf32, #tpu.memory_space<vmem>>, vector<16x2xf32>
      tpu.vector_store %arg10[%c0_84, %c0_85], %132 {strides = array<i32>} : memref<16x2xf32, #tpu.memory_space<vmem>>, vector<16x2xf32>,
      %c0_86 = arith.constant 0 : index
      %c0_87 = arith.constant 0 : index
      %134 = vector.load %arg8[%c0_86, %c0_87] : memref<1x2xf32, #tpu.memory_space<vmem>>, vector<1x2xf32>
      tpu.vector_store %arg8[%c0_86, %c0_87], %113 {strides = array<i32>} : memref<1x2xf32, #tpu.memory_space<vmem>>, vector<1x2xf32>,
      %c1_i32_88 = arith.constant 1 : i32
      %c0_89 = arith.constant 0 : index
      %c0_90 = arith.constant 0 : index
      %135 = vector.load %arg10[%c0_89, %c0_90] : memref<16x2xf32, #tpu.memory_space<vmem>>, vector<16x2xf32>
      %c0_91 = arith.constant 0 : index
      %c0_92 = arith.constant 0 : index
      %136 = vector.load %arg9[%c0_91, %c0_92] : memref<1x2xf32, #tpu.memory_space<vmem>>, vector<1x2xf32>
      %137 = vector.broadcast %136 : vector<1x2xf32> to vector<16x2xf32>
      %138 = arith.divf %135, %137 : vector<16x2xf32>
      %139 = arith.mulf %138, %138 : vector<16x2xf32>
      %cst_93 = arith.constant dense<0.000000e+00> : vector<2xf32>
      %140 = vector.multi_reduction <add>, %139, %cst_93 [0] : vector<16x2xf32> to vector<2xf32>
      %141 = vector.shape_cast %140 : vector<2xf32> to vector<1x2xf32>
      %cst_94 = arith.constant 1.000000e+00 : f32
      %142 = vector.broadcast %cst_94 : f32 to vector<1x2xf32>
      %143 = arith.addf %142, %141 : vector<1x2xf32>
      %144 = arith.divf %141, %143 : vector<1x2xf32>
      %145 = vector.broadcast %144 : vector<1x2xf32> to vector<16x2xf32>
      %146 = arith.mulf %145, %138 : vector<16x2xf32>
      %147 = math.rsqrt %141 : vector<1x2xf32>
      %148 = vector.broadcast %147 : vector<1x2xf32> to vector<16x2xf32>
      %149 = arith.mulf %146, %148 : vector<16x2xf32>
      %c0_95 = arith.constant 0 : index
      %c0_96 = arith.constant 0 : index
      %c0_97 = arith.constant 0 : index
      %150 = vector.load %arg4[%c0_95, %c0_96, %c0_97] : memref<1x16x2xf32, #tpu.memory_space<vmem>>, vector<1x16x2xf32>
      %151 = vector.shape_cast %150 : vector<1x16x2xf32> to vector<16x2xf32>
      %152 = vector.shape_cast %149 : vector<16x2xf32> to vector<1x16x2xf32>
      tpu.vector_store %arg4[%c0_95, %c0_96, %c0_97], %152 {strides = array<i32>} : memref<1x16x2xf32, #tpu.memory_space<vmem>>, vector<1x16x2xf32>,
    } else {
    }
    return
  }
  func.func @transform_0(%arg0: i32, %arg1: i32) -> (i32, i32, i32) {
    %c0_i32 = arith.constant 0 : i32
    %c0_i32_0 = arith.constant 0 : i32
    %c0_i32_1 = arith.constant 0 : i32
    %c0_i32_2 = arith.constant 0 : i32
    return %c0_i32, %c0_i32_0, %c0_i32_1 : i32, i32, i32
  }
  func.func @transform_1(%arg0: i32, %arg1: i32) -> (i32, i32, i32, i32) {
    %c0_i32 = arith.constant 0 : i32
    %c0_i32_0 = arith.constant 0 : i32
    %c0_i32_1 = arith.constant 0 : i32
    return %arg0, %arg1, %c0_i32, %c0_i32_0 : i32, i32, i32, i32
  }
  func.func @transform_2(%arg0: i32, %arg1: i32) -> (i32, i32, i32) {
    %c0_i32 = arith.constant 0 : i32
    %c0_i32_0 = arith.constant 0 : i32
    %c0_i32_1 = arith.constant 0 : i32
    return %arg0, %c0_i32, %c0_i32_0 : i32, i32, i32
  }
}

</mosaic_0001>

<bundles_post_ra>
// kernel: tpu_custom_call.1
= control target key start
LH: loop header
LB: loop body
LE: loop exit
PB: predicated region body
PF: predicated region fallthrough
CT: control target
= control target key end

     0   :  { %s20871_s9 = smov 0   ;;  %s20873_s10 = smov 0   ;;  %s24708_s0 = inlined_call_operand.vmem [shape: f32[32,8,2], index: 0, kind: input, shape index: {}]   ;;  %s24709_s1 = inlined_call_operand.vmem [shape: f32[4,32,16,8], index: 1, kind: input, shape index: {}]   ;;  %s24710_s2 = inlined_call_operand.vmem [shape: f32[4,16,2], index: 2, kind: output, shape index: {}]  }
   0x1   :  { %s20875_s11 = smov 0  }
   0x2 LB: > { %s24_s12 = sadd.s32 1, %s20847_s10  ;;  %p18715_p0 = scmp.ge.s32.totalorder %s20851_s11, 1  ;;  %s20851_s11 = sphi %s20875_s11, %s12_s11   ;;  %s20847_s10 = sphi %s20873_s10, %s24859_s10   ;;  %s20843_s9 = sphi %s20871_s9, %s24858_s9  }
   0x3   : > { %p26_p1 = scmp.ge.s32.totalorder %s24_s12, 4  ;;  %p132_p2 = scmp.lt.s32.totalorder %s20851_s11, 5 }
   0x5   : > { %s24861_s12 = smov (%p26_p1, %s24_s12), 0  ;;  %p133_p3 = pnand %p18715_p0, %p132_p2 }
   0x7   : > { %136 = sbr.rel (%p133_p3) target bundleno = 1565 (0x61d), region = 28 }
   0xe   : > { %v186_v0 = vld [vmem:[%s24708_s0] sm:$0xff]  ;;  %v187_v1 = vld [vmem:[%s24708_s0 + $0x8] sm:$0xff]  ;;  %p160_p4 = scmp.lt.s32.totalorder %s20843_s9, 3  ;;  %vm284_vm0 = vcmask 64512   ;;  %v188_v44 = vld [vmem:[%s24708_s0 + $0x10] sm:$0xff]  ;;  %vm179_vm1 = vcmask 15360  }
   0xf   : > { %v20895_v2 = vand.u32 4294901760, %v186_v0  ;;  %v20897_v3 = vand.u32 4294901760, %v187_v1  ;;  %v189_v46 = vld [vmem:[%s24708_s0 + $0x18] sm:$0xff]  ;;  %v20963_v50 = vand.u32 4294901760, %v188_v44  ;;  %vm16350_vm2 = vcmask 8192  }
  0x10   : > { %s24863_s9 = smov (!%p160_p4, %s20843_s9), 3  ;;  %v20967_v52 = vand.u32 4294901760, %v189_v46  ;;  %vm16804_vm3 = vcmask 1041409   ;;  %vm16806_vm4 = vcmask 1042434   ;;  %vm16808_vm5 = vcmask 1043459  }
  0x11   : > { %19302 = vmatprep.subr.mxu0 %v20895_v2  ;;  %19332 = vmatprep.subr.mxu1 %v20897_v3  ;;  %v379_v4 = vsub.f32 %v186_v0, %v20895_v2  ;;  %v874_v5 = vsub.f32 %v187_v1, %v20897_v3  ;;  %s18724_s17 = sshll.u32 %s24863_s9, 9  ;;  %v1369_v57 = vsub.f32 %v188_v44, %v20963_v50  ;;  %vm16810_vm6 = vcmask 1044484  }
  0x12   : > { %19303 = vmatpush3.msra.mxu0 %v20895_v2  ;;  %19333 = vmatpush3.msra.mxu1 %v20897_v3  ;;  %s20911_s20 = scalar_lea.vmem %s24709_s1, %s18724_s17  ;;  %v1864_v59 = vsub.f32 %v189_v46, %v20967_v52  ;;  %vm16812_vm7 = vcmask 1045509   ;;  %vm16814_vm8 = vcmask 1046534   ;;  %vm16816_vm9 = vcmask 1047559  }
  0x13   : > { %v20913_v6 = vand.u32 4294901760, %v379_v4  ;;  %v20915_v7 = vand.u32 4294901760, %v874_v5  ;;  %v220_v8 = vld [vmem:[%s20911_s20] sm:$0xff]  ;;  %v222_v9 = vld [vmem:[%s20911_s20 + $0x10] sm:$0xff]  ;;  %v221_v10 = vld [vmem:[%s20911_s20 + $0x8] sm:$0xff]  ;;  %v20996_v63 = vand.u32 4294901760, %v1369_v57 }
  0x14   : > { %v286_v11 = vsel %vm284_vm0, %v220_v8, 0  ;;  %v781_v13 = vsel %vm284_vm0, %v222_v9, 0  ;;  %v289_v14 = vsel %vm284_vm0, %v221_v10, 0  ;;  %v223_v15 = vld [vmem:[%s20911_s20 + $0x18] sm:$0xff]  ;;  %v224_v40 = vld [vmem:[%s20911_s20 + $0x20] sm:$0xff]  ;;  %v226_v41 = vld [vmem:[%s20911_s20 + $0x30] sm:$0xff] }
  0x15   : > { %v381_v12 = vsub.f32 %v379_v4, %v20913_v6  ;;  %v20925_v16 = vand.u32 4294901760, %v286_v11  ;;  %v20927_v17 = vand.u32 4294901760, %v781_v13  ;;  %v20929_v18 = vand.u32 4294901760, %v289_v14  ;;  %v225_v42 = vld [vmem:[%s20911_s20 + $0x28] sm:$0xff]  ;;  %v227_v43 = vld [vmem:[%s20911_s20 + $0x38] sm:$0xff] }
  0x16   : > { %v784_v19 = vsel %vm284_vm0, %v223_v15, 0  ;;  %v876_v22 = vsub.f32 %v874_v5, %v20915_v7  ;;  %v1276_v45 = vsel %vm284_vm0, %v224_v40, 0  ;;  %v1771_v47 = vsel %vm284_vm0, %v226_v41, 0 }
  0x17   : > { %v382_v20 = vand.u32 4294901760, %v381_v12  ;;  %v20932_v21 = vand.u32 4294901760, %v784_v19  ;;  %v358_v23 = vsub.f32 %v286_v11, %v20925_v16  ;;  %v853_v24 = vsub.f32 %v781_v13, %v20927_v17 }
  0x18   : > { %v368_v25 = vsub.f32 %v289_v14, %v20929_v18  ;;  %v877_v27 = vand.u32 4294901760, %v876_v22  ;;  %v1279_v48 = vsel %vm284_vm0, %v225_v42, 0  ;;  %v1774_v49 = vsel %vm284_vm0, %v227_v43, 0  ;;  %v191_v22 = vld [vmem:[%s24708_s0 + $0x28] sm:$0xff] }
  0x19   : > { %19307 = vmatprep.subr.mxu0 %v382_v20  ;;  %v863_v26 = vsub.f32 %v784_v19, %v20932_v21  ;;  %v359_v28 = vand.u32 4294901760, %v358_v23  ;;  %v854_v29 = vand.u32 4294901760, %v853_v24  ;;  %v20965_v51 = vand.u32 4294901760, %v1276_v45  ;;  %v231_v19 = vld [vmem:[%s20911_s20 + $0x58] sm:$0xff] }
  0x1a   : > { %v369_v30 = vand.u32 4294901760, %v368_v25  ;;  %19337 = vmatprep.subr.mxu1 %v877_v27  ;;  %v20969_v53 = vand.u32 4294901760, %v1771_v47  ;;  %v20971_v54 = vand.u32 4294901760, %v1279_v48  ;;  %v20973_v55 = vand.u32 4294901760, %v1774_v49 }
  0x1b   : > { %v864_v31 = vand.u32 4294901760, %v863_v26  ;;  %v360_v32 = vsub.f32 %v358_v23, %v359_v28  ;;  %v855_v33 = vsub.f32 %v853_v24, %v854_v29  ;;  %v20980_v56 = vsub.f32 %v1276_v45, %v20965_v51 }
  0x1c   : > { %v370_v34 = vsub.f32 %v368_v25, %v369_v30  ;;  %v20986_v58 = vsub.f32 %v1771_v47, %v20969_v53  ;;  %v20990_v60 = vsub.f32 %v1279_v48, %v20971_v54  ;;  %v20993_v61 = vsub.f32 %v1774_v49, %v20973_v55 }
  0x1d   : > { %v865_v35 = vsub.f32 %v863_v26, %v864_v31  ;;  %v361_v36 = vand.u32 4294901760, %v360_v32  ;;  %v856_v37 = vand.u32 4294901760, %v855_v33  ;;  %v1349_v62 = vand.u32 4294901760, %v20980_v56 }
  0x1e   : > { %v371_v38 = vand.u32 4294901760, %v370_v34  ;;  %v1844_v0 = vand.u32 4294901760, %v20986_v58  ;;  %v20999_v1 = vand.u32 4294901760, %v1864_v59 }
  0x1f   : > { %v866_v39 = vand.u32 4294901760, %v865_v35  ;;  %19304 = vmatprep.mubr.f32.mxu0 %v361_v36  ;;  %19334 = vmatprep.mubr.f32.mxu1 %v856_v37 }
  0x20   : > { %19305 = vmatmul.mubr.f32.vlgmr.msra.gmra.mrb[0].mxu0 %v371_v38  ;;  %v1845_v8 = vsub.f32 %v20986_v58, %v1844_v0  ;;  %v1866_v9 = vsub.f32 %v1864_v59, %v20999_v1 }
  0x21   : > { %19335 = vmatmul.mubr.f32.vlgmr.msra.gmra.mrb[0].mxu1 %v866_v39  ;;  %19308 = vmatpush3.msra.mxu0 %v382_v20  ;;  %v190_v20 = vld [vmem:[%s24708_s0 + $0x20] sm:$0xff] }
  0x22   : > { %19338 = vmatpush3.msra.mxu1 %v877_v27  ;;  %19309 = vmatprep.mubr.f32.mxu0 %v20925_v16  ;;  %v1846_v12 = vand.u32 4294901760, %v1845_v8  ;;  %v1867_v13 = vand.u32 4294901760, %v1866_v9 }
  0x23   : > { %19312 = vmatprep.subr.mxu0 %v379_v4  ;;  %19339 = vmatprep.mubr.f32.mxu1 %v20927_v17 }
  0x24   : > { %19342 = vmatprep.subr.mxu1 %v874_v5 }
  0x28   : > { %19310 = vmatmul.mubr.f32.vlgmr.msra.gmra.mrb[0].mxu0 %v20929_v18 }
  0x29   : > { %19340 = vmatmul.mubr.f32.vlgmr.msra.gmra.mrb[0].mxu1 %v20932_v21  ;;  %19313 = vmatpush3.msra.mxu0 %v379_v4  ;;  %v1359_v4 = vand.u32 4294901760, %v20990_v60 }
  0x2a   : > { %19343 = vmatpush3.msra.mxu1 %v874_v5  ;;  %19314 = vmatprep.mubr.f32.mxu0 %v358_v23  ;;  %v1854_v5 = vand.u32 4294901760, %v20993_v61 }
  0x2b   : > { %19317 = vmatprep.subr.mxu0 %v20895_v2  ;;  %19344 = vmatprep.mubr.f32.mxu1 %v853_v24 }
  0x2c   : > { %19347 = vmatprep.subr.mxu1 %v20897_v3 }
  0x30   : > { %19315 = vmatmul.mubr.f32.vlgmr.msra.gmra.mrb[0].mxu0 %v368_v25  ;;  %v2764_v25 = vsel %vm284_vm0, %v231_v19, 0 }
  0x31   : > { %19345 = vmatmul.mubr.f32.vlgmr.msra.gmra.mrb[0].mxu1 %v863_v26  ;;  %19318 = vmatpush3.msra.mxu0 %v20895_v2  ;;  %v21053_v26 = vand.u32 4294901760, %v190_v20 }
  0x32   : > { %19348 = vmatpush3.msra.mxu1 %v20897_v3  ;;  %19319 = vmatprep.mubr.f32.mxu0 %v359_v28  ;;  %v21057_v28 = vand.u32 4294901760, %v191_v22 }
  0x33   : > { %19322 = vmatprep.subr.mxu0 %v20913_v6  ;;  %19349 = vmatprep.mubr.f32.mxu1 %v854_v29  ;;  %v2359_v33 = vsub.f32 %v190_v20, %v21053_v26 }
  0x34   : > { %19352 = vmatprep.subr.mxu1 %v20915_v7  ;;  %v2854_v35 = vsub.f32 %v191_v22, %v21057_v28 }
  0x35   : > { %v21090_v39 = vand.u32 4294901760, %v2359_v33 }
  0x36   : > { %v21093_v41 = vand.u32 4294901760, %v2854_v35 }
  0x37   : > { %v2361_v45 = vsub.f32 %v2359_v33, %v21090_v39 }
  0x38   : > { %19320 = vmatmul.mubr.f32.vlgmr.msra.gmra.mrb[0].mxu0 %v369_v30  ;;  %v2856_v47 = vsub.f32 %v2854_v35, %v21093_v41 }
  0x39   : > { %19350 = vmatmul.mubr.f32.vlgmr.msra.gmra.mrb[0].mxu1 %v864_v31  ;;  %19323 = vmatpush3.msra.mxu0 %v20913_v6  ;;  %v1350_v6 = vsub.f32 %v20980_v56, %v1349_v62  ;;  %v21067_v31 = vand.u32 4294901760, %v2764_v25 }
  0x3a   : > { %19353 = vmatpush3.msra.mxu1 %v20915_v7  ;;  %19324 = vmatprep.mubr.f32.mxu0 %v20925_v16  ;;  %v1371_v7 = vsub.f32 %v1369_v57, %v20996_v63 }
  0x3b   : > { %19327 = vmatprep.subr.mxu0 %v20895_v2  ;;  %19354 = vmatprep.mubr.f32.mxu1 %v20927_v17  ;;  %v1351_v10 = vand.u32 4294901760, %v1350_v6  ;;  %v21087_v37 = vsub.f32 %v2764_v25, %v21067_v31 }
  0x3c   : > { %19357 = vmatprep.subr.mxu1 %v20897_v3  ;;  %v1372_v11 = vand.u32 4294901760, %v1371_v7 }
  0x3d   : > { %v2844_v43 = vand.u32 4294901760, %v21087_v37 }
  0x3f   : > { %v2845_v49 = vsub.f32 %v21087_v37, %v2844_v43 }
  0x40   : > { %19325 = vmatmul.mubr.f32.vlgmr.msra.gmra.mrb[0].mxu0 %v20929_v18 }
  0x41   : > { %19355 = vmatmul.mubr.f32.vlgmr.msra.gmra.mrb[0].mxu1 %v20932_v21  ;;  %19328 = vmatpush3.msra.mxu0 %v20895_v2  ;;  %v1360_v2 = vsub.f32 %v20990_v60, %v1359_v4 }
  0x42   : > { %19358 = vmatpush3.msra.mxu1 %v20897_v3  ;;  %19329 = vmatprep.mubr.f32.mxu0 %v20925_v16  ;;  %v1855_v3 = vsub.f32 %v20993_v61, %v1854_v5  ;;  %v228_v16 = vld [vmem:[%s20911_s20 + $0x40] sm:$0xff] }
  0x43   : > { %19359 = vmatprep.mubr.f32.mxu1 %v20927_v17  ;;  %19362 = vmatprep.subr.mxu0 %v20963_v50  ;;  %v1361_v14 = vand.u32 4294901760, %v1360_v2  ;;  %v230_v17 = vld [vmem:[%s20911_s20 + $0x50] sm:$0xff] }
  0x44   : > { %19392 = vmatprep.subr.mxu1 %v20967_v52  ;;  %v1856_v15 = vand.u32 4294901760, %v1855_v3  ;;  %v2761_v23 = vsel %vm284_vm0, %v230_v17, 0 }
  0x45   : > { %v21059_v29 = vand.u32 4294901760, %v2761_v23 }
  0x47   : > { %v21080_v34 = vsub.f32 %v2761_v23, %v21059_v29 }
  0x48   : > { %19330 = vmatmul.mubr.f32.vlgmr.msra.gmra.mrb[0].mxu0 %v20929_v18  ;;  %v229_v18 = vld [vmem:[%s20911_s20 + $0x48] sm:$0xff] }
  0x49   : > { %19360 = vmatmul.mubr.f32.vlgmr.msra.gmra.mrb[0].mxu1 %v20932_v21  ;;  %19363 = vmatpush3.msra.mxu0 %v20963_v50  ;;  %v2266_v21 = vsel %vm284_vm0, %v228_v16, 0  ;;  %v2269_v24 = vsel %vm284_vm0, %v229_v18, 0  ;;  %v2834_v40 = vand.u32 4294901760, %v21080_v34 }
  0x4a   : > { %19393 = vmatpush3.msra.mxu1 %v20967_v52  ;;  %19364 = vmatprep.mubr.f32.mxu0 %v1351_v10  ;;  %v21055_v27 = vand.u32 4294901760, %v2266_v21  ;;  %v21065_v30 = vand.u32 4294901760, %v2269_v24 }
  0x4b   : > { %19367 = vmatprep.subr.mxu0 %v1372_v11  ;;  %19394 = vmatprep.mubr.f32.mxu1 %v1846_v12  ;;  %v2835_v46 = vsub.f32 %v21080_v34, %v2834_v40 }
  0x4c   : > { %19397 = vmatprep.subr.mxu1 %v1867_v13  ;;  %19365 = vmatmul.mubr.f32.vlgmr.msra.gmra.mrb[2].mxu0 %v1361_v14  ;;  %v21074_v32 = vsub.f32 %v2266_v21, %v21055_v27  ;;  %v21084_v36 = vsub.f32 %v2269_v24, %v21065_v30 }
  0x4d   : > { %19395 = vmatmul.mubr.f32.vlgmr.msra.gmra.mrb[2].mxu1 %v1856_v15  ;;  %19368 = vmatpush3.msra.mxu0 %v1372_v11 }
  0x4e   : > { %19398 = vmatpush3.msra.mxu1 %v1867_v13  ;;  %19369 = vmatprep.mubr.f32.mxu0 %v20965_v51  ;;  %v2339_v38 = vand.u32 4294901760, %v21074_v32  ;;  %v2349_v42 = vand.u32 4294901760, %v21084_v36 }
  0x4f   : > { %19372 = vmatprep.subr.mxu0 %v1369_v57  ;;  %19399 = vmatprep.mubr.f32.mxu1 %v20969_v53 }
  0x50   : > { %19402 = vmatprep.subr.mxu1 %v1864_v59  ;;  %v2340_v44 = vsub.f32 %v21074_v32, %v2339_v38  ;;  %v2350_v48 = vsub.f32 %v21084_v36, %v2349_v42 }
  0x54   : > { %19370 = vmatmul.mubr.f32.vlgmr.msra.gmra.mrb[2].mxu0 %v20971_v54 }
  0x55   : > { %19400 = vmatmul.mubr.f32.vlgmr.msra.gmra.mrb[2].mxu1 %v20973_v55  ;;  %19373 = vmatpush3.msra.mxu0 %v1369_v57  ;;  %v2846_v57 = vand.u32 4294901760, %v2845_v49 }
  0x56   : > { %19403 = vmatpush3.msra.mxu1 %v1864_v59  ;;  %19374 = vmatprep.mubr.f32.mxu0 %v20980_v56  ;;  %v2351_v56 = vand.u32 4294901760, %v2350_v48  ;;  %v235_v59 = vld [vmem:[%s20911_s20 + $0x78] sm:$0xff] }
  0x57   : > { %19377 = vmatprep.subr.mxu0 %v20963_v50  ;;  %19404 = vmatprep.mubr.f32.mxu1 %v20986_v58  ;;  %v233_v58 = vld [vmem:[%s20911_s20 + $0x68] sm:$0xff] }
  0x58   : > { %19407 = vmatprep.subr.mxu1 %v20967_v52 }
  0x5c   : > { %19375 = vmatmul.mubr.f32.vlgmr.msra.gmra.mrb[2].mxu0 %v20990_v60  ;;  %v192_v60 = vld [vmem:[%s24708_s0 + $0x30] sm:$0xff] }
  0x5d   : > { %19405 = vmatmul.mubr.f32.vlgmr.msra.gmra.mrb[2].mxu1 %v20993_v61  ;;  %19378 = vmatpush3.msra.mxu0 %v20963_v50 }
  0x5e   : > { %19408 = vmatpush3.msra.mxu1 %v20967_v52  ;;  %19379 = vmatprep.mubr.f32.mxu0 %v1349_v62  ;;  %v193_v62 = vld [vmem:[%s24708_s0 + $0x38] sm:$0xff] }
  0x5f   : > { %19382 = vmatprep.subr.mxu0 %v20996_v63  ;;  %19409 = vmatprep.mubr.f32.mxu1 %v1844_v0  ;;  %v3259_v0 = vsel %vm284_vm0, %v233_v58, 0  ;;  %v21151_v6 = vand.u32 4294901760, %v193_v62 }
  0x60   : > { %19412 = vmatprep.subr.mxu1 %v20999_v1  ;;  %v21159_v8 = vand.u32 4294901760, %v3259_v0 }
  0x61   : > { %v3844_v11 = vsub.f32 %v193_v62, %v21151_v6 }
  0x62   : > { %v21178_v12 = vsub.f32 %v3259_v0, %v21159_v8 }
  0x63   : > { %v21187_v17 = vand.u32 4294901760, %v3844_v11 }
  0x64   : > { %19380 = vmatmul.mubr.f32.vlgmr.msra.gmra.mrb[2].mxu0 %v1359_v4  ;;  %v21147_v4 = vand.u32 4294901760, %v192_v60  ;;  %v3339_v18 = vand.u32 4294901760, %v21178_v12 }
  0x65   : > { %19410 = vmatmul.mubr.f32.vlgmr.msra.gmra.mrb[2].mxu1 %v1854_v5  ;;  %19383 = vmatpush3.msra.mxu0 %v20996_v63  ;;  %v3846_v23 = vsub.f32 %v3844_v11, %v21187_v17 }
  0x66   : > { %19413 = vmatpush3.msra.mxu1 %v20999_v1  ;;  %19384 = vmatprep.mubr.f32.mxu0 %v20965_v51  ;;  %v3754_v1 = vsel %vm284_vm0, %v235_v59, 0  ;;  %v3349_v3 = vsub.f32 %v192_v60, %v21147_v4  ;;  %v3340_v24 = vsub.f32 %v21178_v12, %v3339_v18 }
  0x67   : > { %19387 = vmatprep.subr.mxu0 %v20963_v50  ;;  %19414 = vmatprep.mubr.f32.mxu1 %v20969_v53  ;;  %v21161_v9 = vand.u32 4294901760, %v3754_v1 }
  0x68   : > { %19417 = vmatprep.subr.mxu1 %v20967_v52  ;;  %v21184_v15 = vand.u32 4294901760, %v3349_v3 }
  0x69   : > { %v21181_v13 = vsub.f32 %v3754_v1, %v21161_v9 }
  0x6a   : > { %v3351_v21 = vsub.f32 %v3349_v3, %v21184_v15 }
  0x6b   : > { %v3834_v19 = vand.u32 4294901760, %v21181_v13 }
  0x6c   : > { %19385 = vmatmul.mubr.f32.vlgmr.msra.gmra.mrb[2].mxu0 %v20971_v54 }
  0x6d   : > { %19415 = vmatmul.mubr.f32.vlgmr.msra.gmra.mrb[2].mxu1 %v20973_v55  ;;  %19388 = vmatpush3.msra.mxu0 %v20963_v50  ;;  %v2341_v50 = vand.u32 4294901760, %v2340_v44  ;;  %v3835_v25 = vsub.f32 %v21181_v13, %v3834_v19 }
  0x6e   : > { %19418 = vmatpush3.msra.mxu1 %v20967_v52  ;;  %19389 = vmatprep.mubr.f32.mxu0 %v20965_v51  ;;  %v2362_v51 = vand.u32 4294901760, %v2361_v45  ;;  %v2836_v52 = vand.u32 4294901760, %v2835_v46 }
  0x6f   : > { %19419 = vmatprep.mubr.f32.mxu1 %v20969_v53  ;;  %19422 = vmatprep.subr.mxu0 %v21053_v26  ;;  %v2857_v53 = vand.u32 4294901760, %v2856_v47 }
  0x70   : > { %19452 = vmatprep.subr.mxu1 %v21057_v28 }
  0x74   : > { %19390 = vmatmul.mubr.f32.vlgmr.msra.gmra.mrb[2].mxu0 %v20971_v54  ;;  %v232_v54 = vld [vmem:[%s20911_s20 + $0x60] sm:$0xff] }
  0x75   : > { %19420 = vmatmul.mubr.f32.vlgmr.msra.gmra.mrb[2].mxu1 %v20973_v55  ;;  %19423 = vmatpush3.msra.mxu0 %v21053_v26  ;;  %v234_v55 = vld [vmem:[%s20911_s20 + $0x70] sm:$0xff]  ;;  %v3256_v61 = vsel %vm284_vm0, %v232_v54, 0 }
  0x76   : > { %19453 = vmatpush3.msra.mxu1 %v21057_v28  ;;  %19424 = vmatprep.mubr.f32.mxu0 %v2341_v50  ;;  %v3751_v63 = vsel %vm284_vm0, %v234_v55, 0  ;;  %v21149_v5 = vand.u32 4294901760, %v3256_v61 }
  0x77   : > { %19427 = vmatprep.subr.mxu0 %v2362_v51  ;;  %19454 = vmatprep.mubr.f32.mxu1 %v2836_v52  ;;  %v21153_v7 = vand.u32 4294901760, %v3751_v63 }
  0x78   : > { %19457 = vmatprep.subr.mxu1 %v2857_v53  ;;  %19425 = vmatmul.mubr.f32.vlgmr.msra.gmra.mrb[4].mxu0 %v2351_v56  ;;  %v21168_v2 = vsub.f32 %v3256_v61, %v21149_v5 }
  0x79   : > { %19455 = vmatmul.mubr.f32.vlgmr.msra.gmra.mrb[4].mxu1 %v2846_v57  ;;  %19428 = vmatpush3.msra.mxu0 %v2362_v51  ;;  %v21174_v10 = vsub.f32 %v3751_v63, %v21153_v7 }
  0x7a   : > { %19458 = vmatpush3.msra.mxu1 %v2857_v53  ;;  %19429 = vmatprep.mubr.f32.mxu0 %v21055_v27  ;;  %v3329_v14 = vand.u32 4294901760, %v21168_v2 }
  0x7b   : > { %19432 = vmatprep.subr.mxu0 %v2359_v33  ;;  %19459 = vmatprep.mubr.f32.mxu1 %v21059_v29  ;;  %v3824_v16 = vand.u32 4294901760, %v21174_v10 }
  0x7c   : > { %19462 = vmatprep.subr.mxu1 %v2854_v35  ;;  %v3330_v20 = vsub.f32 %v21168_v2, %v3329_v14 }
  0x7d   : > { %v3825_v22 = vsub.f32 %v21174_v10, %v3824_v16 }
  0x80   : > { %19430 = vmatmul.mubr.f32.vlgmr.msra.gmra.mrb[4].mxu0 %v21065_v30 }
  0x81   : > { %19460 = vmatmul.mubr.f32.vlgmr.msra.gmra.mrb[4].mxu1 %v21067_v31  ;;  %19433 = vmatpush3.msra.mxu0 %v2359_v33  ;;  %v3836_v33 = vand.u32 4294901760, %v3835_v25 }
  0x82   : > { %19463 = vmatpush3.msra.mxu1 %v2854_v35  ;;  %19434 = vmatprep.mubr.f32.mxu0 %v21074_v32  ;;  %v3341_v32 = vand.u32 4294901760, %v3340_v24  ;;  %v239_v35 = vld [vmem:[%s20911_s20 + $0x98] sm:$0xff] }
  0x83   : > { %19437 = vmatprep.subr.mxu0 %v21053_v26  ;;  %19464 = vmatprep.mubr.f32.mxu1 %v21080_v34  ;;  %v237_v34 = vld [vmem:[%s20911_s20 + $0x88] sm:$0xff] }
  0x84   : > { %19467 = vmatprep.subr.mxu1 %v21057_v28 }
  0x88   : > { %19435 = vmatmul.mubr.f32.vlgmr.msra.gmra.mrb[4].mxu0 %v21084_v36  ;;  %v194_v36 = vld [vmem:[%s24708_s0 + $0x40] sm:$0xff] }
  0x89   : > { %19465 = vmatmul.mubr.f32.vlgmr.msra.gmra.mrb[4].mxu1 %v21087_v37  ;;  %19438 = vmatpush3.msra.mxu0 %v21053_v26 }
  0x8a   : > { %19468 = vmatpush3.msra.mxu1 %v21057_v28  ;;  %19439 = vmatprep.mubr.f32.mxu0 %v2339_v38  ;;  %v195_v38 = vld [vmem:[%s24708_s0 + $0x48] sm:$0xff] }
  0x8b   : > { %19442 = vmatprep.subr.mxu0 %v21090_v39  ;;  %19469 = vmatprep.mubr.f32.mxu1 %v2834_v40  ;;  %v4249_v40 = vsel %vm284_vm0, %v237_v34, 0  ;;  %v21245_v44 = vand.u32 4294901760, %v195_v38 }
  0x8c   : > { %19472 = vmatprep.subr.mxu1 %v21093_v41  ;;  %v21253_v46 = vand.u32 4294901760, %v4249_v40 }
  0x8d   : > { %v4834_v51 = vsub.f32 %v195_v38, %v21245_v44 }
  0x8e   : > { %v21272_v52 = vsub.f32 %v4249_v40, %v21253_v46 }
  0x8f   : > { %v21281_v55 = vand.u32 4294901760, %v4834_v51 }
  0x90   : > { %19440 = vmatmul.mubr.f32.vlgmr.msra.gmra.mrb[4].mxu0 %v2349_v42  ;;  %v21241_v42 = vand.u32 4294901760, %v194_v36  ;;  %v4329_v58 = vand.u32 4294901760, %v21272_v52 }
  0x91   : > { %19470 = vmatmul.mubr.f32.vlgmr.msra.gmra.mrb[4].mxu1 %v2844_v43  ;;  %19443 = vmatpush3.msra.mxu0 %v21090_v39  ;;  %v4836_v63 = vsub.f32 %v4834_v51, %v21281_v55 }
  0x92   : > { %19473 = vmatpush3.msra.mxu1 %v21093_v41  ;;  %19444 = vmatprep.mubr.f32.mxu0 %v21055_v27  ;;  %v4744_v41 = vsel %vm284_vm0, %v239_v35, 0  ;;  %v4339_v49 = vsub.f32 %v194_v36, %v21241_v42  ;;  %v4330_v0 = vsub.f32 %v21272_v52, %v4329_v58 }
  0x93   : > { %19447 = vmatprep.subr.mxu0 %v21053_v26  ;;  %19474 = vmatprep.mubr.f32.mxu1 %v21059_v29  ;;  %v21255_v47 = vand.u32 4294901760, %v4744_v41 }
  0x94   : > { %19477 = vmatprep.subr.mxu1 %v21057_v28  ;;  %v21278_v57 = vand.u32 4294901760, %v4339_v49 }
  0x95   : > { %v21275_v53 = vsub.f32 %v4744_v41, %v21255_v47 }
  0x96   : > { %v4341_v61 = vsub.f32 %v4339_v49, %v21278_v57 }
  0x97   : > { %v4824_v59 = vand.u32 4294901760, %v21275_v53 }
  0x98   : > { %19445 = vmatmul.mubr.f32.vlgmr.msra.gmra.mrb[4].mxu0 %v21065_v30 }
  0x99   : > { %19475 = vmatmul.mubr.f32.vlgmr.msra.gmra.mrb[4].mxu1 %v21067_v31  ;;  %19448 = vmatpush3.msra.mxu0 %v21053_v26  ;;  %v3331_v26 = vand.u32 4294901760, %v3330_v20  ;;  %v4825_v1 = vsub.f32 %v21275_v53, %v4824_v59 }
  0x9a   : > { %19478 = vmatpush3.msra.mxu1 %v21057_v28  ;;  %19449 = vmatprep.mubr.f32.mxu0 %v21055_v27  ;;  %v3352_v27 = vand.u32 4294901760, %v3351_v21  ;;  %v3826_v28 = vand.u32 4294901760, %v3825_v22 }
  0x9b   : > { %19479 = vmatprep.mubr.f32.mxu1 %v21059_v29  ;;  %19482 = vmatprep.subr.mxu0 %v21147_v4  ;;  %v3847_v29 = vand.u32 4294901760, %v3846_v23 }
  0x9c   : > { %19512 = vmatprep.subr.mxu1 %v21151_v6 }
  0xa0   : > { %19450 = vmatmul.mubr.f32.vlgmr.msra.gmra.mrb[4].mxu0 %v21065_v30  ;;  %v236_v30 = vld [vmem:[%s20911_s20 + $0x80] sm:$0xff] }
  0xa1   : > { %19480 = vmatmul.mubr.f32.vlgmr.msra.gmra.mrb[4].mxu1 %v21067_v31  ;;  %19483 = vmatpush3.msra.mxu0 %v21147_v4  ;;  %v238_v31 = vld [vmem:[%s20911_s20 + $0x90] sm:$0xff]  ;;  %v4246_v37 = vsel %vm284_vm0, %v236_v30, 0 }
  0xa2   : > { %19513 = vmatpush3.msra.mxu1 %v21151_v6  ;;  %19484 = vmatprep.mubr.f32.mxu0 %v3331_v26  ;;  %v4741_v39 = vsel %vm284_vm0, %v238_v31, 0  ;;  %v21243_v43 = vand.u32 4294901760, %v4246_v37 }
  0xa3   : > { %19487 = vmatprep.subr.mxu0 %v3352_v27  ;;  %19514 = vmatprep.mubr.f32.mxu1 %v3826_v28  ;;  %v21247_v45 = vand.u32 4294901760, %v4741_v39 }
  0xa4   : > { %19517 = vmatprep.subr.mxu1 %v3847_v29  ;;  %19485 = vmatmul.mubr.f32.vlgmr.msra.gmra.mrb[6].mxu0 %v3341_v32  ;;  %v21262_v48 = vsub.f32 %v4246_v37, %v21243_v43 }
  0xa5   : > { %19515 = vmatmul.mubr.f32.vlgmr.msra.gmra.mrb[6].mxu1 %v3836_v33  ;;  %19488 = vmatpush3.msra.mxu0 %v3352_v27  ;;  %v21268_v50 = vsub.f32 %v4741_v39, %v21247_v45 }
  0xa6   : > { %19518 = vmatpush3.msra.mxu1 %v3847_v29  ;;  %19489 = vmatprep.mubr.f32.mxu0 %v21149_v5  ;;  %v4319_v56 = vand.u32 4294901760, %v21262_v48 }
  0xa7   : > { %19492 = vmatprep.subr.mxu0 %v3349_v3  ;;  %19519 = vmatprep.mubr.f32.mxu1 %v21153_v7  ;;  %v4814_v54 = vand.u32 4294901760, %v21268_v50 }
  0xa8   : > { %19522 = vmatprep.subr.mxu1 %v3844_v11  ;;  %v4320_v60 = vsub.f32 %v21262_v48, %v4319_v56 }
  0xa9   : > { %v4815_v62 = vsub.f32 %v21268_v50, %v4814_v54 }
  0xac   : > { %19490 = vmatmul.mubr.f32.vlgmr.msra.gmra.mrb[6].mxu0 %v21159_v8 }
  0xad   : > { %19520 = vmatmul.mubr.f32.vlgmr.msra.gmra.mrb[6].mxu1 %v21161_v9  ;;  %19493 = vmatpush3.msra.mxu0 %v3349_v3  ;;  %v4826_v3 = vand.u32 4294901760, %v4825_v1 }
  0xae   : > { %19523 = vmatpush3.msra.mxu1 %v3844_v11  ;;  %19494 = vmatprep.mubr.f32.mxu0 %v21168_v2  ;;  %v4331_v2 = vand.u32 4294901760, %v4330_v0  ;;  %v243_v11 = vld [vmem:[%s20911_s20 + $0xb8] sm:$0xff] }
  0xaf   : > { %19497 = vmatprep.subr.mxu0 %v21147_v4  ;;  %19524 = vmatprep.mubr.f32.mxu1 %v21174_v10  ;;  %v241_v10 = vld [vmem:[%s20911_s20 + $0xa8] sm:$0xff] }
  0xb0   : > { %19527 = vmatprep.subr.mxu1 %v21151_v6 }
  0xb4   : > { %19495 = vmatmul.mubr.f32.vlgmr.msra.gmra.mrb[6].mxu0 %v21178_v12  ;;  %v196_v12 = vld [vmem:[%s24708_s0 + $0x50] sm:$0xff] }
  0xb5   : > { %19525 = vmatmul.mubr.f32.vlgmr.msra.gmra.mrb[6].mxu1 %v21181_v13  ;;  %19498 = vmatpush3.msra.mxu0 %v21147_v4 }
  0xb6   : > { %19528 = vmatpush3.msra.mxu1 %v21151_v6  ;;  %19499 = vmatprep.mubr.f32.mxu0 %v3329_v14  ;;  %v197_v14 = vld [vmem:[%s24708_s0 + $0x58] sm:$0xff] }
  0xb7   : > { %19502 = vmatprep.subr.mxu0 %v21184_v15  ;;  %19529 = vmatprep.mubr.f32.mxu1 %v3824_v16  ;;  %v5239_v16 = vsel %vm284_vm0, %v241_v10, 0  ;;  %v21339_v20 = vand.u32 4294901760, %v197_v14 }
  0xb8   : > { %19532 = vmatprep.subr.mxu1 %v21187_v17  ;;  %v21347_v22 = vand.u32 4294901760, %v5239_v16 }
  0xb9   : > { %v5824_v27 = vsub.f32 %v197_v14, %v21339_v20 }
  0xba   : > { %v21366_v28 = vsub.f32 %v5239_v16, %v21347_v22 }
  0xbb   : > { %v21375_v31 = vand.u32 4294901760, %v5824_v27 }
  0xbc   : > { %19500 = vmatmul.mubr.f32.vlgmr.msra.gmra.mrb[6].mxu0 %v3339_v18  ;;  %v21335_v18 = vand.u32 4294901760, %v196_v12  ;;  %v5319_v34 = vand.u32 4294901760, %v21366_v28 }
  0xbd   : > { %19530 = vmatmul.mubr.f32.vlgmr.msra.gmra.mrb[6].mxu1 %v3834_v19  ;;  %19503 = vmatpush3.msra.mxu0 %v21184_v15  ;;  %v5826_v39 = vsub.f32 %v5824_v27, %v21375_v31 }
  0xbe   : > { %19533 = vmatpush3.msra.mxu1 %v21187_v17  ;;  %19504 = vmatprep.mubr.f32.mxu0 %v21149_v5  ;;  %v5734_v17 = vsel %vm284_vm0, %v243_v11, 0  ;;  %v5329_v25 = vsub.f32 %v196_v12, %v21335_v18  ;;  %v5320_v40 = vsub.f32 %v21366_v28, %v5319_v34 }
  0xbf   : > { %19507 = vmatprep.subr.mxu0 %v21147_v4  ;;  %19534 = vmatprep.mubr.f32.mxu1 %v21153_v7  ;;  %v21349_v23 = vand.u32 4294901760, %v5734_v17 }
  0xc0   : > { %19537 = vmatprep.subr.mxu1 %v21151_v6  ;;  %v21372_v33 = vand.u32 4294901760, %v5329_v25 }
  0xc1   : > { %v21369_v29 = vsub.f32 %v5734_v17, %v21349_v23 }
  0xc2   : > { %v5331_v37 = vsub.f32 %v5329_v25, %v21372_v33 }
  0xc3   : > { %v5814_v35 = vand.u32 4294901760, %v21369_v29 }
  0xc4   : > { %19505 = vmatmul.mubr.f32.vlgmr.msra.gmra.mrb[6].mxu0 %v21159_v8 }
  0xc5   : > { %19535 = vmatmul.mubr.f32.vlgmr.msra.gmra.mrb[6].mxu1 %v21161_v9  ;;  %19508 = vmatpush3.msra.mxu0 %v21147_v4  ;;  %v4321_v4 = vand.u32 4294901760, %v4320_v60  ;;  %v5815_v41 = vsub.f32 %v21369_v29, %v5814_v35 }
  0xc6   : > { %19538 = vmatpush3.msra.mxu1 %v21151_v6  ;;  %19509 = vmatprep.mubr.f32.mxu0 %v21149_v5  ;;  %v4342_v5 = vand.u32 4294901760, %v4341_v61  ;;  %v4816_v6 = vand.u32 4294901760, %v4815_v62 }
  0xc7   : > { %19539 = vmatprep.mubr.f32.mxu1 %v21153_v7  ;;  %19542 = vmatprep.subr.mxu0 %v21241_v42  ;;  %v4837_v7 = vand.u32 4294901760, %v4836_v63 }
  0xc8   : > { %19572 = vmatprep.subr.mxu1 %v21245_v44 }
  0xcc   : > { %19510 = vmatmul.mubr.f32.vlgmr.msra.gmra.mrb[6].mxu0 %v21159_v8  ;;  %v240_v8 = vld [vmem:[%s20911_s20 + $0xa0] sm:$0xff] }
  0xcd   : > { %19540 = vmatmul.mubr.f32.vlgmr.msra.gmra.mrb[6].mxu1 %v21161_v9  ;;  %19543 = vmatpush3.msra.mxu0 %v21241_v42  ;;  %v242_v9 = vld [vmem:[%s20911_s20 + $0xb0] sm:$0xff]  ;;  %v5236_v13 = vsel %vm284_vm0, %v240_v8, 0 }
  0xce   : > { %19573 = vmatpush3.msra.mxu1 %v21245_v44  ;;  %19544 = vmatprep.mubr.f32.mxu0 %v4321_v4  ;;  %v5731_v15 = vsel %vm284_vm0, %v242_v9, 0  ;;  %v21337_v19 = vand.u32 4294901760, %v5236_v13 }
  0xcf   : > { %19547 = vmatprep.subr.mxu0 %v4342_v5  ;;  %19574 = vmatprep.mubr.f32.mxu1 %v4816_v6  ;;  %v21341_v21 = vand.u32 4294901760, %v5731_v15 }
  0xd0   : > { %19577 = vmatprep.subr.mxu1 %v4837_v7  ;;  %19545 = vmatmul.mubr.f32.vlgmr.msra.gmra.mrb[8].mxu0 %v4331_v2  ;;  %v21356_v24 = vsub.f32 %v5236_v13, %v21337_v19 }
  0xd1   : > { %19575 = vmatmul.mubr.f32.vlgmr.msra.gmra.mrb[8].mxu1 %v4826_v3  ;;  %19548 = vmatpush3.msra.mxu0 %v4342_v5  ;;  %v21362_v26 = vsub.f32 %v5731_v15, %v21341_v21 }
  0xd2   : > { %19578 = vmatpush3.msra.mxu1 %v4837_v7  ;;  %19549 = vmatprep.mubr.f32.mxu0 %v21243_v43  ;;  %v5309_v32 = vand.u32 4294901760, %v21356_v24 }
  0xd3   : > { %19552 = vmatprep.subr.mxu0 %v4339_v49  ;;  %19579 = vmatprep.mubr.f32.mxu1 %v21247_v45  ;;  %v5804_v30 = vand.u32 4294901760, %v21362_v26 }
  0xd4   : > { %19582 = vmatprep.subr.mxu1 %v4834_v51  ;;  %v5310_v36 = vsub.f32 %v21356_v24, %v5309_v32 }
  0xd5   : > { %v5805_v38 = vsub.f32 %v21362_v26, %v5804_v30 }
  0xd8   : > { %19550 = vmatmul.mubr.f32.vlgmr.msra.gmra.mrb[8].mxu0 %v21253_v46 }
  0xd9   : > { %19580 = vmatmul.mubr.f32.vlgmr.msra.gmra.mrb[8].mxu1 %v21255_v47  ;;  %19553 = vmatpush3.msra.mxu0 %v4339_v49  ;;  %v5816_v49 = vand.u32 4294901760, %v5815_v41 }
  0xda   : > { %19583 = vmatpush3.msra.mxu1 %v4834_v51  ;;  %19554 = vmatprep.mubr.f32.mxu0 %v21262_v48  ;;  %v5321_v48 = vand.u32 4294901760, %v5320_v40  ;;  %v247_v51 = vld [vmem:[%s20911_s20 + $0xd8] sm:$0xff] }
  0xdb   : > { %19557 = vmatprep.subr.mxu0 %v21241_v42  ;;  %19584 = vmatprep.mubr.f32.mxu1 %v21268_v50  ;;  %v245_v50 = vld [vmem:[%s20911_s20 + $0xc8] sm:$0xff]  ;;  %v201_v40 = vld [vmem:[%s24708_s0 + $0x78] sm:$0xff] }
  0xdc   : > { %19587 = vmatprep.subr.mxu1 %v21245_v44 }
  0xe0   : > { %19555 = vmatmul.mubr.f32.vlgmr.msra.gmra.mrb[8].mxu0 %v21272_v52  ;;  %v198_v52 = vld [vmem:[%s24708_s0 + $0x60] sm:$0xff] }
  0xe1   : > { %19585 = vmatmul.mubr.f32.vlgmr.msra.gmra.mrb[8].mxu1 %v21275_v53  ;;  %19558 = vmatpush3.msra.mxu0 %v21241_v42 }
  0xe2   : > { %19588 = vmatpush3.msra.mxu1 %v21245_v44  ;;  %19559 = vmatprep.mubr.f32.mxu0 %v4319_v56  ;;  %v199_v56 = vld [vmem:[%s24708_s0 + $0x68] sm:$0xff] }
  0xe3   : > { %19562 = vmatprep.subr.mxu0 %v21278_v57  ;;  %19589 = vmatprep.mubr.f32.mxu1 %v4814_v54  ;;  %v6229_v54 = vsel %vm284_vm0, %v245_v50, 0  ;;  %v21433_v60 = vand.u32 4294901760, %v199_v56 }
  0xe4   : > { %19592 = vmatprep.subr.mxu1 %v21281_v55  ;;  %v21441_v62 = vand.u32 4294901760, %v6229_v54 }
  0xe5   : > { %v6814_v5 = vsub.f32 %v199_v56, %v21433_v60 }
  0xe6   : > { %v21462_v6 = vsub.f32 %v6229_v54, %v21441_v62 }
  0xe7   : > { %v21472_v11 = vand.u32 4294901760, %v6814_v5 }
  0xe8   : > { %19560 = vmatmul.mubr.f32.vlgmr.msra.gmra.mrb[8].mxu0 %v4329_v58  ;;  %v21429_v58 = vand.u32 4294901760, %v198_v52  ;;  %v6309_v16 = vand.u32 4294901760, %v21462_v6 }
  0xe9   : > { %19590 = vmatmul.mubr.f32.vlgmr.msra.gmra.mrb[8].mxu1 %v4824_v59  ;;  %19563 = vmatpush3.msra.mxu0 %v21278_v57 }
  0xea   : > { %19593 = vmatpush3.msra.mxu1 %v21281_v55  ;;  %19564 = vmatprep.mubr.f32.mxu0 %v21243_v43  ;;  %v6724_v55 = vsel %vm284_vm0, %v247_v51, 0  ;;  %v21453_v1 = vsub.f32 %v198_v52, %v21429_v58 }
  0xeb   : > { %19567 = vmatprep.subr.mxu0 %v21241_v42  ;;  %19594 = vmatprep.mubr.f32.mxu1 %v21247_v45  ;;  %v21443_v63 = vand.u32 4294901760, %v6724_v55 }
  0xec   : > { %19597 = vmatprep.subr.mxu1 %v21245_v44  ;;  %v21469_v3 = vand.u32 4294901760, %v21453_v1 }
  0xed   : > { %v21465_v7 = vsub.f32 %v6724_v55, %v21443_v63 }
  0xef   : > { %v6804_v17 = vand.u32 4294901760, %v21465_v7 }
  0xf0   : > { %19565 = vmatmul.mubr.f32.vlgmr.msra.gmra.mrb[8].mxu0 %v21253_v46 }
  0xf1   : > { %19595 = vmatmul.mubr.f32.vlgmr.msra.gmra.mrb[8].mxu1 %v21255_v47  ;;  %19568 = vmatpush3.msra.mxu0 %v21241_v42  ;;  %v5311_v42 = vand.u32 4294901760, %v5310_v36  ;;  %v249_v36 = vld [vmem:[%s20911_s20 + $0xe8] sm:$0xff] }
  0xf2   : > { %19598 = vmatpush3.msra.mxu1 %v21245_v44  ;;  %19569 = vmatprep.mubr.f32.mxu0 %v21243_v43  ;;  %v5332_v43 = vand.u32 4294901760, %v5331_v37  ;;  %v5806_v44 = vand.u32 4294901760, %v5805_v38  ;;  %v251_v37 = vld [vmem:[%s20911_s20 + $0xf8] sm:$0xff]  ;;  %v200_v38 = vld [vmem:[%s24708_s0 + $0x70] sm:$0xff] }
  0xf3   : > { %19599 = vmatprep.mubr.f32.mxu1 %v21247_v45  ;;  %19602 = vmatprep.subr.mxu0 %v21335_v18  ;;  %v5827_v45 = vand.u32 4294901760, %v5826_v39 }
  0xf4   : > { %19632 = vmatprep.subr.mxu1 %v21339_v20 }
  0xf8   : > { %19570 = vmatmul.mubr.f32.vlgmr.msra.gmra.mrb[8].mxu0 %v21253_v46  ;;  %v244_v46 = vld [vmem:[%s20911_s20 + $0xc0] sm:$0xff] }
  0xf9   : > { %19600 = vmatmul.mubr.f32.vlgmr.msra.gmra.mrb[8].mxu1 %v21255_v47  ;;  %19603 = vmatpush3.msra.mxu0 %v21335_v18  ;;  %v246_v47 = vld [vmem:[%s20911_s20 + $0xd0] sm:$0xff]  ;;  %v6226_v53 = vsel %vm284_vm0, %v244_v46, 0 }
  0xfa   : > { %19633 = vmatpush3.msra.mxu1 %v21339_v20  ;;  %19604 = vmatprep.mubr.f32.mxu0 %v5311_v42  ;;  %v6721_v57 = vsel %vm284_vm0, %v246_v47, 0  ;;  %v21431_v59 = vand.u32 4294901760, %v6226_v53  ;;  %v7219_v42 = vsel %vm284_vm0, %v249_v36, 0 }
  0xfb   : > { %19607 = vmatprep.subr.mxu0 %v5332_v43  ;;  %19634 = vmatprep.mubr.f32.mxu1 %v5806_v44  ;;  %v21435_v61 = vand.u32 4294901760, %v6721_v57  ;;  %v21549_v44 = vand.u32 4294901760, %v200_v38  ;;  %v21561_v46 = vand.u32 4294901760, %v7219_v42 }
  0xfc   : > { %19637 = vmatprep.subr.mxu1 %v5827_v45  ;;  %19605 = vmatmul.mubr.f32.vlgmr.msra.gmra.mrb[10].mxu0 %v5321_v48  ;;  %v21450_v0 = vsub.f32 %v6226_v53, %v21431_v59  ;;  %v21553_v48 = vand.u32 4294901760, %v201_v40 }
  0xfd   : > { %19635 = vmatmul.mubr.f32.vlgmr.msra.gmra.mrb[10].mxu1 %v5816_v49  ;;  %19608 = vmatpush3.msra.mxu0 %v5332_v43  ;;  %v21458_v4 = vsub.f32 %v6721_v57, %v21435_v61  ;;  %v7714_v43 = vsel %vm284_vm0, %v251_v37, 0  ;;  %v21573_v51 = vsub.f32 %v200_v38, %v21549_v44  ;;  %v21584_v56 = vsub.f32 %v7219_v42, %v21561_v46 }
  0xfe   : > { %19638 = vmatpush3.msra.mxu1 %v5827_v45  ;;  %19609 = vmatprep.mubr.f32.mxu0 %v21337_v19  ;;  %v6299_v2 = vand.u32 4294901760, %v21450_v0  ;;  %v21563_v47 = vand.u32 4294901760, %v7714_v43  ;;  %v21581_v53 = vsub.f32 %v201_v40, %v21553_v48 }
  0xff   : > { %19612 = vmatprep.subr.mxu0 %v5329_v25  ;;  %19639 = vmatprep.mubr.f32.mxu1 %v21341_v21  ;;  %v6794_v10 = vand.u32 4294901760, %v21458_v4  ;;  %v21591_v55 = vand.u32 4294901760, %v21573_v51 }
 0x100   : > { %19642 = vmatprep.subr.mxu1 %v5824_v27  ;;  %v21587_v57 = vsub.f32 %v7714_v43, %v21563_v47 }
 0x104   : > { %19610 = vmatmul.mubr.f32.vlgmr.msra.gmra.mrb[10].mxu0 %v21347_v22 }
 0x105   : > { %19640 = vmatmul.mubr.f32.vlgmr.msra.gmra.mrb[10].mxu1 %v21349_v23  ;;  %19613 = vmatpush3.msra.mxu0 %v5329_v25 }
 0x106   : > { %19643 = vmatpush3.msra.mxu1 %v5824_v27  ;;  %19614 = vmatprep.mubr.f32.mxu0 %v21356_v24 }
 0x107   : > { %19617 = vmatprep.subr.mxu0 %v21335_v18  ;;  %19644 = vmatprep.mubr.f32.mxu1 %v21362_v26 }
 0x108   : > { %19647 = vmatprep.subr.mxu1 %v21339_v20 }
 0x10c   : > { %19615 = vmatmul.mubr.f32.vlgmr.msra.gmra.mrb[10].mxu0 %v21366_v28  ;;  %v6300_v28 = vsub.f32 %v21450_v0, %v6299_v2 }
 0x10d   : > { %19645 = vmatmul.mubr.f32.vlgmr.msra.gmra.mrb[10].mxu1 %v21369_v29  ;;  %19618 = vmatpush3.msra.mxu0 %v21335_v18  ;;  %v6321_v29 = vsub.f32 %v21453_v1, %v21469_v3 }
 0x10e   : > { %19648 = vmatpush3.msra.mxu1 %v21339_v20  ;;  %19619 = vmatprep.mubr.f32.mxu0 %v5309_v32  ;;  %v6301_v32 = vand.u32 4294901760, %v6300_v28 }
 0x10f   : > { %19622 = vmatprep.subr.mxu0 %v21372_v33  ;;  %19649 = vmatprep.mubr.f32.mxu1 %v5804_v30 }
 0x110   : > { %19652 = vmatprep.subr.mxu1 %v21375_v31 }
 0x114   : > { %19620 = vmatmul.mubr.f32.vlgmr.msra.gmra.mrb[10].mxu0 %v5319_v34 }
 0x115   : > { %19650 = vmatmul.mubr.f32.vlgmr.msra.gmra.mrb[10].mxu1 %v5814_v35  ;;  %19623 = vmatpush3.msra.mxu0 %v21372_v33  ;;  %v6322_v33 = vand.u32 4294901760, %v6321_v29 }
 0x116   : > { %19653 = vmatpush3.msra.mxu1 %v21375_v31  ;;  %19624 = vmatprep.mubr.f32.mxu0 %v21337_v19 }
 0x117   : > { %19627 = vmatprep.subr.mxu0 %v21335_v18  ;;  %19654 = vmatprep.mubr.f32.mxu1 %v21341_v21 }
 0x118   : > { %19657 = vmatprep.subr.mxu1 %v21339_v20 }
 0x11b   : > { %v19331_v8 = vpop.f32.mrb[0].mxu0 }
 0x11c   : > { %v19361_v9 = vpop.f32.mrb[0].mxu1  ;;  %16129 = vst.msk [vmem:[#allocation2 + $0x8] sm:$0xff] %vm179_vm1, %v19331_v8  ;;  %v16257_v12 = vsel %vm179_vm1, %v19331_v8, 0.0  ;;  %v770_v14 = vpop.f32.mrb[1].mxu0  ;;  %19625 = vmatmul.mubr.f32.vlgmr.msra.gmra.mrb[10].mxu0 %v21347_v22  ;;  %v7794_v8 = vand.u32 4294901760, %v21587_v57 }
 0x11d   : > { %16131 = vst.msk [vmem:[#allocation2 + $0x18] sm:$0xff] %vm179_vm1, %v19361_v9  ;;  %v16258_v13 = vsel %vm179_vm1, %v19361_v9, 0.0  ;;  %v1265_v15 = vpop.f32.mrb[1].mxu1  ;;  %19655 = vmatmul.mubr.f32.vlgmr.msra.gmra.mrb[10].mxu1 %v21349_v23  ;;  %16128 = vst.msk [vmem:[#allocation2] sm:$0xff] %vm179_vm1, %v770_v14  ;;  %v16194_v25 = vsel %vm179_vm1, %v770_v14, 0.0  ;;  %19628 = vmatpush3.msra.mxu0 %v21335_v18  ;;  %v6795_v18 = vsub.f32 %v21458_v4, %v6794_v10 }
 0x11e   : > { %v21482_v24 = vadd.f32 %v16258_v13, %v16257_v12  ;;  %16130 = vst.msk [vmem:[#allocation2 + $0x10] sm:$0xff] %vm179_vm1, %v1265_v15  ;;  %v16195_v26 = vsel %vm179_vm1, %v1265_v15, 0.0  ;;  %19658 = vmatpush3.msra.mxu1 %v21339_v20  ;;  %19629 = vmatprep.mubr.f32.mxu0 %v21337_v19  ;;  %v6816_v20 = vsub.f32 %v6814_v5, %v21472_v11 }
 0x11f   : > { %v21490_v27 = vadd.f32 %v16195_v26, %v16194_v25  ;;  %19659 = vmatprep.mubr.f32.mxu1 %v21341_v21  ;;  %19662 = vmatprep.subr.mxu0 %v21429_v58  ;;  %v6310_v19 = vsub.f32 %v21462_v6, %v6309_v16  ;;  %v6805_v21 = vsub.f32 %v21465_v7, %v6804_v17  ;;  %v6796_v30 = vand.u32 4294901760, %v6795_v18  ;;  %v253_v18 = vld [vmem:[%s20911_s20 + $0x108] sm:$0xff] }
 0x120   : > { %19692 = vmatprep.subr.mxu1 %v21433_v60  ;;  %v6817_v31 = vand.u32 4294901760, %v6816_v20  ;;  %v7311_v14 = vsub.f32 %v21573_v51, %v21591_v55  ;;  %v255_v20 = vld [vmem:[%s20911_s20 + $0x118] sm:$0xff] }
 0x121   : > { %v6311_v34 = vand.u32 4294901760, %v6310_v19  ;;  %v6806_v35 = vand.u32 4294901760, %v6805_v21  ;;  %v202_v19 = vld [vmem:[%s24708_s0 + $0x80] sm:$0xff] }
 0x122   : > { %v7312_v25 = vand.u32 4294901760, %v7311_v14 }
 0x124   : > { %19630 = vmatmul.mubr.f32.vlgmr.msra.gmra.mrb[10].mxu0 %v21347_v22  ;;  %v248_v22 = vld [vmem:[%s20911_s20 + $0xe0] sm:$0xff] }
 0x125   : > { %19660 = vmatmul.mubr.f32.vlgmr.msra.gmra.mrb[10].mxu1 %v21349_v23  ;;  %19663 = vmatpush3.msra.mxu0 %v21429_v58  ;;  %v250_v23 = vld [vmem:[%s20911_s20 + $0xf0] sm:$0xff]  ;;  %v7216_v39 = vsel %vm284_vm0, %v248_v22, 0 }
 0x126   : > { %19693 = vmatpush3.msra.mxu1 %v21433_v60  ;;  %19664 = vmatprep.mubr.f32.mxu0 %v6301_v32  ;;  %v7711_v41 = vsel %vm284_vm0, %v250_v23, 0  ;;  %v21551_v45 = vand.u32 4294901760, %v7216_v39  ;;  %v203_v32 = vld [vmem:[%s24708_s0 + $0x88] sm:$0xff] }
 0x127   : > { %19667 = vmatprep.subr.mxu0 %v6322_v33  ;;  %19694 = vmatprep.mubr.f32.mxu1 %v6796_v30  ;;  %v21555_v49 = vand.u32 4294901760, %v7711_v41  ;;  %v8209_v30 = vsel %vm284_vm0, %v253_v18, 0  ;;  %v21681_v22 = vand.u32 4294901760, %v203_v32 }
 0x128   : > { %19697 = vmatprep.subr.mxu1 %v6817_v31  ;;  %19665 = vmatmul.mubr.f32.vlgmr.msra.gmra.mrb[12].mxu0 %v6311_v34  ;;  %v21570_v50 = vsub.f32 %v7216_v39, %v21551_v45  ;;  %v21677_v34 = vand.u32 4294901760, %v202_v19  ;;  %v21689_v36 = vand.u32 4294901760, %v8209_v30 }
 0x129   : > { %19695 = vmatmul.mubr.f32.vlgmr.msra.gmra.mrb[12].mxu1 %v6806_v35  ;;  %19668 = vmatpush3.msra.mxu0 %v6322_v33  ;;  %v21578_v52 = vsub.f32 %v7711_v41, %v21555_v49  ;;  %v21709_v41 = vsub.f32 %v203_v32, %v21681_v22 }
 0x12a   : > { %19698 = vmatpush3.msra.mxu1 %v6817_v31  ;;  %19669 = vmatprep.mubr.f32.mxu0 %v21431_v59  ;;  %v7289_v54 = vand.u32 4294901760, %v21570_v50  ;;  %v8704_v31 = vsel %vm284_vm0, %v255_v20, 0  ;;  %v21701_v39 = vsub.f32 %v202_v19, %v21677_v34  ;;  %v21712_v42 = vsub.f32 %v8209_v30, %v21689_v36 }
 0x12b   : > { %19672 = vmatprep.subr.mxu0 %v21453_v1  ;;  %19699 = vmatprep.mubr.f32.mxu1 %v21435_v61  ;;  %v21691_v37 = vand.u32 4294901760, %v8704_v31 }
 0x12c   : > { %19702 = vmatprep.subr.mxu1 %v6814_v5  ;;  %v7290_v13 = vsub.f32 %v21570_v50, %v7289_v54 }
 0x12d   : > { %v21715_v43 = vsub.f32 %v8704_v31, %v21691_v37 }
 0x130   : > { %19670 = vmatmul.mubr.f32.vlgmr.msra.gmra.mrb[12].mxu0 %v21441_v62 }
 0x131   : > { %19700 = vmatmul.mubr.f32.vlgmr.msra.gmra.mrb[12].mxu1 %v21443_v63  ;;  %19673 = vmatpush3.msra.mxu0 %v21453_v1 }
 0x132   : > { %19703 = vmatpush3.msra.mxu1 %v6814_v5  ;;  %19674 = vmatprep.mubr.f32.mxu0 %v21450_v0  ;;  %v21595_v5 = vand.u32 4294901760, %v21581_v53 }
 0x133   : > { %19677 = vmatprep.subr.mxu0 %v21429_v58  ;;  %19704 = vmatprep.mubr.f32.mxu1 %v21458_v4  ;;  %v7784_v4 = vand.u32 4294901760, %v21578_v52 }
 0x134   : > { %19707 = vmatprep.subr.mxu1 %v21433_v60 }
 0x138   : > { %19675 = vmatmul.mubr.f32.vlgmr.msra.gmra.mrb[12].mxu0 %v21462_v6 }
 0x139   : > { %19705 = vmatmul.mubr.f32.vlgmr.msra.gmra.mrb[12].mxu1 %v21465_v7  ;;  %19678 = vmatpush3.msra.mxu0 %v21429_v58 }
 0x13a   : > { %19708 = vmatpush3.msra.mxu1 %v21433_v60  ;;  %19679 = vmatprep.mubr.f32.mxu0 %v6299_v2 }
 0x13b   : > { %19682 = vmatprep.subr.mxu0 %v21469_v3  ;;  %19709 = vmatprep.mubr.f32.mxu1 %v6794_v10 }
 0x13c   : > { %19712 = vmatprep.subr.mxu1 %v21472_v11 }
 0x140   : > { %19680 = vmatmul.mubr.f32.vlgmr.msra.gmra.mrb[12].mxu0 %v6309_v16 }
 0x141   : > { %19710 = vmatmul.mubr.f32.vlgmr.msra.gmra.mrb[12].mxu1 %v6804_v17  ;;  %19683 = vmatpush3.msra.mxu0 %v21469_v3  ;;  %v7299_v3 = vand.u32 4294901760, %v21584_v56  ;;  %v7795_v17 = vsub.f32 %v21587_v57, %v7794_v8 }
 0x142   : > { %19713 = vmatpush3.msra.mxu1 %v21472_v11  ;;  %19684 = vmatprep.mubr.f32.mxu0 %v21431_v59 }
 0x143   : > { %19687 = vmatprep.subr.mxu0 %v21429_v58  ;;  %19714 = vmatprep.mubr.f32.mxu1 %v21435_v61  ;;  %v7300_v16 = vsub.f32 %v21584_v56, %v7299_v3  ;;  %v7796_v29 = vand.u32 4294901760, %v7795_v17 }
 0x144   : > { %19717 = vmatprep.subr.mxu1 %v21433_v60 }
 0x145   : > { %v7301_v28 = vand.u32 4294901760, %v7300_v16  ;;  %v204_v16 = vld [vmem:[%s24708_s0 + $0x90] sm:$0xff] }
 0x147   : > { %v19391_v0 = vpop.f32.mrb[2].mxu0 }
 0x148   : > { %v19421_v1 = vpop.f32.mrb[2].mxu1  ;;  %16133 = vst.msk [vmem:[#allocation2 + $0x28] sm:$0xff] %vm179_vm1, %v19391_v0  ;;  %v16260_v6 = vsel %vm179_vm1, %v19391_v0, 0.0  ;;  %v1760_v7 = vpop.f32.mrb[3].mxu0  ;;  %19685 = vmatmul.mubr.f32.vlgmr.msra.gmra.mrb[12].mxu0 %v21441_v62 }
 0x149   : > { %16135 = vst.msk [vmem:[#allocation2 + $0x38] sm:$0xff] %vm179_vm1, %v19421_v1  ;;  %v2255_v2 = vpop.f32.mrb[3].mxu1  ;;  %19715 = vmatmul.mubr.f32.vlgmr.msra.gmra.mrb[12].mxu1 %v21443_v63  ;;  %v16261_v9 = vadd.f32 %v16260_v6, %v21482_v24  ;;  %16132 = vst.msk [vmem:[#allocation2 + $0x20] sm:$0xff] %vm179_vm1, %v1760_v7  ;;  %v16197_v10 = vsel %vm179_vm1, %v1760_v7, 0.0  ;;  %19688 = vmatpush3.msra.mxu0 %v21429_v58  ;;  %v16262_v11 = vsel %vm179_vm1, %v19421_v1, 0.0  ;;  %v7291_v24 = vand.u32 4294901760, %v7290_v13 }
 0x14a   : > { %16134 = vst.msk [vmem:[#allocation2 + $0x30] sm:$0xff] %vm179_vm1, %v2255_v2  ;;  %19718 = vmatpush3.msra.mxu1 %v21433_v60  ;;  %v16198_v12 = vadd.f32 %v16197_v10, %v21490_v27  ;;  %19689 = vmatprep.mubr.f32.mxu0 %v21431_v59  ;;  %v16199_v58 = vsel %vm179_vm1, %v2255_v2, 0.0  ;;  %v7785_v59 = vsub.f32 %v21578_v52, %v7784_v4  ;;  %v8289_v1 = vand.u32 4294901760, %v21712_v42 }
 0x14b   : > { %19719 = vmatprep.mubr.f32.mxu1 %v21435_v61  ;;  %v21619_v15 = vadd.f32 %v16262_v11, %v16261_v9  ;;  %19722 = vmatprep.subr.mxu0 %v21549_v44  ;;  %v7806_v60 = vsub.f32 %v21581_v53, %v21595_v5 }
 0x14c   : > { %19752 = vmatprep.subr.mxu1 %v21553_v48  ;;  %v21629_v61 = vadd.f32 %v16199_v58, %v16198_v12  ;;  %v7786_v26 = vand.u32 4294901760, %v7785_v59  ;;  %v8290_v10 = vsub.f32 %v21712_v42, %v8289_v1 }
 0x14d   : > { %v7807_v27 = vand.u32 4294901760, %v7806_v60  ;;  %v257_v60 = vld [vmem:[%s20911_s20 + $0x128] sm:$0xff] }
 0x14e   : > { %v8291_v58 = vand.u32 4294901760, %v8290_v10  ;;  %v206_v10 = vld [vmem:[%s24708_s0 + $0xa0] sm:$0xff] }
 0x150   : > { %19690 = vmatmul.mubr.f32.vlgmr.msra.gmra.mrb[12].mxu0 %v21441_v62  ;;  %v252_v62 = vld [vmem:[%s20911_s20 + $0x100] sm:$0xff] }
 0x151   : > { %19720 = vmatmul.mubr.f32.vlgmr.msra.gmra.mrb[12].mxu1 %v21443_v63  ;;  %19723 = vmatpush3.msra.mxu0 %v21549_v44  ;;  %v254_v63 = vld [vmem:[%s20911_s20 + $0x110] sm:$0xff]  ;;  %v8206_v21 = vsel %vm284_vm0, %v252_v62, 0 }
 0x152   : > { %19753 = vmatpush3.msra.mxu1 %v21553_v48  ;;  %19724 = vmatprep.mubr.f32.mxu0 %v7291_v24  ;;  %v8701_v33 = vsel %vm284_vm0, %v254_v63, 0  ;;  %v21679_v35 = vand.u32 4294901760, %v8206_v21  ;;  %v205_v24 = vld [vmem:[%s24708_s0 + $0x98] sm:$0xff] }
 0x153   : > { %19727 = vmatprep.subr.mxu0 %v7312_v25  ;;  %19754 = vmatprep.mubr.f32.mxu1 %v7786_v26  ;;  %v21683_v23 = vand.u32 4294901760, %v8701_v33  ;;  %v9199_v26 = vsel %vm284_vm0, %v257_v60, 0  ;;  %v21809_v62 = vand.u32 4294901760, %v205_v24 }
 0x154   : > { %19757 = vmatprep.subr.mxu1 %v7807_v27  ;;  %19725 = vmatmul.mubr.f32.vlgmr.msra.gmra.mrb[14].mxu0 %v7301_v28  ;;  %v21698_v38 = vsub.f32 %v8206_v21, %v21679_v35  ;;  %v21805_v28 = vand.u32 4294901760, %v204_v16  ;;  %v21817_v18 = vand.u32 4294901760, %v9199_v26 }
 0x155   : > { %19755 = vmatmul.mubr.f32.vlgmr.msra.gmra.mrb[14].mxu1 %v7796_v29  ;;  %19728 = vmatpush3.msra.mxu0 %v7312_v25  ;;  %v21706_v40 = vsub.f32 %v8701_v33, %v21683_v23  ;;  %v21837_v33 = vsub.f32 %v205_v24, %v21809_v62 }
 0x156   : > { %19758 = vmatpush3.msra.mxu1 %v7807_v27  ;;  %19729 = vmatprep.mubr.f32.mxu0 %v21551_v45  ;;  %v21829_v21 = vsub.f32 %v204_v16, %v21805_v28  ;;  %v21840_v30 = vsub.f32 %v9199_v26, %v21817_v18 }
 0x157   : > { %19732 = vmatprep.subr.mxu0 %v21573_v51  ;;  %19759 = vmatprep.mubr.f32.mxu1 %v21555_v49 }
 0x158   : > { %19762 = vmatprep.subr.mxu1 %v21581_v53 }
 0x15c   : > { %19730 = vmatmul.mubr.f32.vlgmr.msra.gmra.mrb[14].mxu0 %v21561_v46 }
 0x15d   : > { %19760 = vmatmul.mubr.f32.vlgmr.msra.gmra.mrb[14].mxu1 %v21563_v47  ;;  %19733 = vmatpush3.msra.mxu0 %v21573_v51  ;;  %v21719_v51 = vand.u32 4294901760, %v21701_v39 }
 0x15e   : > { %19763 = vmatpush3.msra.mxu1 %v21581_v53  ;;  %19734 = vmatprep.mubr.f32.mxu0 %v21570_v50  ;;  %v8279_v50 = vand.u32 4294901760, %v21698_v38 }
 0x15f   : > { %19737 = vmatprep.subr.mxu0 %v21549_v44  ;;  %19764 = vmatprep.mubr.f32.mxu1 %v21578_v52 }
 0x160   : > { %19767 = vmatprep.subr.mxu1 %v21553_v48 }
 0x164   : > { %19735 = vmatmul.mubr.f32.vlgmr.msra.gmra.mrb[14].mxu0 %v21584_v56  ;;  %v8774_v56 = vand.u32 4294901760, %v21706_v40 }
 0x165   : > { %19765 = vmatmul.mubr.f32.vlgmr.msra.gmra.mrb[14].mxu1 %v21587_v57  ;;  %19738 = vmatpush3.msra.mxu0 %v21549_v44  ;;  %v21723_v57 = vand.u32 4294901760, %v21709_v41 }
 0x166   : > { %19768 = vmatpush3.msra.mxu1 %v21553_v48  ;;  %19739 = vmatprep.mubr.f32.mxu0 %v7289_v54 }
 0x167   : > { %19742 = vmatprep.subr.mxu0 %v21591_v55  ;;  %19769 = vmatprep.mubr.f32.mxu1 %v7784_v4  ;;  %v8784_v4 = vand.u32 4294901760, %v21715_v43 }
 0x168   : > { %19772 = vmatprep.subr.mxu1 %v21595_v5 }
 0x169   : > { %v8785_v11 = vsub.f32 %v21715_v43, %v8784_v4 }
 0x16b   : > { %v8786_v59 = vand.u32 4294901760, %v8785_v11 }
 0x16c   : > { %19740 = vmatmul.mubr.f32.vlgmr.msra.gmra.mrb[14].mxu0 %v7299_v3  ;;  %v8280_v3 = vsub.f32 %v21698_v38, %v8279_v50 }
 0x16d   : > { %19770 = vmatmul.mubr.f32.vlgmr.msra.gmra.mrb[14].mxu1 %v7794_v8  ;;  %19743 = vmatpush3.msra.mxu0 %v21591_v55  ;;  %v8301_v8 = vsub.f32 %v21701_v39, %v21719_v51 }
 0x16e   : > { %19773 = vmatpush3.msra.mxu1 %v21595_v5  ;;  %19744 = vmatprep.mubr.f32.mxu0 %v21551_v45  ;;  %v8281_v12 = vand.u32 4294901760, %v8280_v3 }
 0x16f   : > { %19747 = vmatprep.subr.mxu0 %v21549_v44  ;;  %19774 = vmatprep.mubr.f32.mxu1 %v21555_v49  ;;  %v8302_v13 = vand.u32 4294901760, %v8301_v8 }
 0x170   : > { %19777 = vmatprep.subr.mxu1 %v21553_v48 }
 0x173   : > { %v19451_v52 = vpop.f32.mrb[4].mxu0 }
 0x174   : > { %v19481_v53 = vpop.f32.mrb[4].mxu1  ;;  %16137 = vst.msk [vmem:[#allocation2 + $0x48] sm:$0xff] %vm179_vm1, %v19451_v52  ;;  %v16264_v54 = vsel %vm179_vm1, %v19451_v52, 0.0  ;;  %v2750_v55 = vpop.f32.mrb[5].mxu0  ;;  %19745 = vmatmul.mubr.f32.vlgmr.msra.gmra.mrb[14].mxu0 %v21561_v46 }
 0x175   : > { %16139 = vst.msk [vmem:[#allocation2 + $0x58] sm:$0xff] %vm179_vm1, %v19481_v53  ;;  %v3245_v0 = vpop.f32.mrb[5].mxu1  ;;  %19775 = vmatmul.mubr.f32.vlgmr.msra.gmra.mrb[14].mxu1 %v21563_v47  ;;  %v16265_v5 = vadd.f32 %v16264_v54, %v21619_v15  ;;  %16136 = vst.msk [vmem:[#allocation2 + $0x40] sm:$0xff] %vm179_vm1, %v2750_v55  ;;  %v16201_v6 = vsel %vm179_vm1, %v2750_v55, 0.0  ;;  %19748 = vmatpush3.msra.mxu0 %v21549_v44  ;;  %v16266_v7 = vsel %vm179_vm1, %v19481_v53, 0.0  ;;  %v9279_v53 = vand.u32 4294901760, %v21840_v30 }
 0x176   : > { %16138 = vst.msk [vmem:[#allocation2 + $0x50] sm:$0xff] %vm179_vm1, %v3245_v0  ;;  %19778 = vmatpush3.msra.mxu1 %v21553_v48  ;;  %v16202_v2 = vadd.f32 %v16201_v6, %v21629_v61  ;;  %19749 = vmatprep.mubr.f32.mxu0 %v21551_v45  ;;  %v16203_v44 = vsel %vm179_vm1, %v3245_v0, 0.0  ;;  %v8775_v45 = vsub.f32 %v21706_v40, %v8774_v56  ;;  %v259_v61 = vld [vmem:[%s20911_s20 + $0x138] sm:$0xff] }
 0x177   : > { %19779 = vmatprep.mubr.f32.mxu1 %v21555_v49  ;;  %v21747_v9 = vadd.f32 %v16266_v7, %v16265_v5  ;;  %19782 = vmatprep.subr.mxu0 %v21677_v34  ;;  %v8796_v48 = vsub.f32 %v21709_v41, %v21723_v57  ;;  %v9694_v27 = vsel %vm284_vm0, %v259_v61, 0  ;;  %v9280_v6 = vsub.f32 %v21840_v30, %v9279_v53 }
 0x178   : > { %19812 = vmatprep.subr.mxu1 %v21681_v22  ;;  %v21757_v49 = vadd.f32 %v16203_v44, %v16202_v2  ;;  %v8776_v14 = vand.u32 4294901760, %v8775_v45  ;;  %v21819_v20 = vand.u32 4294901760, %v9694_v27 }
 0x179   : > { %v8797_v15 = vand.u32 4294901760, %v8796_v48  ;;  %v9281_v44 = vand.u32 4294901760, %v9280_v6  ;;  %v261_v48 = vld [vmem:[%s20911_s20 + $0x148] sm:$0xff]  ;;  %v208_v6 = vld [vmem:[%s24708_s0 + $0xb0] sm:$0xff] }
 0x17a   : > { %v21843_v31 = vsub.f32 %v9694_v27, %v21819_v20 }
 0x17c   : > { %19750 = vmatmul.mubr.f32.vlgmr.msra.gmra.mrb[14].mxu0 %v21561_v46  ;;  %v256_v46 = vld [vmem:[%s20911_s20 + $0x120] sm:$0xff] }
 0x17d   : > { %19780 = vmatmul.mubr.f32.vlgmr.msra.gmra.mrb[14].mxu1 %v21563_v47  ;;  %19783 = vmatpush3.msra.mxu0 %v21677_v34  ;;  %v258_v47 = vld [vmem:[%s20911_s20 + $0x130] sm:$0xff]  ;;  %v9196_v17 = vsel %vm284_vm0, %v256_v46, 0 }
 0x17e   : > { %19813 = vmatpush3.msra.mxu1 %v21681_v22  ;;  %19784 = vmatprep.mubr.f32.mxu0 %v8281_v12  ;;  %v9691_v25 = vsel %vm284_vm0, %v258_v47, 0  ;;  %v21807_v29 = vand.u32 4294901760, %v9196_v17  ;;  %v207_v12 = vld [vmem:[%s24708_s0 + $0xa8] sm:$0xff] }
 0x17f   : > { %19787 = vmatprep.subr.mxu0 %v8302_v13  ;;  %19814 = vmatprep.mubr.f32.mxu1 %v8776_v14  ;;  %v21811_v63 = vand.u32 4294901760, %v9691_v25  ;;  %v10189_v14 = vsel %vm284_vm0, %v261_v48, 0  ;;  %v21937_v46 = vand.u32 4294901760, %v207_v12 }
 0x180   : > { %19817 = vmatprep.subr.mxu1 %v8797_v15  ;;  %19785 = vmatmul.mubr.f32.vlgmr.msra.gmra.mrb[16].mxu0 %v8291_v58  ;;  %v21826_v19 = vsub.f32 %v9196_v17, %v21807_v29  ;;  %v21933_v58 = vand.u32 4294901760, %v206_v10  ;;  %v21945_v60 = vand.u32 4294901760, %v10189_v14 }
 0x181   : > { %19815 = vmatmul.mubr.f32.vlgmr.msra.gmra.mrb[16].mxu1 %v8786_v59  ;;  %19788 = vmatpush3.msra.mxu0 %v8302_v13  ;;  %v21834_v32 = vsub.f32 %v9691_v25, %v21811_v63  ;;  %v21965_v25 = vsub.f32 %v207_v12, %v21937_v46 }
 0x182   : > { %19818 = vmatpush3.msra.mxu1 %v8797_v15  ;;  %19789 = vmatprep.mubr.f32.mxu0 %v21679_v35  ;;  %v21957_v17 = vsub.f32 %v206_v10, %v21933_v58  ;;  %v21968_v26 = vsub.f32 %v10189_v14, %v21945_v60 }
 0x183   : > { %19792 = vmatprep.subr.mxu0 %v21701_v39  ;;  %19819 = vmatprep.mubr.f32.mxu1 %v21683_v23 }
 0x184   : > { %19822 = vmatprep.subr.mxu1 %v21709_v41 }
 0x188   : > { %19790 = vmatmul.mubr.f32.vlgmr.msra.gmra.mrb[16].mxu0 %v21689_v36 }
 0x189   : > { %19820 = vmatmul.mubr.f32.vlgmr.msra.gmra.mrb[16].mxu1 %v21691_v37  ;;  %19793 = vmatpush3.msra.mxu0 %v21701_v39  ;;  %v21847_v39 = vand.u32 4294901760, %v21829_v21 }
 0x18a   : > { %19823 = vmatpush3.msra.mxu1 %v21709_v41  ;;  %19794 = vmatprep.mubr.f32.mxu0 %v21698_v38  ;;  %v9269_v38 = vand.u32 4294901760, %v21826_v19 }
 0x18b   : > { %19797 = vmatprep.subr.mxu0 %v21677_v34  ;;  %19824 = vmatprep.mubr.f32.mxu1 %v21706_v40 }
 0x18c   : > { %19827 = vmatprep.subr.mxu1 %v21681_v22 }
 0x190   : > { %19795 = vmatmul.mubr.f32.vlgmr.msra.gmra.mrb[16].mxu0 %v21712_v42  ;;  %v9764_v42 = vand.u32 4294901760, %v21834_v32 }
 0x191   : > { %19825 = vmatmul.mubr.f32.vlgmr.msra.gmra.mrb[16].mxu1 %v21715_v43  ;;  %19798 = vmatpush3.msra.mxu0 %v21677_v34  ;;  %v21851_v43 = vand.u32 4294901760, %v21837_v33 }
 0x192   : > { %19828 = vmatpush3.msra.mxu1 %v21681_v22  ;;  %19799 = vmatprep.mubr.f32.mxu0 %v8279_v50 }
 0x193   : > { %19802 = vmatprep.subr.mxu0 %v21719_v51  ;;  %19829 = vmatprep.mubr.f32.mxu1 %v8774_v56  ;;  %v9774_v56 = vand.u32 4294901760, %v21843_v31 }
 0x194   : > { %19832 = vmatprep.subr.mxu1 %v21723_v57 }
 0x195   : > { %v9775_v7 = vsub.f32 %v21843_v31, %v9774_v56 }
 0x197   : > { %v9776_v45 = vand.u32 4294901760, %v9775_v7 }
 0x198   : > { %19800 = vmatmul.mubr.f32.vlgmr.msra.gmra.mrb[16].mxu0 %v8289_v1  ;;  %v9270_v1 = vsub.f32 %v21826_v19, %v9269_v38 }
 0x199   : > { %19830 = vmatmul.mubr.f32.vlgmr.msra.gmra.mrb[16].mxu1 %v8784_v4  ;;  %19803 = vmatpush3.msra.mxu0 %v21719_v51  ;;  %v9291_v4 = vsub.f32 %v21829_v21, %v21847_v39 }
 0x19a   : > { %19833 = vmatpush3.msra.mxu1 %v21723_v57  ;;  %19804 = vmatprep.mubr.f32.mxu0 %v21679_v35  ;;  %v9271_v2 = vand.u32 4294901760, %v9270_v1 }
 0x19b   : > { %19807 = vmatprep.subr.mxu0 %v21677_v34  ;;  %19834 = vmatprep.mubr.f32.mxu1 %v21683_v23  ;;  %v9292_v3 = vand.u32 4294901760, %v9291_v4 }
 0x19c   : > { %19837 = vmatprep.subr.mxu1 %v21681_v22 }
 0x19f   : > { %v19511_v40 = vpop.f32.mrb[6].mxu0 }
 0x1a0   : > { %v19541_v41 = vpop.f32.mrb[6].mxu1  ;;  %16141 = vst.msk [vmem:[#allocation2 + $0x68] sm:$0xff] %vm179_vm1, %v19511_v40  ;;  %v16268_v50 = vsel %vm179_vm1, %v19511_v40, 0.0  ;;  %v3740_v51 = vpop.f32.mrb[7].mxu0  ;;  %19805 = vmatmul.mubr.f32.vlgmr.msra.gmra.mrb[16].mxu0 %v21689_v36 }
 0x1a1   : > { %16143 = vst.msk [vmem:[#allocation2 + $0x78] sm:$0xff] %vm179_vm1, %v19541_v41  ;;  %v4235_v52 = vpop.f32.mrb[7].mxu1  ;;  %19835 = vmatmul.mubr.f32.vlgmr.msra.gmra.mrb[16].mxu1 %v21691_v37  ;;  %v16269_v57 = vadd.f32 %v16268_v50, %v21747_v9  ;;  %16140 = vst.msk [vmem:[#allocation2 + $0x60] sm:$0xff] %vm179_vm1, %v3740_v51  ;;  %v16205_v54 = vsel %vm179_vm1, %v3740_v51, 0.0  ;;  %19808 = vmatpush3.msra.mxu0 %v21677_v34  ;;  %v16270_v55 = vsel %vm179_vm1, %v19541_v41, 0.0  ;;  %v10269_v41 = vand.u32 4294901760, %v21968_v26 }
 0x1a2   : > { %16142 = vst.msk [vmem:[#allocation2 + $0x70] sm:$0xff] %vm179_vm1, %v4235_v52  ;;  %19838 = vmatpush3.msra.mxu1 %v21681_v22  ;;  %v16206_v0 = vadd.f32 %v16205_v54, %v21757_v49  ;;  %19809 = vmatprep.mubr.f32.mxu0 %v21679_v35  ;;  %v16207_v34 = vsel %vm179_vm1, %v4235_v52, 0.0  ;;  %v9765_v35 = vsub.f32 %v21834_v32, %v9764_v42  ;;  %v263_v49 = vld [vmem:[%s20911_s20 + $0x158] sm:$0xff] }
 0x1a3   : > { %19839 = vmatprep.mubr.f32.mxu1 %v21683_v23  ;;  %v21875_v5 = vadd.f32 %v16270_v55, %v16269_v57  ;;  %19842 = vmatprep.subr.mxu0 %v21805_v28  ;;  %v9786_v22 = vsub.f32 %v21837_v33, %v21851_v43  ;;  %v10684_v15 = vsel %vm284_vm0, %v263_v49, 0  ;;  %v10270_v54 = vsub.f32 %v21968_v26, %v10269_v41 }
 0x1a4   : > { %19872 = vmatprep.subr.mxu1 %v21809_v62  ;;  %v21885_v23 = vadd.f32 %v16207_v34, %v16206_v0  ;;  %v9766_v8 = vand.u32 4294901760, %v9765_v35  ;;  %v21947_v61 = vand.u32 4294901760, %v10684_v15 }
 0x1a5   : > { %v9787_v9 = vand.u32 4294901760, %v9786_v22  ;;  %v10271_v34 = vand.u32 4294901760, %v10270_v54  ;;  %v265_v22 = vld [vmem:[%s20911_s20 + $0x168] sm:$0xff]  ;;  %v210_v54 = vld [vmem:[%s24708_s0 + $0xc0] sm:$0xff] }
 0x1a6   : > { %v21971_v27 = vsub.f32 %v10684_v15, %v21947_v61 }
 0x1a8   : > { %19810 = vmatmul.mubr.f32.vlgmr.msra.gmra.mrb[16].mxu0 %v21689_v36  ;;  %v260_v36 = vld [vmem:[%s20911_s20 + $0x140] sm:$0xff] }
 0x1a9   : > { %19840 = vmatmul.mubr.f32.vlgmr.msra.gmra.mrb[16].mxu1 %v21691_v37  ;;  %19843 = vmatpush3.msra.mxu0 %v21805_v28  ;;  %v262_v37 = vld [vmem:[%s20911_s20 + $0x150] sm:$0xff]  ;;  %v10186_v11 = vsel %vm284_vm0, %v260_v36, 0 }
 0x1aa   : > { %19873 = vmatpush3.msra.mxu1 %v21809_v62  ;;  %19844 = vmatprep.mubr.f32.mxu0 %v9271_v2  ;;  %v10681_v13 = vsel %vm284_vm0, %v262_v37, 0  ;;  %v21935_v59 = vand.u32 4294901760, %v10186_v11  ;;  %v209_v2 = vld [vmem:[%s24708_s0 + $0xb8] sm:$0xff] }
 0x1ab   : > { %19847 = vmatprep.subr.mxu0 %v9292_v3  ;;  %19874 = vmatprep.mubr.f32.mxu1 %v9766_v8  ;;  %v21939_v47 = vand.u32 4294901760, %v10681_v13  ;;  %v11179_v8 = vsel %vm284_vm0, %v265_v22, 0  ;;  %v22065_v36 = vand.u32 4294901760, %v209_v2 }
 0x1ac   : > { %19877 = vmatprep.subr.mxu1 %v9787_v9  ;;  %19845 = vmatmul.mubr.f32.vlgmr.msra.gmra.mrb[18].mxu0 %v9281_v44  ;;  %v21954_v16 = vsub.f32 %v10186_v11, %v21935_v59  ;;  %v22061_v44 = vand.u32 4294901760, %v208_v6  ;;  %v22073_v48 = vand.u32 4294901760, %v11179_v8 }
 0x1ad   : > { %19875 = vmatmul.mubr.f32.vlgmr.msra.gmra.mrb[18].mxu1 %v9776_v45  ;;  %19848 = vmatpush3.msra.mxu0 %v9292_v3  ;;  %v21962_v24 = vsub.f32 %v10681_v13, %v21939_v47  ;;  %v22093_v13 = vsub.f32 %v209_v2, %v22065_v36 }
 0x1ae   : > { %19878 = vmatpush3.msra.mxu1 %v9787_v9  ;;  %19849 = vmatprep.mubr.f32.mxu0 %v21807_v29  ;;  %v22085_v11 = vsub.f32 %v208_v6, %v22061_v44  ;;  %v22096_v14 = vsub.f32 %v11179_v8, %v22073_v48 }
 0x1af   : > { %19852 = vmatprep.subr.mxu0 %v21829_v21  ;;  %19879 = vmatprep.mubr.f32.mxu1 %v21811_v63 }
 0x1b0   : > { %19882 = vmatprep.subr.mxu1 %v21837_v33 }
 0x1b4   : > { %19850 = vmatmul.mubr.f32.vlgmr.msra.gmra.mrb[18].mxu0 %v21817_v18 }
 0x1b5   : > { %19880 = vmatmul.mubr.f32.vlgmr.msra.gmra.mrb[18].mxu1 %v21819_v20  ;;  %19853 = vmatpush3.msra.mxu0 %v21829_v21  ;;  %v21975_v21 = vand.u32 4294901760, %v21957_v17 }
 0x1b6   : > { %19883 = vmatpush3.msra.mxu1 %v21837_v33  ;;  %19854 = vmatprep.mubr.f32.mxu0 %v21826_v19  ;;  %v10259_v19 = vand.u32 4294901760, %v21954_v16 }
 0x1b7   : > { %19857 = vmatprep.subr.mxu0 %v21805_v28  ;;  %19884 = vmatprep.mubr.f32.mxu1 %v21834_v32 }
 0x1b8   : > { %19887 = vmatprep.subr.mxu1 %v21809_v62 }
 0x1bc   : > { %19855 = vmatmul.mubr.f32.vlgmr.msra.gmra.mrb[18].mxu0 %v21840_v30  ;;  %v10754_v30 = vand.u32 4294901760, %v21962_v24 }
 0x1bd   : > { %19885 = vmatmul.mubr.f32.vlgmr.msra.gmra.mrb[18].mxu1 %v21843_v31  ;;  %19858 = vmatpush3.msra.mxu0 %v21805_v28  ;;  %v21979_v31 = vand.u32 4294901760, %v21965_v25 }
 0x1be   : > { %19888 = vmatpush3.msra.mxu1 %v21809_v62  ;;  %19859 = vmatprep.mubr.f32.mxu0 %v9269_v38 }
 0x1bf   : > { %19862 = vmatprep.subr.mxu0 %v21847_v39  ;;  %19889 = vmatprep.mubr.f32.mxu1 %v9764_v42  ;;  %v10764_v42 = vand.u32 4294901760, %v21971_v27 }
 0x1c0   : > { %19892 = vmatprep.subr.mxu1 %v21851_v43 }
 0x1c1   : > { %v10765_v55 = vsub.f32 %v21971_v27, %v10764_v42 }
 0x1c3   : > { %v10766_v35 = vand.u32 4294901760, %v10765_v55 }
 0x1c4   : > { %19860 = vmatmul.mubr.f32.vlgmr.msra.gmra.mrb[18].mxu0 %v9279_v53  ;;  %v10260_v53 = vsub.f32 %v21954_v16, %v10259_v19 }
 0x1c5   : > { %19890 = vmatmul.mubr.f32.vlgmr.msra.gmra.mrb[18].mxu1 %v9774_v56  ;;  %19863 = vmatpush3.msra.mxu0 %v21847_v39  ;;  %v10281_v56 = vsub.f32 %v21957_v17, %v21975_v21 }
 0x1c6   : > { %19893 = vmatpush3.msra.mxu1 %v21851_v43  ;;  %19864 = vmatprep.mubr.f32.mxu0 %v21807_v29  ;;  %v10261_v0 = vand.u32 4294901760, %v10260_v53 }
 0x1c7   : > { %19867 = vmatprep.subr.mxu0 %v21805_v28  ;;  %19894 = vmatprep.mubr.f32.mxu1 %v21811_v63  ;;  %v10282_v1 = vand.u32 4294901760, %v10281_v56 }
 0x1c8   : > { %19897 = vmatprep.subr.mxu1 %v21809_v62 }
 0x1cb   : > { %v19571_v32 = vpop.f32.mrb[8].mxu0 }
 0x1cc   : > { %v19601_v33 = vpop.f32.mrb[8].mxu1  ;;  %16145 = vst.msk [vmem:[#allocation2 + $0x88] sm:$0xff] %vm179_vm1, %v19571_v32  ;;  %v16272_v38 = vsel %vm179_vm1, %v19571_v32, 0.0  ;;  %v4730_v39 = vpop.f32.mrb[9].mxu0  ;;  %19865 = vmatmul.mubr.f32.vlgmr.msra.gmra.mrb[18].mxu0 %v21817_v18 }
 0x1cd   : > { %16147 = vst.msk [vmem:[#allocation2 + $0x98] sm:$0xff] %vm179_vm1, %v19601_v33  ;;  %v5225_v40 = vpop.f32.mrb[9].mxu1  ;;  %19895 = vmatmul.mubr.f32.vlgmr.msra.gmra.mrb[18].mxu1 %v21819_v20  ;;  %v16273_v43 = vadd.f32 %v16272_v38, %v21875_v5  ;;  %16144 = vst.msk [vmem:[#allocation2 + $0x80] sm:$0xff] %vm179_vm1, %v4730_v39  ;;  %v16209_v50 = vsel %vm179_vm1, %v4730_v39, 0.0  ;;  %19868 = vmatpush3.msra.mxu0 %v21805_v28  ;;  %v16274_v51 = vsel %vm179_vm1, %v19601_v33, 0.0  ;;  %v11259_v33 = vand.u32 4294901760, %v22096_v14 }
 0x1ce   : > { %16146 = vst.msk [vmem:[#allocation2 + $0x90] sm:$0xff] %vm179_vm1, %v5225_v40  ;;  %19898 = vmatpush3.msra.mxu1 %v21809_v62  ;;  %v16210_v52 = vadd.f32 %v16209_v50, %v21885_v23  ;;  %19869 = vmatprep.mubr.f32.mxu0 %v21807_v29  ;;  %v16211_v28 = vsel %vm179_vm1, %v5225_v40, 0.0  ;;  %v10755_v29 = vsub.f32 %v21962_v24, %v10754_v30  ;;  %v267_v23 = vld [vmem:[%s20911_s20 + $0x178] sm:$0xff] }
 0x1cf   : > { %19899 = vmatprep.mubr.f32.mxu1 %v21811_v63  ;;  %v22003_v57 = vadd.f32 %v16274_v51, %v16273_v43  ;;  %19902 = vmatprep.subr.mxu0 %v21933_v58  ;;  %v10776_v62 = vsub.f32 %v21965_v25, %v21979_v31  ;;  %v11674_v9 = vsel %vm284_vm0, %v267_v23, 0  ;;  %v11260_v50 = vsub.f32 %v22096_v14, %v11259_v33 }
 0x1d0   : > { %19932 = vmatprep.subr.mxu1 %v21937_v46  ;;  %v22013_v63 = vadd.f32 %v16211_v28, %v16210_v52  ;;  %v10756_v4 = vand.u32 4294901760, %v10755_v29  ;;  %v22075_v49 = vand.u32 4294901760, %v11674_v9 }
 0x1d1   : > { %v10777_v5 = vand.u32 4294901760, %v10776_v62  ;;  %v11261_v28 = vand.u32 4294901760, %v11260_v50  ;;  %v269_v62 = vld [vmem:[%s20911_s20 + $0x188] sm:$0xff]  ;;  %v212_v50 = vld [vmem:[%s24708_s0 + $0xd0] sm:$0xff] }
 0x1d2   : > { %v22099_v15 = vsub.f32 %v11674_v9, %v22075_v49 }
 0x1d4   : > { %19870 = vmatmul.mubr.f32.vlgmr.msra.gmra.mrb[18].mxu0 %v21817_v18  ;;  %v264_v18 = vld [vmem:[%s20911_s20 + $0x160] sm:$0xff] }
 0x1d5   : > { %19900 = vmatmul.mubr.f32.vlgmr.msra.gmra.mrb[18].mxu1 %v21819_v20  ;;  %19903 = vmatpush3.msra.mxu0 %v21933_v58  ;;  %v266_v20 = vld [vmem:[%s20911_s20 + $0x170] sm:$0xff]  ;;  %v11176_v7 = vsel %vm284_vm0, %v264_v18, 0 }
 0x1d6   : > { %19933 = vmatpush3.msra.mxu1 %v21937_v46  ;;  %19904 = vmatprep.mubr.f32.mxu0 %v10261_v0  ;;  %v11671_v3 = vsel %vm284_vm0, %v266_v20, 0  ;;  %v22063_v45 = vand.u32 4294901760, %v11176_v7  ;;  %v211_v0 = vld [vmem:[%s24708_s0 + $0xc8] sm:$0xff] }
 0x1d7   : > { %19907 = vmatprep.subr.mxu0 %v10282_v1  ;;  %19934 = vmatprep.mubr.f32.mxu1 %v10756_v4  ;;  %v22067_v37 = vand.u32 4294901760, %v11671_v3  ;;  %v12169_v4 = vsel %vm284_vm0, %v269_v62, 0  ;;  %v22193_v18 = vand.u32 4294901760, %v211_v0 }
 0x1d8   : > { %19937 = vmatprep.subr.mxu1 %v10777_v5  ;;  %19905 = vmatmul.mubr.f32.vlgmr.msra.gmra.mrb[20].mxu0 %v10271_v34  ;;  %v22082_v10 = vsub.f32 %v11176_v7, %v22063_v45  ;;  %v22189_v34 = vand.u32 4294901760, %v210_v54  ;;  %v22201_v22 = vand.u32 4294901760, %v12169_v4 }
 0x1d9   : > { %19935 = vmatmul.mubr.f32.vlgmr.msra.gmra.mrb[20].mxu1 %v10766_v35  ;;  %19908 = vmatpush3.msra.mxu0 %v10282_v1  ;;  %v22090_v12 = vsub.f32 %v11671_v3, %v22067_v37  ;;  %v22221_v3 = vsub.f32 %v211_v0, %v22193_v18 }
 0x1da   : > { %19938 = vmatpush3.msra.mxu1 %v10777_v5  ;;  %19909 = vmatprep.mubr.f32.mxu0 %v21935_v59  ;;  %v22213_v7 = vsub.f32 %v210_v54, %v22189_v34  ;;  %v22224_v8 = vsub.f32 %v12169_v4, %v22201_v22 }
 0x1db   : > { %19912 = vmatprep.subr.mxu0 %v21957_v17  ;;  %19939 = vmatprep.mubr.f32.mxu1 %v21939_v47 }
 0x1dc   : > { %19942 = vmatprep.subr.mxu1 %v21965_v25 }
 0x1e0   : > { %19910 = vmatmul.mubr.f32.vlgmr.msra.gmra.mrb[20].mxu0 %v21945_v60 }
 0x1e1   : > { %19940 = vmatmul.mubr.f32.vlgmr.msra.gmra.mrb[20].mxu1 %v21947_v61  ;;  %19913 = vmatpush3.msra.mxu0 %v21957_v17  ;;  %v22103_v17 = vand.u32 4294901760, %v22085_v11 }
 0x1e2   : > { %19943 = vmatpush3.msra.mxu1 %v21965_v25  ;;  %19914 = vmatprep.mubr.f32.mxu0 %v21954_v16  ;;  %v11249_v16 = vand.u32 4294901760, %v22082_v10 }
 0x1e3   : > { %19917 = vmatprep.subr.mxu0 %v21933_v58  ;;  %19944 = vmatprep.mubr.f32.mxu1 %v21962_v24 }
 0x1e4   : > { %19947 = vmatprep.subr.mxu1 %v21937_v46 }
 0x1e8   : > { %19915 = vmatmul.mubr.f32.vlgmr.msra.gmra.mrb[20].mxu0 %v21968_v26  ;;  %v11744_v26 = vand.u32 4294901760, %v22090_v12 }
 0x1e9   : > { %19945 = vmatmul.mubr.f32.vlgmr.msra.gmra.mrb[20].mxu1 %v21971_v27  ;;  %19918 = vmatpush3.msra.mxu0 %v21933_v58  ;;  %v22107_v27 = vand.u32 4294901760, %v22093_v13 }
 0x1ea   : > { %19948 = vmatpush3.msra.mxu1 %v21937_v46  ;;  %19919 = vmatprep.mubr.f32.mxu0 %v10259_v19 }
 0x1eb   : > { %19922 = vmatprep.subr.mxu0 %v21975_v21  ;;  %19949 = vmatprep.mubr.f32.mxu1 %v10754_v30  ;;  %v11754_v30 = vand.u32 4294901760, %v22099_v15 }
 0x1ec   : > { %19952 = vmatprep.subr.mxu1 %v21979_v31 }
 0x1ed   : > { %v11755_v51 = vsub.f32 %v22099_v15, %v11754_v30 }
 0x1ef   : > { %v11756_v29 = vand.u32 4294901760, %v11755_v51 }
 0x1f0   : > { %19920 = vmatmul.mubr.f32.vlgmr.msra.gmra.mrb[20].mxu0 %v10269_v41  ;;  %v11250_v41 = vsub.f32 %v22082_v10, %v11249_v16 }
 0x1f1   : > { %19950 = vmatmul.mubr.f32.vlgmr.msra.gmra.mrb[20].mxu1 %v10764_v42  ;;  %19923 = vmatpush3.msra.mxu0 %v21975_v21  ;;  %v11271_v42 = vsub.f32 %v22085_v11, %v22103_v17 }
 0x1f2   : > { %19953 = vmatpush3.msra.mxu1 %v21979_v31  ;;  %19924 = vmatprep.mubr.f32.mxu0 %v21935_v59  ;;  %v11251_v52 = vand.u32 4294901760, %v11250_v41 }
 0x1f3   : > { %19927 = vmatprep.subr.mxu0 %v21933_v58  ;;  %19954 = vmatprep.mubr.f32.mxu1 %v21939_v47  ;;  %v11272_v53 = vand.u32 4294901760, %v11271_v42 }
 0x1f4   : > { %19957 = vmatprep.subr.mxu1 %v21937_v46 }
 0x1f7   : > { %v19631_v24 = vpop.f32.mrb[10].mxu0 }
 0x1f8   : > { %v19661_v25 = vpop.f32.mrb[10].mxu1  ;;  %16149 = vst.msk [vmem:[#allocation2 + $0xa8] sm:$0xff] %vm179_vm1, %v19631_v24  ;;  %v16276_v19 = vsel %vm179_vm1, %v19631_v24, 0.0  ;;  %v5720_v21 = vpop.f32.mrb[11].mxu0  ;;  %19925 = vmatmul.mubr.f32.vlgmr.msra.gmra.mrb[20].mxu0 %v21945_v60 }
 0x1f9   : > { %16151 = vst.msk [vmem:[#allocation2 + $0xb8] sm:$0xff] %vm179_vm1, %v19661_v25  ;;  %v6215_v32 = vpop.f32.mrb[11].mxu1  ;;  %19955 = vmatmul.mubr.f32.vlgmr.msra.gmra.mrb[20].mxu1 %v21947_v61  ;;  %v16277_v31 = vadd.f32 %v16276_v19, %v22003_v57  ;;  %16148 = vst.msk [vmem:[#allocation2 + $0xa0] sm:$0xff] %vm179_vm1, %v5720_v21  ;;  %v16213_v38 = vsel %vm179_vm1, %v5720_v21, 0.0  ;;  %19928 = vmatpush3.msra.mxu0 %v21933_v58  ;;  %v16278_v39 = vsel %vm179_vm1, %v19661_v25, 0.0  ;;  %v12249_v25 = vand.u32 4294901760, %v22224_v8 }
 0x1fa   : > { %16150 = vst.msk [vmem:[#allocation2 + $0xb0] sm:$0xff] %vm179_vm1, %v6215_v32  ;;  %19958 = vmatpush3.msra.mxu1 %v21937_v46  ;;  %v16214_v40 = vadd.f32 %v16213_v38, %v22013_v63  ;;  %19929 = vmatprep.mubr.f32.mxu0 %v21935_v59  ;;  %v16215_v58 = vsel %vm179_vm1, %v6215_v32, 0.0  ;;  %v11745_v59 = vsub.f32 %v22090_v12, %v11744_v26  ;;  %v271_v63 = vld [vmem:[%s20911_s20 + $0x198] sm:$0xff] }
 0x1fb   : > { %19959 = vmatprep.mubr.f32.mxu1 %v21939_v47  ;;  %v22131_v43 = vadd.f32 %v16278_v39, %v16277_v31  ;;  %19962 = vmatprep.subr.mxu0 %v22061_v44  ;;  %v11766_v46 = vsub.f32 %v22093_v13, %v22107_v27  ;;  %v12664_v5 = vsel %vm284_vm0, %v271_v63, 0  ;;  %v12250_v38 = vsub.f32 %v22224_v8, %v12249_v25 }
 0x1fc   : > { %19992 = vmatprep.subr.mxu1 %v22065_v36  ;;  %v22141_v47 = vadd.f32 %v16215_v58, %v16214_v40  ;;  %v11746_v56 = vand.u32 4294901760, %v11745_v59  ;;  %v22203_v23 = vand.u32 4294901760, %v12664_v5 }
 0x1fd   : > { %v11767_v57 = vand.u32 4294901760, %v11766_v46  ;;  %v12251_v58 = vand.u32 4294901760, %v12250_v38  ;;  %v273_v46 = vld [vmem:[%s20911_s20 + $0x1a8] sm:$0xff]  ;;  %v214_v38 = vld [vmem:[%s24708_s0 + $0xe0] sm:$0xff] }
 0x1fe   : > { %v22227_v9 = vsub.f32 %v12664_v5, %v22203_v23 }
 0x200   : > { %19930 = vmatmul.mubr.f32.vlgmr.msra.gmra.mrb[20].mxu0 %v21945_v60  ;;  %v268_v60 = vld [vmem:[%s20911_s20 + $0x180] sm:$0xff] }
 0x201   : > { %19960 = vmatmul.mubr.f32.vlgmr.msra.gmra.mrb[20].mxu1 %v21947_v61  ;;  %19963 = vmatpush3.msra.mxu0 %v22061_v44  ;;  %v270_v61 = vld [vmem:[%s20911_s20 + $0x190] sm:$0xff]  ;;  %v12166_v55 = vsel %vm284_vm0, %v268_v60, 0 }
 0x202   : > { %19993 = vmatpush3.msra.mxu1 %v22065_v36  ;;  %19964 = vmatprep.mubr.f32.mxu0 %v11251_v52  ;;  %v12661_v1 = vsel %vm284_vm0, %v270_v61, 0  ;;  %v22191_v35 = vand.u32 4294901760, %v12166_v55  ;;  %v213_v52 = vld [vmem:[%s24708_s0 + $0xd8] sm:$0xff] }
 0x203   : > { %19967 = vmatprep.subr.mxu0 %v11272_v53  ;;  %19994 = vmatprep.mubr.f32.mxu1 %v11746_v56  ;;  %v22195_v20 = vand.u32 4294901760, %v12661_v1  ;;  %v13159_v56 = vsel %vm284_vm0, %v273_v46, 0  ;;  %v22321_v60 = vand.u32 4294901760, %v213_v52 }
 0x204   : > { %19997 = vmatprep.subr.mxu1 %v11767_v57  ;;  %19965 = vmatmul.mubr.f32.vlgmr.msra.gmra.mrb[22].mxu0 %v11261_v28  ;;  %v22210_v6 = vsub.f32 %v12166_v55, %v22191_v35  ;;  %v22317_v28 = vand.u32 4294901760, %v212_v50  ;;  %v22329_v62 = vand.u32 4294901760, %v13159_v56 }
 0x205   : > { %19995 = vmatmul.mubr.f32.vlgmr.msra.gmra.mrb[22].mxu1 %v11756_v29  ;;  %19968 = vmatpush3.msra.mxu0 %v11272_v53  ;;  %v22218_v2 = vsub.f32 %v12661_v1, %v22195_v20  ;;  %v22349_v1 = vsub.f32 %v213_v52, %v22321_v60 }
 0x206   : > { %19998 = vmatpush3.msra.mxu1 %v11767_v57  ;;  %19969 = vmatprep.mubr.f32.mxu0 %v22063_v45  ;;  %v22341_v55 = vsub.f32 %v212_v50, %v22317_v28  ;;  %v22352_v4 = vsub.f32 %v13159_v56, %v22329_v62 }
 0x207   : > { %19972 = vmatprep.subr.mxu0 %v22085_v11  ;;  %19999 = vmatprep.mubr.f32.mxu1 %v22067_v37 }
 0x208   : > { %20002 = vmatprep.subr.mxu1 %v22093_v13 }
 0x20c   : > { %19970 = vmatmul.mubr.f32.vlgmr.msra.gmra.mrb[22].mxu0 %v22073_v48 }
 0x20d   : > { %20000 = vmatmul.mubr.f32.vlgmr.msra.gmra.mrb[22].mxu1 %v22075_v49  ;;  %19973 = vmatpush3.msra.mxu0 %v22085_v11  ;;  %v22231_v11 = vand.u32 4294901760, %v22213_v7 }
 0x20e   : > { %20003 = vmatpush3.msra.mxu1 %v22093_v13  ;;  %19974 = vmatprep.mubr.f32.mxu0 %v22082_v10  ;;  %v12239_v10 = vand.u32 4294901760, %v22210_v6 }
 0x20f   : > { %19977 = vmatprep.subr.mxu0 %v22061_v44  ;;  %20004 = vmatprep.mubr.f32.mxu1 %v22090_v12 }
 0x210   : > { %20007 = vmatprep.subr.mxu1 %v22065_v36 }
 0x214   : > { %19975 = vmatmul.mubr.f32.vlgmr.msra.gmra.mrb[22].mxu0 %v22096_v14  ;;  %v12734_v14 = vand.u32 4294901760, %v22218_v2 }
 0x215   : > { %20005 = vmatmul.mubr.f32.vlgmr.msra.gmra.mrb[22].mxu1 %v22099_v15  ;;  %19978 = vmatpush3.msra.mxu0 %v22061_v44  ;;  %v22235_v15 = vand.u32 4294901760, %v22221_v3 }
 0x216   : > { %20008 = vmatpush3.msra.mxu1 %v22065_v36  ;;  %19979 = vmatprep.mubr.f32.mxu0 %v11249_v16 }
 0x217   : > { %19982 = vmatprep.subr.mxu0 %v22103_v17  ;;  %20009 = vmatprep.mubr.f32.mxu1 %v11744_v26  ;;  %v12744_v26 = vand.u32 4294901760, %v22227_v9 }
 0x218   : > { %20012 = vmatprep.subr.mxu1 %v22107_v27 }
 0x219   : > { %v12745_v39 = vsub.f32 %v22227_v9, %v12744_v26 }
 0x21b   : > { %v12746_v59 = vand.u32 4294901760, %v12745_v39 }
 0x21c   : > { %19980 = vmatmul.mubr.f32.vlgmr.msra.gmra.mrb[22].mxu0 %v11259_v33  ;;  %v12240_v33 = vsub.f32 %v22210_v6, %v12239_v10 }
 0x21d   : > { %20010 = vmatmul.mubr.f32.vlgmr.msra.gmra.mrb[22].mxu1 %v11754_v30  ;;  %19983 = vmatpush3.msra.mxu0 %v22103_v17  ;;  %v12261_v30 = vsub.f32 %v22213_v7, %v22231_v11 }
 0x21e   : > { %20013 = vmatpush3.msra.mxu1 %v22107_v27  ;;  %19984 = vmatprep.mubr.f32.mxu0 %v22063_v45  ;;  %v12241_v40 = vand.u32 4294901760, %v12240_v33 }
 0x21f   : > { %19987 = vmatprep.subr.mxu0 %v22061_v44  ;;  %20014 = vmatprep.mubr.f32.mxu1 %v22067_v37  ;;  %v12262_v41 = vand.u32 4294901760, %v12261_v30 }
 0x220   : > { %20017 = vmatprep.subr.mxu1 %v22065_v36 }
 0x223   : > { %v19691_v12 = vpop.f32.mrb[12].mxu0 }
 0x224   : > { %v19721_v13 = vpop.f32.mrb[12].mxu1  ;;  %16153 = vst.msk [vmem:[#allocation2 + $0xc8] sm:$0xff] %vm179_vm1, %v19691_v12  ;;  %v16280_v16 = vsel %vm179_vm1, %v19691_v12, 0.0  ;;  %v6710_v17 = vpop.f32.mrb[13].mxu0  ;;  %19985 = vmatmul.mubr.f32.vlgmr.msra.gmra.mrb[22].mxu0 %v22073_v48 }
 0x225   : > { %16155 = vst.msk [vmem:[#allocation2 + $0xd8] sm:$0xff] %vm179_vm1, %v19721_v13  ;;  %v7205_v24 = vpop.f32.mrb[13].mxu1  ;;  %20015 = vmatmul.mubr.f32.vlgmr.msra.gmra.mrb[22].mxu1 %v22075_v49  ;;  %v16281_v27 = vadd.f32 %v16280_v16, %v22131_v43  ;;  %16152 = vst.msk [vmem:[#allocation2 + $0xc0] sm:$0xff] %vm179_vm1, %v6710_v17  ;;  %v16217_v19 = vsel %vm179_vm1, %v6710_v17, 0.0  ;;  %19988 = vmatpush3.msra.mxu0 %v22061_v44  ;;  %v16282_v21 = vsel %vm179_vm1, %v19721_v13, 0.0  ;;  %v13239_v13 = vand.u32 4294901760, %v22352_v4 }
 0x226   : > { %16154 = vst.msk [vmem:[#allocation2 + $0xd0] sm:$0xff] %vm179_vm1, %v7205_v24  ;;  %20018 = vmatpush3.msra.mxu1 %v22065_v36  ;;  %v16218_v32 = vadd.f32 %v16217_v19, %v22141_v47  ;;  %19989 = vmatprep.mubr.f32.mxu0 %v22063_v45  ;;  %v16219_v44 = vsel %vm179_vm1, %v7205_v24, 0.0  ;;  %v12735_v45 = vsub.f32 %v22218_v2, %v12734_v14  ;;  %v275_v47 = vld [vmem:[%s20911_s20 + $0x1b8] sm:$0xff] }
 0x227   : > { %20019 = vmatprep.mubr.f32.mxu1 %v22067_v37  ;;  %v22259_v31 = vadd.f32 %v16282_v21, %v16281_v27  ;;  %20022 = vmatprep.subr.mxu0 %v22189_v34  ;;  %v12756_v36 = vsub.f32 %v22221_v3, %v22235_v15  ;;  %v13654_v57 = vsel %vm284_vm0, %v275_v47, 0  ;;  %v13240_v19 = vsub.f32 %v22352_v4, %v13239_v13 }
 0x228   : > { %20052 = vmatprep.subr.mxu1 %v22193_v18  ;;  %v22269_v37 = vadd.f32 %v16219_v44, %v16218_v32  ;;  %v12736_v42 = vand.u32 4294901760, %v12735_v45  ;;  %v22331_v63 = vand.u32 4294901760, %v13654_v57 }
 0x229   : > { %v12757_v43 = vand.u32 4294901760, %v12756_v36  ;;  %v13241_v44 = vand.u32 4294901760, %v13240_v19  ;;  %v277_v36 = vld [vmem:[%s20911_s20 + $0x1c8] sm:$0xff]  ;;  %v216_v19 = vld [vmem:[%s24708_s0 + $0xf0] sm:$0xff] }
 0x22a   : > { %v22355_v5 = vsub.f32 %v13654_v57, %v22331_v63 }
 0x22c   : > { %19990 = vmatmul.mubr.f32.vlgmr.msra.gmra.mrb[22].mxu0 %v22073_v48  ;;  %v272_v48 = vld [vmem:[%s20911_s20 + $0x1a0] sm:$0xff] }
 0x22d   : > { %20020 = vmatmul.mubr.f32.vlgmr.msra.gmra.mrb[22].mxu1 %v22075_v49  ;;  %20023 = vmatpush3.msra.mxu0 %v22189_v34  ;;  %v274_v49 = vld [vmem:[%s20911_s20 + $0x1b0] sm:$0xff]  ;;  %v13156_v51 = vsel %vm284_vm0, %v272_v48, 0 }
 0x22e   : > { %20053 = vmatpush3.msra.mxu1 %v22193_v18  ;;  %20024 = vmatprep.mubr.f32.mxu0 %v12241_v40  ;;  %v13651_v53 = vsel %vm284_vm0, %v274_v49, 0  ;;  %v22319_v29 = vand.u32 4294901760, %v13156_v51  ;;  %v215_v40 = vld [vmem:[%s24708_s0 + $0xe8] sm:$0xff] }
 0x22f   : > { %20027 = vmatprep.subr.mxu0 %v12262_v41  ;;  %20054 = vmatprep.mubr.f32.mxu1 %v12736_v42  ;;  %v22323_v61 = vand.u32 4294901760, %v13651_v53  ;;  %v14149_v42 = vsel %vm284_vm0, %v277_v36, 0  ;;  %v22449_v48 = vand.u32 4294901760, %v215_v40 }
 0x230   : > { %20057 = vmatprep.subr.mxu1 %v12757_v43  ;;  %20025 = vmatmul.mubr.f32.vlgmr.msra.gmra.mrb[24].mxu0 %v12251_v58  ;;  %v22338_v54 = vsub.f32 %v13156_v51, %v22319_v29  ;;  %v22445_v58 = vand.u32 4294901760, %v214_v38  ;;  %v22457_v46 = vand.u32 4294901760, %v14149_v42 }
 0x231   : > { %20055 = vmatmul.mubr.f32.vlgmr.msra.gmra.mrb[24].mxu1 %v12746_v59  ;;  %20028 = vmatpush3.msra.mxu0 %v12262_v41  ;;  %v22346_v0 = vsub.f32 %v13651_v53, %v22323_v61  ;;  %v22477_v53 = vsub.f32 %v215_v40, %v22449_v48 }
 0x232   : > { %20058 = vmatpush3.msra.mxu1 %v12757_v43  ;;  %20029 = vmatprep.mubr.f32.mxu0 %v22191_v35  ;;  %v22469_v51 = vsub.f32 %v214_v38, %v22445_v58  ;;  %v22480_v56 = vsub.f32 %v14149_v42, %v22457_v46 }
 0x233   : > { %20032 = vmatprep.subr.mxu0 %v22213_v7  ;;  %20059 = vmatprep.mubr.f32.mxu1 %v22195_v20 }
 0x234   : > { %20062 = vmatprep.subr.mxu1 %v22221_v3 }
 0x238   : > { %20030 = vmatmul.mubr.f32.vlgmr.msra.gmra.mrb[24].mxu0 %v22201_v22 }
 0x239   : > { %20060 = vmatmul.mubr.f32.vlgmr.msra.gmra.mrb[24].mxu1 %v22203_v23  ;;  %20033 = vmatpush3.msra.mxu0 %v22213_v7  ;;  %v22359_v7 = vand.u32 4294901760, %v22341_v55 }
 0x23a   : > { %20063 = vmatpush3.msra.mxu1 %v22221_v3  ;;  %20034 = vmatprep.mubr.f32.mxu0 %v22210_v6  ;;  %v13229_v6 = vand.u32 4294901760, %v22338_v54 }
 0x23b   : > { %20037 = vmatprep.subr.mxu0 %v22189_v34  ;;  %20064 = vmatprep.mubr.f32.mxu1 %v22218_v2 }
 0x23c   : > { %20067 = vmatprep.subr.mxu1 %v22193_v18 }
 0x240   : > { %20035 = vmatmul.mubr.f32.vlgmr.msra.gmra.mrb[24].mxu0 %v22224_v8  ;;  %v13724_v8 = vand.u32 4294901760, %v22346_v0 }
 0x241   : > { %20065 = vmatmul.mubr.f32.vlgmr.msra.gmra.mrb[24].mxu1 %v22227_v9  ;;  %20038 = vmatpush3.msra.mxu0 %v22189_v34  ;;  %v22363_v9 = vand.u32 4294901760, %v22349_v1 }
 0x242   : > { %20068 = vmatpush3.msra.mxu1 %v22193_v18  ;;  %20039 = vmatprep.mubr.f32.mxu0 %v12239_v10 }
 0x243   : > { %20042 = vmatprep.subr.mxu0 %v22231_v11  ;;  %20069 = vmatprep.mubr.f32.mxu1 %v12734_v14  ;;  %v13734_v14 = vand.u32 4294901760, %v22355_v5 }
 0x244   : > { %20072 = vmatprep.subr.mxu1 %v22235_v15 }
 0x245   : > { %v13735_v21 = vsub.f32 %v22355_v5, %v13734_v14 }
 0x247   : > { %v13736_v45 = vand.u32 4294901760, %v13735_v21 }
 0x248   : > { %20040 = vmatmul.mubr.f32.vlgmr.msra.gmra.mrb[24].mxu0 %v12249_v25  ;;  %v13230_v25 = vsub.f32 %v22338_v54, %v13229_v6 }
 0x249   : > { %20070 = vmatmul.mubr.f32.vlgmr.msra.gmra.mrb[24].mxu1 %v12744_v26  ;;  %20043 = vmatpush3.msra.mxu0 %v22231_v11  ;;  %v13251_v26 = vsub.f32 %v22341_v55, %v22359_v7 }
 0x24a   : > { %20073 = vmatpush3.msra.mxu1 %v22235_v15  ;;  %20044 = vmatprep.mubr.f32.mxu0 %v22191_v35  ;;  %v13231_v32 = vand.u32 4294901760, %v13230_v25 }
 0x24b   : > { %20047 = vmatprep.subr.mxu0 %v22189_v34  ;;  %20074 = vmatprep.mubr.f32.mxu1 %v22195_v20  ;;  %v13252_v33 = vand.u32 4294901760, %v13251_v26 }
 0x24c   : > { %20077 = vmatprep.subr.mxu1 %v22193_v18 }
 0x24f   : > { %v19751_v2 = vpop.f32.mrb[14].mxu0 }
 0x250   : > { %v19781_v3 = vpop.f32.mrb[14].mxu1  ;;  %16157 = vst.msk [vmem:[#allocation2 + $0xe8] sm:$0xff] %vm179_vm1, %v19751_v2  ;;  %v16284_v10 = vsel %vm179_vm1, %v19751_v2, 0.0  ;;  %v7700_v11 = vpop.f32.mrb[15].mxu0  ;;  %20045 = vmatmul.mubr.f32.vlgmr.msra.gmra.mrb[24].mxu0 %v22201_v22 }
 0x251   : > { %16159 = vst.msk [vmem:[#allocation2 + $0xf8] sm:$0xff] %vm179_vm1, %v19781_v3  ;;  %v8195_v12 = vpop.f32.mrb[15].mxu1  ;;  %20075 = vmatmul.mubr.f32.vlgmr.msra.gmra.mrb[24].mxu1 %v22203_v23  ;;  %v16285_v15 = vadd.f32 %v16284_v10, %v22259_v31  ;;  %16156 = vst.msk [vmem:[#allocation2 + $0xe0] sm:$0xff] %vm179_vm1, %v7700_v11  ;;  %v16221_v16 = vsel %vm179_vm1, %v7700_v11, 0.0  ;;  %20048 = vmatpush3.msra.mxu0 %v22189_v34  ;;  %v16286_v17 = vsel %vm179_vm1, %v19781_v3, 0.0  ;;  %v14229_v3 = vand.u32 4294901760, %v22480_v56 }
 0x252   : > { %16158 = vst.msk [vmem:[#allocation2 + $0xf0] sm:$0xff] %vm179_vm1, %v8195_v12  ;;  %20078 = vmatpush3.msra.mxu1 %v22193_v18  ;;  %v16222_v24 = vadd.f32 %v16221_v16, %v22269_v37  ;;  %20049 = vmatprep.mubr.f32.mxu0 %v22191_v35  ;;  %v16223_v34 = vsel %vm179_vm1, %v8195_v12, 0.0  ;;  %v13725_v35 = vsub.f32 %v22346_v0, %v13724_v8  ;;  %v279_v37 = vld [vmem:[%s20911_s20 + $0x1d8] sm:$0xff] }
 0x253   : > { %20079 = vmatprep.mubr.f32.mxu1 %v22195_v20  ;;  %v22387_v27 = vadd.f32 %v16286_v17, %v16285_v15  ;;  %20082 = vmatprep.subr.mxu0 %v22317_v28  ;;  %v13746_v18 = vsub.f32 %v22349_v1, %v22363_v9  ;;  %v14644_v43 = vsel %vm284_vm0, %v279_v37, 0  ;;  %v14230_v16 = vsub.f32 %v22480_v56, %v14229_v3 }
 0x254   : > { %20112 = vmatprep.subr.mxu1 %v22321_v60  ;;  %v22397_v20 = vadd.f32 %v16223_v34, %v16222_v24  ;;  %v13726_v30 = vand.u32 4294901760, %v13725_v35  ;;  %v22459_v47 = vand.u32 4294901760, %v14644_v43 }
 0x255   : > { %v13747_v31 = vand.u32 4294901760, %v13746_v18  ;;  %v14231_v34 = vand.u32 4294901760, %v14230_v16  ;;  %v281_v18 = vld [vmem:[%s20911_s20 + $0x1e8] sm:$0xff] }
 0x256   : > { %v22483_v57 = vsub.f32 %v14644_v43, %v22459_v47 }
 0x258   : > { %20050 = vmatmul.mubr.f32.vlgmr.msra.gmra.mrb[24].mxu0 %v22201_v22  ;;  %v276_v22 = vld [vmem:[%s20911_s20 + $0x1c0] sm:$0xff] }
 0x259   : > { %20080 = vmatmul.mubr.f32.vlgmr.msra.gmra.mrb[24].mxu1 %v22203_v23  ;;  %20083 = vmatpush3.msra.mxu0 %v22317_v28  ;;  %v278_v23 = vld [vmem:[%s20911_s20 + $0x1d0] sm:$0xff]  ;;  %v14146_v39 = vsel %vm284_vm0, %v276_v22, 0 }
 0x25a   : > { %20113 = vmatpush3.msra.mxu1 %v22321_v60  ;;  %20084 = vmatprep.mubr.f32.mxu0 %v13231_v32  ;;  %v14641_v41 = vsel %vm284_vm0, %v278_v23, 0  ;;  %v22447_v59 = vand.u32 4294901760, %v14146_v39  ;;  %v217_v32 = vld [vmem:[%s24708_s0 + $0xf8] sm:$0xff] }
 0x25b   : > { %20087 = vmatprep.subr.mxu0 %v13252_v33  ;;  %20114 = vmatprep.mubr.f32.mxu1 %v13726_v30  ;;  %v22451_v49 = vand.u32 4294901760, %v14641_v41  ;;  %v15139_v30 = vsel %vm284_vm0, %v281_v18, 0  ;;  %v22577_v22 = vand.u32 4294901760, %v217_v32 }
 0x25c   : > { %20117 = vmatprep.subr.mxu1 %v13747_v31  ;;  %20085 = vmatmul.mubr.f32.vlgmr.msra.gmra.mrb[26].mxu0 %v13241_v44  ;;  %v22466_v50 = vsub.f32 %v14146_v39, %v22447_v59  ;;  %v22573_v44 = vand.u32 4294901760, %v216_v19  ;;  %v22585_v36 = vand.u32 4294901760, %v15139_v30 }
 0x25d   : > { %20115 = vmatmul.mubr.f32.vlgmr.msra.gmra.mrb[26].mxu1 %v13736_v45  ;;  %20088 = vmatpush3.msra.mxu0 %v13252_v33  ;;  %v22474_v52 = vsub.f32 %v14641_v41, %v22451_v49  ;;  %v22605_v41 = vsub.f32 %v217_v32, %v22577_v22 }
 0x25e   : > { %20118 = vmatpush3.msra.mxu1 %v13747_v31  ;;  %20089 = vmatprep.mubr.f32.mxu0 %v22319_v29  ;;  %v22597_v39 = vsub.f32 %v216_v19, %v22573_v44  ;;  %v22608_v42 = vsub.f32 %v15139_v30, %v22585_v36 }
 0x25f   : > { %20092 = vmatprep.subr.mxu0 %v22341_v55  ;;  %20119 = vmatprep.mubr.f32.mxu1 %v22323_v61 }
 0x260   : > { %20122 = vmatprep.subr.mxu1 %v22349_v1 }
 0x264   : > { %20090 = vmatmul.mubr.f32.vlgmr.msra.gmra.mrb[26].mxu0 %v22329_v62 }
 0x265   : > { %20120 = vmatmul.mubr.f32.vlgmr.msra.gmra.mrb[26].mxu1 %v22331_v63  ;;  %20093 = vmatpush3.msra.mxu0 %v22341_v55  ;;  %v22487_v55 = vand.u32 4294901760, %v22469_v51 }
 0x266   : > { %20123 = vmatpush3.msra.mxu1 %v22349_v1  ;;  %20094 = vmatprep.mubr.f32.mxu0 %v22338_v54  ;;  %v14219_v54 = vand.u32 4294901760, %v22466_v50 }
 0x267   : > { %20097 = vmatprep.subr.mxu0 %v22317_v28  ;;  %20124 = vmatprep.mubr.f32.mxu1 %v22346_v0 }
 0x268   : > { %20127 = vmatprep.subr.mxu1 %v22321_v60 }
 0x26c   : > { %20095 = vmatmul.mubr.f32.vlgmr.msra.gmra.mrb[26].mxu0 %v22352_v4  ;;  %v14714_v4 = vand.u32 4294901760, %v22474_v52 }
 0x26d   : > { %20125 = vmatmul.mubr.f32.vlgmr.msra.gmra.mrb[26].mxu1 %v22355_v5  ;;  %20098 = vmatpush3.msra.mxu0 %v22317_v28  ;;  %v22491_v5 = vand.u32 4294901760, %v22477_v53 }
 0x26e   : > { %20128 = vmatpush3.msra.mxu1 %v22321_v60  ;;  %20099 = vmatprep.mubr.f32.mxu0 %v13229_v6 }
 0x26f   : > { %20102 = vmatprep.subr.mxu0 %v22359_v7  ;;  %20129 = vmatprep.mubr.f32.mxu1 %v13724_v8  ;;  %v14724_v8 = vand.u32 4294901760, %v22483_v57 }
 0x270   : > { %20132 = vmatprep.subr.mxu1 %v22363_v9 }
 0x271   : > { %v14725_v17 = vsub.f32 %v22483_v57, %v14724_v8 }
 0x273   : > { %v14726_v35 = vand.u32 4294901760, %v14725_v17 }
 0x274   : > { %20100 = vmatmul.mubr.f32.vlgmr.msra.gmra.mrb[26].mxu0 %v13239_v13  ;;  %v14220_v13 = vsub.f32 %v22466_v50, %v14219_v54 }
 0x275   : > { %20130 = vmatmul.mubr.f32.vlgmr.msra.gmra.mrb[26].mxu1 %v13734_v14  ;;  %20103 = vmatpush3.msra.mxu0 %v22359_v7  ;;  %v14241_v14 = vsub.f32 %v22469_v51, %v22487_v55 }
 0x276   : > { %20133 = vmatpush3.msra.mxu1 %v22363_v9  ;;  %20104 = vmatprep.mubr.f32.mxu0 %v22319_v29  ;;  %v14221_v24 = vand.u32 4294901760, %v14220_v13 }
 0x277   : > { %20107 = vmatprep.subr.mxu0 %v22317_v28  ;;  %20134 = vmatprep.mubr.f32.mxu1 %v22323_v61  ;;  %v14242_v25 = vand.u32 4294901760, %v14241_v14 }
 0x278   : > { %20137 = vmatprep.subr.mxu1 %v22321_v60 }
 0x27b   : > { %v19811_v0 = vpop.f32.mrb[16].mxu0 }
 0x27c   : > { %v19841_v1 = vpop.f32.mrb[16].mxu1  ;;  %16161 = vst.msk [vmem:[#allocation2 + $0x108] sm:$0xff] %vm179_vm1, %v19811_v0  ;;  %v16288_v6 = vsel %vm179_vm1, %v19811_v0, 0.0  ;;  %v8690_v7 = vpop.f32.mrb[17].mxu0  ;;  %20105 = vmatmul.mubr.f32.vlgmr.msra.gmra.mrb[26].mxu0 %v22329_v62 }
 0x27d   : > { %16163 = vst.msk [vmem:[#allocation2 + $0x118] sm:$0xff] %vm179_vm1, %v19841_v1  ;;  %v9185_v2 = vpop.f32.mrb[17].mxu1  ;;  %20135 = vmatmul.mubr.f32.vlgmr.msra.gmra.mrb[26].mxu1 %v22331_v63  ;;  %v16289_v9 = vadd.f32 %v16288_v6, %v22387_v27  ;;  %16160 = vst.msk [vmem:[#allocation2 + $0x100] sm:$0xff] %vm179_vm1, %v8690_v7  ;;  %v16225_v10 = vsel %vm179_vm1, %v8690_v7, 0.0  ;;  %20108 = vmatpush3.msra.mxu0 %v22317_v28  ;;  %v16290_v11 = vsel %vm179_vm1, %v19841_v1, 0.0  ;;  %v15219_v1 = vand.u32 4294901760, %v22608_v42 }
 0x27e   : > { %16162 = vst.msk [vmem:[#allocation2 + $0x110] sm:$0xff] %vm179_vm1, %v9185_v2  ;;  %20138 = vmatpush3.msra.mxu1 %v22321_v60  ;;  %v16226_v12 = vadd.f32 %v16225_v10, %v22397_v20  ;;  %20109 = vmatprep.mubr.f32.mxu0 %v22319_v29  ;;  %v16227_v28 = vsel %vm179_vm1, %v9185_v2, 0.0  ;;  %v14715_v29 = vsub.f32 %v22474_v52, %v14714_v4  ;;  %v283_v20 = vld [vmem:[%s20911_s20 + $0x1f8] sm:$0xff] }
 0x27f   : > { %20139 = vmatprep.mubr.f32.mxu1 %v22323_v61  ;;  %v22515_v15 = vadd.f32 %v16290_v11, %v16289_v9  ;;  %20142 = vmatprep.subr.mxu0 %v22445_v58  ;;  %v14736_v60 = vsub.f32 %v22477_v53, %v22491_v5  ;;  %v15634_v31 = vsel %vm284_vm0, %v283_v20, 0  ;;  %v15220_v10 = vsub.f32 %v22608_v42, %v15219_v1 }
 0x280   : > { %20172 = vmatprep.subr.mxu1 %v22449_v48  ;;  %v22525_v61 = vadd.f32 %v16227_v28, %v16226_v12  ;;  %v14716_v26 = vand.u32 4294901760, %v14715_v29  ;;  %v22587_v37 = vand.u32 4294901760, %v15634_v31 }
 0x281   : > { %v14737_v27 = vand.u32 4294901760, %v14736_v60  ;;  %v15221_v28 = vand.u32 4294901760, %v15220_v10 }
 0x282   : > { %v22611_v43 = vsub.f32 %v15634_v31, %v22587_v37 }
 0x284   : > { %20110 = vmatmul.mubr.f32.vlgmr.msra.gmra.mrb[26].mxu0 %v22329_v62  ;;  %v280_v62 = vld [vmem:[%s20911_s20 + $0x1e0] sm:$0xff] }
 0x285   : > { %20140 = vmatmul.mubr.f32.vlgmr.msra.gmra.mrb[26].mxu1 %v22331_v63  ;;  %20143 = vmatpush3.msra.mxu0 %v22445_v58  ;;  %v282_v63 = vld [vmem:[%s20911_s20 + $0x1f0] sm:$0xff]  ;;  %v15136_v21 = vsel %vm284_vm0, %v280_v62, 0  ;;  %s18725_s20 = sshll.u32 %s24863_s9, 4 }
 0x286   : > { %20173 = vmatpush3.msra.mxu1 %v22449_v48  ;;  %20144 = vmatprep.mubr.f32.mxu0 %v14221_v24  ;;  %v15631_v33 = vsel %vm284_vm0, %v282_v63, 0  ;;  %v22575_v45 = vand.u32 4294901760, %v15136_v21  ;;  %s174_s13 = scalar_lea.vmem %s24710_s2, %s18725_s20 }
 0x287   : > { %20147 = vmatprep.subr.mxu0 %v14242_v25  ;;  %20174 = vmatprep.mubr.f32.mxu1 %v14716_v26  ;;  %v22579_v23 = vand.u32 4294901760, %v15631_v33 }
 0x288   : > { %20177 = vmatprep.subr.mxu1 %v14737_v27  ;;  %20145 = vmatmul.mubr.f32.vlgmr.msra.gmra.mrb[28].mxu0 %v14231_v34  ;;  %v22594_v38 = vsub.f32 %v15136_v21, %v22575_v45 }
 0x289   : > { %20175 = vmatmul.mubr.f32.vlgmr.msra.gmra.mrb[28].mxu1 %v14726_v35  ;;  %20148 = vmatpush3.msra.mxu0 %v14242_v25  ;;  %v22602_v40 = vsub.f32 %v15631_v33, %v22579_v23 }
 0x28a   : > { %20178 = vmatpush3.msra.mxu1 %v14737_v27  ;;  %20149 = vmatprep.mubr.f32.mxu0 %v22447_v59 }
 0x28b   : > { %20152 = vmatprep.subr.mxu0 %v22469_v51  ;;  %20179 = vmatprep.mubr.f32.mxu1 %v22451_v49 }
 0x28c   : > { %20182 = vmatprep.subr.mxu1 %v22477_v53 }
 0x290   : > { %20150 = vmatmul.mubr.f32.vlgmr.msra.gmra.mrb[28].mxu0 %v22457_v46 }
 0x291   : > { %20180 = vmatmul.mubr.f32.vlgmr.msra.gmra.mrb[28].mxu1 %v22459_v47  ;;  %20153 = vmatpush3.msra.mxu0 %v22469_v51  ;;  %v22615_v51 = vand.u32 4294901760, %v22597_v39 }
 0x292   : > { %20183 = vmatpush3.msra.mxu1 %v22477_v53  ;;  %20154 = vmatprep.mubr.f32.mxu0 %v22466_v50  ;;  %v15209_v50 = vand.u32 4294901760, %v22594_v38 }
 0x293   : > { %20157 = vmatprep.subr.mxu0 %v22445_v58  ;;  %20184 = vmatprep.mubr.f32.mxu1 %v22474_v52 }
 0x294   : > { %20187 = vmatprep.subr.mxu1 %v22449_v48 }
 0x298   : > { %20155 = vmatmul.mubr.f32.vlgmr.msra.gmra.mrb[28].mxu0 %v22480_v56  ;;  %v15704_v56 = vand.u32 4294901760, %v22602_v40 }
 0x299   : > { %20185 = vmatmul.mubr.f32.vlgmr.msra.gmra.mrb[28].mxu1 %v22483_v57  ;;  %20158 = vmatpush3.msra.mxu0 %v22445_v58  ;;  %v22619_v57 = vand.u32 4294901760, %v22605_v41 }
 0x29a   : > { %20188 = vmatpush3.msra.mxu1 %v22449_v48  ;;  %20159 = vmatprep.mubr.f32.mxu0 %v14219_v54 }
 0x29b   : > { %20162 = vmatprep.subr.mxu0 %v22487_v55  ;;  %20189 = vmatprep.mubr.f32.mxu1 %v14714_v4  ;;  %v15714_v4 = vand.u32 4294901760, %v22611_v43 }
 0x29c   : > { %20192 = vmatprep.subr.mxu1 %v22491_v5 }
 0x29d   : > { %v15715_v11 = vsub.f32 %v22611_v43, %v15714_v4 }
 0x29f   : > { %v15716_v29 = vand.u32 4294901760, %v15715_v11 }
 0x2a0   : > { %20160 = vmatmul.mubr.f32.vlgmr.msra.gmra.mrb[28].mxu0 %v14229_v3  ;;  %v15210_v3 = vsub.f32 %v22594_v38, %v15209_v50 }
 0x2a1   : > { %20190 = vmatmul.mubr.f32.vlgmr.msra.gmra.mrb[28].mxu1 %v14724_v8  ;;  %20163 = vmatpush3.msra.mxu0 %v22487_v55  ;;  %v15231_v8 = vsub.f32 %v22597_v39, %v22615_v51 }
 0x2a2   : > { %20193 = vmatpush3.msra.mxu1 %v22491_v5  ;;  %20164 = vmatprep.mubr.f32.mxu0 %v22447_v59  ;;  %v15211_v12 = vand.u32 4294901760, %v15210_v3  ;;  %v24713_v3 = vmov -inf  }
 0x2a3   : > { %20167 = vmatprep.subr.mxu0 %v22445_v58  ;;  %20194 = vmatprep.mubr.f32.mxu1 %v22451_v49  ;;  %v15232_v13 = vand.u32 4294901760, %v15231_v8  ;;  %16351 = vst.msk [vmem:[#allocation5] sm:$0x1] %vm16350_vm2, %v24713_v3 }
 0x2a4   : > { %20197 = vmatprep.subr.mxu1 %v22449_v48 }
 0x2a7   : > { %v19871_v52 = vpop.f32.mrb[18].mxu0 }
 0x2a8   : > { %v19901_v53 = vpop.f32.mrb[18].mxu1  ;;  %16165 = vst.msk [vmem:[#allocation2 + $0x128] sm:$0xff] %vm179_vm1, %v19871_v52  ;;  %v16292_v54 = vsel %vm179_vm1, %v19871_v52, 0.0  ;;  %v9680_v55 = vpop.f32.mrb[19].mxu0  ;;  %20165 = vmatmul.mubr.f32.vlgmr.msra.gmra.mrb[28].mxu0 %v22457_v46 }
 0x2a9   : > { %16167 = vst.msk [vmem:[#allocation2 + $0x138] sm:$0xff] %vm179_vm1, %v19901_v53  ;;  %v10175_v0 = vpop.f32.mrb[19].mxu1  ;;  %20195 = vmatmul.mubr.f32.vlgmr.msra.gmra.mrb[28].mxu1 %v22459_v47  ;;  %v16293_v5 = vadd.f32 %v16292_v54, %v22515_v15  ;;  %16164 = vst.msk [vmem:[#allocation2 + $0x120] sm:$0xff] %vm179_vm1, %v9680_v55  ;;  %v16229_v6 = vsel %vm179_vm1, %v9680_v55, 0.0  ;;  %20168 = vmatpush3.msra.mxu0 %v22445_v58  ;;  %v16294_v7 = vsel %vm179_vm1, %v19901_v53, 0.0 }
 0x2aa   : > { %16166 = vst.msk [vmem:[#allocation2 + $0x130] sm:$0xff] %vm179_vm1, %v10175_v0  ;;  %20198 = vmatpush3.msra.mxu1 %v22449_v48  ;;  %v16230_v2 = vadd.f32 %v16229_v6, %v22525_v61  ;;  %20169 = vmatprep.mubr.f32.mxu0 %v22447_v59  ;;  %v16231_v58 = vsel %vm179_vm1, %v10175_v0, 0.0  ;;  %v15705_v59 = vsub.f32 %v22602_v40, %v15704_v56 }
 0x2ab   : > { %20199 = vmatprep.mubr.f32.mxu1 %v22451_v49  ;;  %v22643_v9 = vadd.f32 %v16294_v7, %v16293_v5  ;;  %20202 = vmatprep.subr.mxu0 %v22573_v44  ;;  %v15726_v48 = vsub.f32 %v22605_v41, %v22619_v57 }
 0x2ac   : > { %20232 = vmatprep.subr.mxu1 %v22577_v22  ;;  %v22653_v49 = vadd.f32 %v16231_v58, %v16230_v2  ;;  %v15706_v14 = vand.u32 4294901760, %v15705_v59 }
 0x2ad   : > { %v15727_v15 = vand.u32 4294901760, %v15726_v48 }
 0x2b0   : > { %20170 = vmatmul.mubr.f32.vlgmr.msra.gmra.mrb[28].mxu0 %v22457_v46 }
 0x2b1   : > { %20200 = vmatmul.mubr.f32.vlgmr.msra.gmra.mrb[28].mxu1 %v22459_v47  ;;  %20203 = vmatpush3.msra.mxu0 %v22573_v44 }
 0x2b2   : > { %20233 = vmatpush3.msra.mxu1 %v22577_v22  ;;  %20204 = vmatprep.mubr.f32.mxu0 %v15211_v12 }
 0x2b3   : > { %20207 = vmatprep.subr.mxu0 %v15232_v13  ;;  %20234 = vmatprep.mubr.f32.mxu1 %v15706_v14 }
 0x2b4   : > { %20237 = vmatprep.subr.mxu1 %v15727_v15  ;;  %20205 = vmatmul.mubr.f32.vlgmr.msra.gmra.mrb[30].mxu0 %v15221_v28 }
 0x2b5   : > { %20235 = vmatmul.mubr.f32.vlgmr.msra.gmra.mrb[30].mxu1 %v15716_v29  ;;  %20208 = vmatpush3.msra.mxu0 %v15232_v13 }
 0x2b6   : > { %20238 = vmatpush3.msra.mxu1 %v15727_v15  ;;  %20209 = vmatprep.mubr.f32.mxu0 %v22575_v45 }
 0x2b7   : > { %20212 = vmatprep.subr.mxu0 %v22597_v39  ;;  %20239 = vmatprep.mubr.f32.mxu1 %v22579_v23 }
 0x2b8   : > { %20242 = vmatprep.subr.mxu1 %v22605_v41 }
 0x2bc   : > { %20210 = vmatmul.mubr.f32.vlgmr.msra.gmra.mrb[30].mxu0 %v22585_v36 }
 0x2bd   : > { %20240 = vmatmul.mubr.f32.vlgmr.msra.gmra.mrb[30].mxu1 %v22587_v37  ;;  %20213 = vmatpush3.msra.mxu0 %v22597_v39 }
 0x2be   : > { %20243 = vmatpush3.msra.mxu1 %v22605_v41  ;;  %20214 = vmatprep.mubr.f32.mxu0 %v22594_v38  ;;  %v24711_v41 = vmov 0.0  }
 0x2bf   : > { %20217 = vmatprep.subr.mxu0 %v22573_v44  ;;  %20244 = vmatprep.mubr.f32.mxu1 %v22602_v40  ;;  %181 = vst.msk [vmem:[#allocation3 + $0x8] sm:$0xff] %vm179_vm1, %v24711_v41  ;;  %16353 = vst.msk [vmem:[#allocation7] sm:$0xff] %vm179_vm1, %v24711_v41 }
 0x2c0   : > { %20247 = vmatprep.subr.mxu1 %v22577_v22  ;;  %16354 = vst.msk [vmem:[#allocation7 + $0x8] sm:$0xff] %vm179_vm1, %v24711_v41  ;;  %180 = vst.msk [vmem:[#allocation3] sm:$0xff] %vm179_vm1, %v24711_v41 }
 0x2c1   : > { %16352 = vst.msk [vmem:[#allocation6] sm:$0x1] %vm16350_vm2, %v24711_v41 }
 0x2c4   : > { %20215 = vmatmul.mubr.f32.vlgmr.msra.gmra.mrb[30].mxu0 %v22608_v42 }
 0x2c5   : > { %20245 = vmatmul.mubr.f32.vlgmr.msra.gmra.mrb[30].mxu1 %v22611_v43  ;;  %20218 = vmatpush3.msra.mxu0 %v22573_v44 }
 0x2c6   : > { %20248 = vmatpush3.msra.mxu1 %v22577_v22  ;;  %20219 = vmatprep.mubr.f32.mxu0 %v15209_v50 }
 0x2c7   : > { %20222 = vmatprep.subr.mxu0 %v22615_v51  ;;  %20249 = vmatprep.mubr.f32.mxu1 %v15704_v56 }
 0x2c8   : > { %20252 = vmatprep.subr.mxu1 %v22619_v57 }
 0x2cc   : > { %20220 = vmatmul.mubr.f32.vlgmr.msra.gmra.mrb[30].mxu0 %v15219_v1 }
 0x2cd   : > { %20250 = vmatmul.mubr.f32.vlgmr.msra.gmra.mrb[30].mxu1 %v15714_v4  ;;  %20223 = vmatpush3.msra.mxu0 %v22615_v51 }
 0x2ce   : > { %20253 = vmatpush3.msra.mxu1 %v22619_v57  ;;  %20224 = vmatprep.mubr.f32.mxu0 %v22575_v45 }
 0x2cf   : > { %20227 = vmatprep.subr.mxu0 %v22573_v44  ;;  %20254 = vmatprep.mubr.f32.mxu1 %v22579_v23 }
 0x2d0   : > { %20257 = vmatprep.subr.mxu1 %v22577_v22 }
 0x2d3   : > { %v19931_v46 = vpop.f32.mrb[20].mxu0 }
 0x2d4   : > { %v19961_v47 = vpop.f32.mrb[20].mxu1  ;;  %16169 = vst.msk [vmem:[#allocation2 + $0x148] sm:$0xff] %vm179_vm1, %v19931_v46  ;;  %v16296_v60 = vsel %vm179_vm1, %v19931_v46, 0.0  ;;  %v10670_v61 = vpop.f32.mrb[21].mxu0  ;;  %20225 = vmatmul.mubr.f32.vlgmr.msra.gmra.mrb[30].mxu0 %v22585_v36 }
 0x2d5   : > { %16171 = vst.msk [vmem:[#allocation2 + $0x158] sm:$0xff] %vm179_vm1, %v19961_v47  ;;  %v11165_v16 = vpop.f32.mrb[21].mxu1  ;;  %20255 = vmatmul.mubr.f32.vlgmr.msra.gmra.mrb[30].mxu1 %v22587_v37  ;;  %v16297_v17 = vadd.f32 %v16296_v60, %v22643_v9  ;;  %16168 = vst.msk [vmem:[#allocation2 + $0x140] sm:$0xff] %vm179_vm1, %v10670_v61  ;;  %v16233_v24 = vsel %vm179_vm1, %v10670_v61, 0.0  ;;  %20228 = vmatpush3.msra.mxu0 %v22573_v44  ;;  %v16298_v25 = vsel %vm179_vm1, %v19961_v47, 0.0 }
 0x2d6   : > { %16170 = vst.msk [vmem:[#allocation2 + $0x150] sm:$0xff] %vm179_vm1, %v11165_v16  ;;  %20258 = vmatpush3.msra.mxu1 %v22577_v22  ;;  %v16234_v26 = vadd.f32 %v16233_v24, %v22653_v49  ;;  %20229 = vmatprep.mubr.f32.mxu0 %v22575_v45  ;;  %v16235_v34 = vsel %vm179_vm1, %v11165_v16, 0.0 }
 0x2d7   : > { %20259 = vmatprep.mubr.f32.mxu1 %v22579_v23  ;;  %v16299_v27 = vadd.f32 %v16298_v25, %v16297_v17  ;;  %v16193_v17 = vld [vmem:[#allocation3 + $0x8] sm:$0xff] }
 0x2d8   : > { %v16236_v35 = vadd.f32 %v16235_v34, %v16234_v26 }
 0x2dc   : > { %20230 = vmatmul.mubr.f32.vlgmr.msra.gmra.mrb[30].mxu0 %v22585_v36 }
 0x2dd   : > { %20260 = vmatmul.mubr.f32.vlgmr.msra.gmra.mrb[30].mxu1 %v22587_v37 }
 0x2ff   : > { %v19991_v62 = vpop.f32.mrb[22].mxu0 }
 0x300   : > { %v20021_v63 = vpop.f32.mrb[22].mxu1  ;;  %16173 = vst.msk [vmem:[#allocation2 + $0x168] sm:$0xff] %vm179_vm1, %v19991_v62  ;;  %v16300_v18 = vsel %vm179_vm1, %v19991_v62, 0.0  ;;  %v11660_v20 = vpop.f32.mrb[23].mxu0 }
 0x301   : > { %16175 = vst.msk [vmem:[#allocation2 + $0x178] sm:$0xff] %vm179_vm1, %v20021_v63  ;;  %v12155_v19 = vpop.f32.mrb[23].mxu1  ;;  %v16301_v21 = vadd.f32 %v16300_v18, %v16299_v27  ;;  %16172 = vst.msk [vmem:[#allocation2 + $0x160] sm:$0xff] %vm179_vm1, %v11660_v20  ;;  %v16237_v32 = vsel %vm179_vm1, %v11660_v20, 0.0  ;;  %v16302_v33 = vsel %vm179_vm1, %v20021_v63, 0.0  ;;  %v16192_v27 = vld [vmem:[#allocation3] sm:$0xff] }
 0x302   : > { %16174 = vst.msk [vmem:[#allocation2 + $0x170] sm:$0xff] %vm179_vm1, %v12155_v19  ;;  %v16238_v30 = vadd.f32 %v16237_v32, %v16236_v35  ;;  %v16239_v44 = vsel %vm179_vm1, %v12155_v19, 0.0 }
 0x303   : > { %v16303_v31 = vadd.f32 %v16302_v33, %v16301_v21 }
 0x304   : > { %v16240_v45 = vadd.f32 %v16239_v44, %v16238_v30 }
 0x32b   : > { %v20051_v22 = vpop.f32.mrb[24].mxu0 }
 0x32c   : > { %v20081_v23 = vpop.f32.mrb[24].mxu1  ;;  %16177 = vst.msk [vmem:[#allocation2 + $0x188] sm:$0xff] %vm179_vm1, %v20051_v22  ;;  %v16304_v36 = vsel %vm179_vm1, %v20051_v22, 0.0  ;;  %v12650_v37 = vpop.f32.mrb[25].mxu0 }
 0x32d   : > { %16179 = vst.msk [vmem:[#allocation2 + $0x198] sm:$0xff] %vm179_vm1, %v20081_v23  ;;  %v13145_v38 = vpop.f32.mrb[25].mxu1  ;;  %v16305_v39 = vadd.f32 %v16304_v36, %v16303_v31  ;;  %16176 = vst.msk [vmem:[#allocation2 + $0x180] sm:$0xff] %vm179_vm1, %v12650_v37  ;;  %v16241_v40 = vsel %vm179_vm1, %v12650_v37, 0.0  ;;  %v16306_v42 = vsel %vm179_vm1, %v20081_v23, 0.0 }
 0x32e   : > { %16178 = vst.msk [vmem:[#allocation2 + $0x190] sm:$0xff] %vm179_vm1, %v13145_v38  ;;  %v16242_v43 = vadd.f32 %v16241_v40, %v16240_v45  ;;  %v16243_v51 = vsel %vm179_vm1, %v13145_v38, 0.0 }
 0x32f   : > { %v16307_v50 = vadd.f32 %v16306_v42, %v16305_v39 }
 0x330   : > { %v16244_v52 = vadd.f32 %v16243_v51, %v16242_v43 }
 0x357   : > { %v20111_v53 = vpop.f32.mrb[26].mxu0 }
 0x358   : > { %v20141_v56 = vpop.f32.mrb[26].mxu1  ;;  %16181 = vst.msk [vmem:[#allocation2 + $0x1a8] sm:$0xff] %vm179_vm1, %v20111_v53  ;;  %v16308_v57 = vsel %vm179_vm1, %v20111_v53, 0.0  ;;  %v13640_v54 = vpop.f32.mrb[27].mxu0  ;;  %v16359_v53 = vld [vmem:[#allocation2 + $0x18] sm:$0xff] }
 0x359   : > { %16183 = vst.msk [vmem:[#allocation2 + $0x1b8] sm:$0xff] %vm179_vm1, %v20141_v56  ;;  %v14135_v55 = vpop.f32.mrb[27].mxu1  ;;  %v16309_v0 = vadd.f32 %v16308_v57, %v16307_v50  ;;  %16180 = vst.msk [vmem:[#allocation2 + $0x1a0] sm:$0xff] %vm179_vm1, %v13640_v54  ;;  %v16245_v1 = vsel %vm179_vm1, %v13640_v54, 0.0  ;;  %v16310_v4 = vsel %vm179_vm1, %v20141_v56, 0.0  ;;  %v16356_v56 = vld [vmem:[#allocation2] sm:$0xff] }
 0x35a   : > { %16182 = vst.msk [vmem:[#allocation2 + $0x1b0] sm:$0xff] %vm179_vm1, %v14135_v55  ;;  %v16246_v5 = vadd.f32 %v16245_v1, %v16244_v52  ;;  %v16247_v7 = vsel %vm179_vm1, %v14135_v55, 0.0  ;;  %v16357_v52 = vld [vmem:[#allocation2 + $0x8] sm:$0xff]  ;;  %v16358_v57 = vld [vmem:[#allocation2 + $0x10] sm:$0xff]  ;;  %v16363_v55 = vld [vmem:[#allocation2 + $0x38] sm:$0xff] }
 0x35b   : > { %v16311_v6 = vadd.f32 %v16310_v4, %v16309_v0  ;;  %v16361_v54 = vld [vmem:[#allocation2 + $0x28] sm:$0xff]  ;;  %v16360_v0 = vld [vmem:[#allocation2 + $0x20] sm:$0xff]  ;;  %v16362_v1 = vld [vmem:[#allocation2 + $0x30] sm:$0xff] }
 0x35c   : > { %v16248_v2 = vadd.f32 %v16247_v7, %v16246_v5  ;;  %v16367_v7 = vld [vmem:[#allocation2 + $0x58] sm:$0xff] }
 0x360   : > { %v16408_v41 = vld [vmem:[#allocation2 + $0x1a0] sm:$0xff] }
 0x383   : > { %v20171_v8 = vpop.f32.mrb[28].mxu0 }
 0x384   : > { %v20201_v9 = vpop.f32.mrb[28].mxu1  ;;  %16185 = vst.msk [vmem:[#allocation2 + $0x1c8] sm:$0xff] %vm179_vm1, %v20171_v8  ;;  %v16312_v58 = vsel %vm179_vm1, %v20171_v8, 0.0  ;;  %v14630_v59 = vpop.f32.mrb[29].mxu0  ;;  %v16366_v8 = vld [vmem:[#allocation2 + $0x50] sm:$0xff] }
 0x385   : > { %16187 = vst.msk [vmem:[#allocation2 + $0x1d8] sm:$0xff] %vm179_vm1, %v20201_v9  ;;  %v15125_v48 = vpop.f32.mrb[29].mxu1  ;;  %v16313_v49 = vadd.f32 %v16312_v58, %v16311_v6  ;;  %16184 = vst.msk [vmem:[#allocation2 + $0x1c0] sm:$0xff] %vm179_vm1, %v14630_v59  ;;  %v16249_v10 = vsel %vm179_vm1, %v14630_v59, 0.0  ;;  %v16314_v11 = vsel %vm179_vm1, %v20201_v9, 0.0  ;;  %v16365_v6 = vld [vmem:[#allocation2 + $0x48] sm:$0xff] }
 0x386   : > { %16186 = vst.msk [vmem:[#allocation2 + $0x1d0] sm:$0xff] %vm179_vm1, %v15125_v48  ;;  %v16250_v12 = vadd.f32 %v16249_v10, %v16248_v2  ;;  %v16251_v14 = vsel %vm179_vm1, %v15125_v48, 0.0  ;;  %v16364_v2 = vld [vmem:[#allocation2 + $0x40] sm:$0xff]  ;;  %v16369_v58 = vld [vmem:[#allocation2 + $0x68] sm:$0xff]  ;;  %v16371_v59 = vld [vmem:[#allocation2 + $0x78] sm:$0xff] }
 0x387   : > { %v16315_v13 = vadd.f32 %v16314_v11, %v16313_v49  ;;  %v16368_v48 = vld [vmem:[#allocation2 + $0x60] sm:$0xff]  ;;  %v16370_v49 = vld [vmem:[#allocation2 + $0x70] sm:$0xff] }
 0x388   : > { %v16252_v15 = vadd.f32 %v16251_v14, %v16250_v12  ;;  %v16373_v14 = vld [vmem:[#allocation2 + $0x88] sm:$0xff] }
 0x38b   : > { %v16413_v9 = vld [vmem:[#allocation2 + $0x1c8] sm:$0xff] }
 0x3af   : > { %v20231_v28 = vpop.f32.mrb[30].mxu0 }
 0x3b0   : > { %v20261_v29 = vpop.f32.mrb[30].mxu1  ;;  %16189 = vst.msk [vmem:[#allocation2 + $0x1e8] sm:$0xff] %vm179_vm1, %v20231_v28  ;;  %v16316_v46 = vsel %vm179_vm1, %v20231_v28, 0.0  ;;  %v15620_v47 = vpop.f32.mrb[31].mxu0  ;;  %v16372_v28 = vld [vmem:[#allocation2 + $0x80] sm:$0xff] }
 0x3b1   : > { %16191 = vst.msk [vmem:[#allocation2 + $0x1f8] sm:$0xff] %vm179_vm1, %v20261_v29  ;;  %v16115_v60 = vpop.f32.mrb[31].mxu1  ;;  %v16317_v61 = vadd.f32 %v16316_v46, %v16315_v13  ;;  %16188 = vst.msk [vmem:[#allocation2 + $0x1e0] sm:$0xff] %vm179_vm1, %v15620_v47  ;;  %v16253_v16 = vsel %vm179_vm1, %v15620_v47, 0.0  ;;  %v16318_v24 = vsel %vm179_vm1, %v20261_v29, 0.0  ;;  %v16374_v29 = vld [vmem:[#allocation2 + $0x90] sm:$0xff] }
 0x3b2   : > { %16190 = vst.msk [vmem:[#allocation2 + $0x1f0] sm:$0xff] %vm179_vm1, %v16115_v60  ;;  %v16254_v25 = vadd.f32 %v16253_v16, %v16252_v15  ;;  %v16255_v34 = vsel %vm179_vm1, %v16115_v60, 0.0  ;;  %v16375_v15 = vld [vmem:[#allocation2 + $0x98] sm:$0xff]  ;;  %v16377_v16 = vld [vmem:[#allocation2 + $0xa8] sm:$0xff] }
 0x3b3   : > { %v16319_v26 = vadd.f32 %v16318_v24, %v16317_v61  ;;  %v16376_v24 = vld [vmem:[#allocation2 + $0xa0] sm:$0xff] }
 0x3b4   : > { %v16256_v35 = vadd.f32 %v16255_v34, %v16254_v25  ;;  %v16378_v25 = vld [vmem:[#allocation2 + $0xb0] sm:$0xff] }
 0x3b5   : > { %v16321_v62 = vadd.f32 %v16319_v26, %v16193_v17  ;;  %v16379_v17 = vld [vmem:[#allocation2 + $0xb8] sm:$0xff] }
 0x3b6   : > { %v16320_v63 = vadd.f32 %v16256_v35, %v16192_v27 }
 0x3b7   : > { %16323 = vst.msk [vmem:[#allocation3 + $0x8] sm:$0xff] %vm179_vm1, %v16321_v62  ;;  %v16381_v62 = vld [vmem:[#allocation2 + $0xc8] sm:$0xff] }
 0x3b8   : > { %16322 = vst.msk [vmem:[#allocation3] sm:$0xff] %vm179_vm1, %v16320_v63  ;;  %v16383_v63 = vld [vmem:[#allocation2 + $0xd8] sm:$0xff] }
 0x3be   : > { %v16328_v18 = vld [vmem:[#allocation3 + $0x8] sm:$0xff] }
 0x3bf   : > { %v16330_v20 = vmul.f32 0.03125, %v16328_v18  ;;  %v16327_v19 = vld [vmem:[#allocation3] sm:$0xff] }
 0x3c0   : > { %v16329_v21 = vmul.f32 0.03125, %v16327_v19  ;;  %v16380_v18 = vld [vmem:[#allocation2 + $0xc0] sm:$0xff] }
 0x3c1   : > { %v16332_v32 = vmul.f32 %v16330_v20, %v16330_v20 }
 0x3c2   : > { %v16331_v33 = vmul.f32 %v16329_v21, %v16329_v21 }
 0x3c3   : > { %v16334_v30 = vsel %vm179_vm1, %v16332_v32, 0.0 }
 0x3c4   : > { %v16333_v31 = vsel %vm179_vm1, %v16331_v33, 0.0 }
 0x3c5   : > { %v16335_v44 = vadd.f32 %v16334_v30, %v16333_v31  ;;  %v16385_v30 = vld [vmem:[#allocation2 + $0xe8] sm:$0xff]  ;;  %v16387_v31 = vld [vmem:[#allocation2 + $0xf8] sm:$0xff] }
 0x3c7   : > { %v16336_v45 = vrot.slane %v16335_v44, 4 }
 0x3c9   : > { %v16337_v22 = vadd.f32 %v16336_v45, %v16335_v44  ;;  %v16384_v44 = vld [vmem:[#allocation2 + $0xe0] sm:$0xff]  ;;  %v16386_v45 = vld [vmem:[#allocation2 + $0xf0] sm:$0xff] }
 0x3cb   : > { %v16338_v23 = vrot.slane %v16337_v22, 2 }
 0x3cd   : > { %v16339_v36 = vadd.f32 %v16338_v23, %v16337_v22 }
 0x3cf   : > { %v16340_v37 = vrot.slane %v16339_v36, 1 }
 0x3d1   : > { %v16341_v38 = vadd.f32 %v16340_v37, %v16339_v36 }
 0x3d3   : > { %v16342_v39 = vadd.f32 1.0, %v16341_v38 }
 0x3d5   : > { %20609 = vrcp.f32 %v16342_v39  ;;  %v16391_v39 = vld [vmem:[#allocation2 + $0x118] sm:$0xff] }
 0x3d6   : > { %20611 = vrsqrt.f32 %v16341_v38 }
 0x3df   : > { %v20610_v40 = vpop.eup %20609 }
 0x3e0   : > { %v16344_v42 = vmul.f32 %v20610_v40, %v16341_v38  ;;  %v20612_v51 = vpop.eup %20611  ;;  %v16389_v38 = vld [vmem:[#allocation2 + $0x108] sm:$0xff]  ;;  %v16388_v40 = vld [vmem:[#allocation2 + $0x100] sm:$0xff] }
 0x3e2   : > { %v16345_v43 = vmul.f32 %v16344_v42, %v16329_v21  ;;  %v16346_v50 = vmul.f32 %v16344_v42, %v16330_v20  ;;  %v16382_v20 = vld [vmem:[#allocation2 + $0xd0] sm:$0xff] }
 0x3e3   : > { %v16390_v42 = vld [vmem:[#allocation2 + $0x110] sm:$0xff] }
 0x3e4   : > { %v22763_v4 = vmul.f32 %v20612_v51, %v16345_v43  ;;  %v22765_v5 = vmul.f32 %v20612_v51, %v16346_v50 }
 0x3e6   : > { %v22768_v10 = vmul.f32 %v16356_v56, %v22763_v4  ;;  %v22771_v11 = vmul.f32 %v16357_v52, %v22765_v5  ;;  %v22774_v12 = vmul.f32 %v16358_v57, %v22763_v4  ;;  %v22777_v13 = vmul.f32 %v16359_v53, %v22765_v5  ;;  %v16393_v53 = vld [vmem:[#allocation2 + $0x128] sm:$0xff]  ;;  %v16395_v56 = vld [vmem:[#allocation2 + $0x138] sm:$0xff]  ;;  %v16392_v57 = vld [vmem:[#allocation2 + $0x120] sm:$0xff] }
 0x3e7   : > { %v22780_v46 = vmul.f32 %v16360_v0, %v22763_v4  ;;  %v22783_v47 = vmul.f32 %v16361_v54, %v22765_v5  ;;  %v22786_v60 = vmul.f32 %v16362_v1, %v22763_v4  ;;  %v22789_v61 = vmul.f32 %v16363_v55, %v22765_v5  ;;  %v16394_v54 = vld [vmem:[#allocation2 + $0x130] sm:$0xff] }
 0x3e8   : > { %v22792_v26 = vmul.f32 %v16364_v2, %v22763_v4  ;;  %v22795_v27 = vmul.f32 %v16365_v6, %v22765_v5  ;;  %v22798_v34 = vmul.f32 %v16366_v8, %v22763_v4  ;;  %v22801_v35 = vmul.f32 %v16367_v7, %v22765_v5  ;;  %v16397_v7 = vld [vmem:[#allocation2 + $0x148] sm:$0xff]  ;;  %v16399_v2 = vld [vmem:[#allocation2 + $0x158] sm:$0xff]  ;;  %v16396_v8 = vld [vmem:[#allocation2 + $0x140] sm:$0xff] }
 0x3e9   : > { %v22804_v19 = vmul.f32 %v16368_v48, %v22763_v4  ;;  %v22807_v21 = vmul.f32 %v16369_v58, %v22765_v5  ;;  %v22810_v32 = vmul.f32 %v16370_v49, %v22763_v4  ;;  %v22813_v33 = vmul.f32 %v16371_v59, %v22765_v5 }
 0x3ea   : > { %v22816_v22 = vmul.f32 %v16372_v28, %v22763_v4  ;;  %v22819_v23 = vmul.f32 %v16373_v14, %v22765_v5  ;;  %v22822_v36 = vmul.f32 %v16374_v29, %v22763_v4  ;;  %v22825_v37 = vmul.f32 %v16375_v15, %v22765_v5  ;;  %v16398_v14 = vld [vmem:[#allocation2 + $0x150] sm:$0xff]  ;;  %v16401_v15 = vld [vmem:[#allocation2 + $0x168] sm:$0xff]  ;;  %v16403_v28 = vld [vmem:[#allocation2 + $0x178] sm:$0xff] }
 0x3eb   : > { %v22828_v43 = vmul.f32 %v16376_v24, %v22763_v4  ;;  %v22831_v50 = vmul.f32 %v16377_v16, %v22765_v5  ;;  %v22834_v51 = vmul.f32 %v16378_v25, %v22763_v4  ;;  %v22837_v52 = vmul.f32 %v16379_v17, %v22765_v5  ;;  %v16400_v25 = vld [vmem:[#allocation2 + $0x160] sm:$0xff] }
 0x3ec   : > { %v22840_v55 = vmul.f32 %v16380_v18, %v22763_v4  ;;  %v22843_v0 = vmul.f32 %v16381_v62, %v22765_v5  ;;  %v22846_v1 = vmul.f32 %v16382_v20, %v22763_v4  ;;  %v22849_v6 = vmul.f32 %v16383_v63, %v22765_v5  ;;  %v16402_v62 = vld [vmem:[#allocation2 + $0x170] sm:$0xff]  ;;  %v16405_v63 = vld [vmem:[#allocation2 + $0x188] sm:$0xff] }
 0x3ed   : > { %v22852_v58 = vmul.f32 %v16384_v44, %v22763_v4  ;;  %v22855_v59 = vmul.f32 %v16385_v30, %v22765_v5  ;;  %v22858_v48 = vmul.f32 %v16386_v45, %v22763_v4  ;;  %v22861_v49 = vmul.f32 %v16387_v31, %v22765_v5  ;;  %v16407_v44 = vld [vmem:[#allocation2 + $0x198] sm:$0xff]  ;;  %v16404_v45 = vld [vmem:[#allocation2 + $0x180] sm:$0xff] }
 0x3ee   : > { %v22864_v29 = vmul.f32 %v16388_v40, %v22763_v4  ;;  %v22867_v16 = vmul.f32 %v16389_v38, %v22765_v5  ;;  %v22870_v17 = vmul.f32 %v16390_v42, %v22763_v4  ;;  %v22873_v24 = vmul.f32 %v16391_v39, %v22765_v5  ;;  %v16406_v38 = vld [vmem:[#allocation2 + $0x190] sm:$0xff] }
 0x3ef   : > { %v22876_v18 = vmul.f32 %v16392_v57, %v22763_v4  ;;  %v22879_v20 = vmul.f32 %v16393_v53, %v22765_v5  ;;  %v22882_v30 = vmul.f32 %v16394_v54, %v22763_v4  ;;  %v22885_v31 = vmul.f32 %v16395_v56, %v22765_v5  ;;  %v16409_v57 = vld [vmem:[#allocation2 + $0x1a8] sm:$0xff]  ;;  %v16411_v54 = vld [vmem:[#allocation2 + $0x1b8] sm:$0xff] }
 0x3f0   : > { %v22888_v39 = vmul.f32 %v16396_v8, %v22763_v4  ;;  %v22891_v40 = vmul.f32 %v16397_v7, %v22765_v5  ;;  %v22894_v42 = vmul.f32 %v16398_v14, %v22763_v4  ;;  %v22897_v53 = vmul.f32 %v16399_v2, %v22765_v5  ;;  %v16410_v14 = vld [vmem:[#allocation2 + $0x1b0] sm:$0xff] }
 0x3f1   : > { %v22900_v56 = vmul.f32 %v16400_v25, %v22763_v4  ;;  %v22903_v3 = vmul.f32 %v16401_v15, %v22765_v5  ;;  %v22906_v8 = vmul.f32 %v16402_v62, %v22763_v4  ;;  %v22909_v7 = vmul.f32 %v16403_v28, %v22765_v5  ;;  %v16412_v62 = vld [vmem:[#allocation2 + $0x1c0] sm:$0xff] }
 0x3f2   : > { %24741 = vst [vmem:[#allocation8_spill] sm:$0xff] %v22894_v42  ;;  %24742 = vst [vmem:[#allocation9_spill] sm:$0xff] %v22897_v53  ;;  %v16415_v42 = vld [vmem:[#allocation2 + $0x1d8] sm:$0xff]  ;;  %v22912_v2 = vmul.f32 %v16404_v45, %v22763_v4  ;;  %v22915_v53 = vmul.f32 %v16405_v63, %v22765_v5  ;;  %v22918_v25 = vmul.f32 %v16406_v38, %v22763_v4 }
 0x3f3   : > { %24743 = vst [vmem:[#allocation10_spill] sm:$0xff] %v22903_v3  ;;  %24744 = vst [vmem:[#allocation11_spill] sm:$0xff] %v22906_v8  ;;  %v22921_v15 = vmul.f32 %v16407_v44, %v22765_v5  ;;  %v16414_v8 = vld [vmem:[#allocation2 + $0x1d0] sm:$0xff]  ;;  %v16417_v3 = vld [vmem:[#allocation2 + $0x1e8] sm:$0xff]  ;;  %v22924_v28 = vmul.f32 %v16408_v41, %v22763_v4  ;;  %v22930_v45 = vmul.f32 %v16410_v14, %v22763_v4 }
 0x3f4   : > { %24745 = vst [vmem:[#allocation12_spill] sm:$0xff] %v22909_v7  ;;  %24746 = vst [vmem:[#allocation13_spill] sm:$0xff] %v22915_v53  ;;  %v22927_v7 = vmul.f32 %v16409_v57, %v22765_v5  ;;  %v22933_v63 = vmul.f32 %v16411_v54, %v22765_v5  ;;  %v16419_v38 = vld [vmem:[#allocation2 + $0x1f8] sm:$0xff]  ;;  %v16418_v53 = vld [vmem:[#allocation2 + $0x1f0] sm:$0xff]  ;;  %v22936_v44 = vmul.f32 %v16412_v62, %v22763_v4 }
 0x3f5   : > { %24747 = vst [vmem:[#allocation14_spill] sm:$0xff] %v22918_v25  ;;  %24748 = vst [vmem:[#allocation15_spill] sm:$0xff] %v22921_v15  ;;  %v16416_v25 = vld [vmem:[#allocation2 + $0x1e0] sm:$0xff]  ;;  %v22939_v15 = vmul.f32 %v16413_v9, %v22765_v5  ;;  %v22942_v41 = vmul.f32 %v16414_v8, %v22763_v4  ;;  %v22945_v57 = vmul.f32 %v16415_v42, %v22765_v5  ;;  %v16484_v9 = vsel %vm179_vm1, %v22768_v10, 0.0 }
 0x3f6   : > { %24749 = vst [vmem:[#allocation16_spill] sm:$0xff] %v22933_v63  ;;  %v22948_v14 = vmul.f32 %v16416_v25, %v22763_v4  ;;  %v22951_v54 = vmul.f32 %v16417_v3, %v22765_v5  ;;  %v22954_v63 = vmul.f32 %v16418_v53, %v22763_v4  ;;  %v22957_v62 = vmul.f32 %v16419_v38, %v22765_v5 }
 0x3f7   : > { %24750 = vst [vmem:[#allocation17_spill] sm:$0xff] %v22942_v41  ;;  %24751 = vst [vmem:[#allocation18_spill] sm:$0xff] %v22945_v57  ;;  %v16485_v8 = vsel %vm179_vm1, %v22771_v11, 0.0  ;;  %v16493_v42 = vsel %vm179_vm1, %v22774_v12, 0.0  ;;  %v16494_v25 = vsel %vm179_vm1, %v22777_v13, 0.0  ;;  %v16502_v4 = vsel %vm179_vm1, %v22780_v46, 0.0 }
 0x3f8   : > { %24752 = vst [vmem:[#allocation19_spill] sm:$0xff] %v22948_v14  ;;  %24753 = vst [vmem:[#allocation20_spill] sm:$0xff] %v22951_v54  ;;  %v16486_v3 = vadd.f32 %v16485_v8, %v16484_v9  ;;  %v16495_v54 = vadd.f32 %v16494_v25, %v16493_v42  ;;  %v16503_v5 = vsel %vm179_vm1, %v22783_v47, 0.0  ;;  %v16511_v10 = vsel %vm179_vm1, %v22786_v60, 0.0 }
 0x3f9   : > { %24754 = vst [vmem:[#allocation21_spill] sm:$0xff] %v22954_v63  ;;  %24755 = vst [vmem:[#allocation22_spill] sm:$0xff] %v22957_v62  ;;  %v16504_v53 = vadd.f32 %v16503_v5, %v16502_v4  ;;  %v16512_v11 = vsel %vm179_vm1, %v22789_v61, 0.0  ;;  %v16520_v12 = vsel %vm179_vm1, %v22792_v26, 0.0  ;;  %v16521_v8 = vsel %vm179_vm1, %v22795_v27, 0.0 }
 0x3fa   : > { %v16487_v38 = vrot.slane %v16486_v3, 4  ;;  %v16496_v13 = vrot.slane %v16495_v54, 4  ;;  %v16513_v9 = vadd.f32 %v16512_v11, %v16511_v10  ;;  %v16522_v42 = vadd.f32 %v16521_v8, %v16520_v12 }
 0x3fb   : > { %v16505_v46 = vrot.slane %v16504_v53, 4  ;;  %v16529_v47 = vsel %vm179_vm1, %v22798_v34, 0.0  ;;  %v16530_v60 = vsel %vm179_vm1, %v22801_v35, 0.0  ;;  %v16538_v10 = vsel %vm179_vm1, %v22804_v19, 0.0 }
 0x3fc   : > { %v16488_v25 = vadd.f32 %v16487_v38, %v16486_v3  ;;  %v16497_v4 = vadd.f32 %v16496_v13, %v16495_v54  ;;  %v16514_v61 = vrot.slane %v16513_v9, 4  ;;  %v16531_v5 = vadd.f32 %v16530_v60, %v16529_v47 }
 0x3fd   : > { %v16506_v62 = vadd.f32 %v16505_v46, %v16504_v53  ;;  %v16523_v26 = vrot.slane %v16522_v42, 4  ;;  %v16539_v27 = vsel %vm179_vm1, %v22807_v21, 0.0  ;;  %v16547_v35 = vsel %vm179_vm1, %v22810_v32, 0.0 }
 0x3fe   : > { %v16489_v11 = vrot.slane %v16488_v25, 2  ;;  %v16498_v12 = vrot.slane %v16497_v4, 2  ;;  %v16515_v8 = vadd.f32 %v16514_v61, %v16513_v9  ;;  %v16532_v63 = vrot.slane %v16531_v5, 4 }
 0x3ff   : > { %v16507_v34 = vrot.slane %v16506_v62, 2  ;;  %v16524_v14 = vadd.f32 %v16523_v26, %v16522_v42  ;;  %v16540_v57 = vadd.f32 %v16539_v27, %v16538_v10  ;;  %v16548_v21 = vsel %vm179_vm1, %v22813_v33, 0.0 }
 0x400   : > { %v16490_v54 = vadd.f32 %v16489_v11, %v16488_v25  ;;  %v16499_v3 = vadd.f32 %v16498_v12, %v16497_v4  ;;  %v16516_v53 = vrot.slane %v16515_v8, 2  ;;  %v16533_v38 = vadd.f32 %v16532_v63, %v16531_v5 }
 0x401   : > { %v16508_v13 = vadd.f32 %v16507_v34, %v16506_v62  ;;  %v16525_v46 = vrot.slane %v16524_v14, 2  ;;  %v16541_v19 = vrot.slane %v16540_v57, 4  ;;  %v16549_v10 = vadd.f32 %v16548_v21, %v16547_v35 }
 0x402   : > { %v16491_v47 = vrot.slane %v16490_v54, 1  ;;  %v16500_v60 = vrot.slane %v16499_v3, 1  ;;  %v16517_v9 = vadd.f32 %v16516_v53, %v16515_v8  ;;  %v16534_v61 = vrot.slane %v16533_v38, 2 }
 0x403   : > { %v16509_v41 = vrot.slane %v16508_v13, 1  ;;  %v16526_v42 = vadd.f32 %v16525_v46, %v16524_v14  ;;  %v16542_v26 = vadd.f32 %v16541_v19, %v16540_v57  ;;  %v16550_v11 = vrot.slane %v16549_v10, 4 }
 0x404   : > { %v22991_v27 = vadd.f32 %v16491_v47, %v16490_v54  ;;  %v22993_v32 = vadd.f32 %v16500_v60, %v16499_v3  ;;  %v16518_v25 = vrot.slane %v16517_v9, 1  ;;  %v16535_v63 = vadd.f32 %v16534_v61, %v16533_v38 }
 0x405   : > { %v22995_v62 = vadd.f32 %v16509_v41, %v16508_v13  ;;  %v16527_v4 = vrot.slane %v16526_v42, 1  ;;  %v16543_v5 = vrot.slane %v16542_v26, 2  ;;  %v16556_v8 = vsel %vm179_vm1, %v22816_v22, 0.0 }
 0x406   : > { %v22997_v33 = vadd.f32 %v16518_v25, %v16517_v9  ;;  %v16536_v12 = vrot.slane %v16535_v63, 1  ;;  %v16557_v57 = vsel %vm179_vm1, %v22819_v23, 0.0  ;;  %v16551_v35 = vadd.f32 %v16550_v11, %v16549_v10 }
 0x407   : > { %v23003_v14 = vadd.f32 %v16527_v4, %v16526_v42  ;;  %v16544_v34 = vadd.f32 %v16543_v5, %v16542_v26  ;;  %v16558_v54 = vadd.f32 %v16557_v57, %v16556_v8  ;;  %v16565_v41 = vsel %vm179_vm1, %v22822_v36, 0.0 }
 0x408   : > { %v23005_v3 = vadd.f32 %v16536_v12, %v16535_v63  ;;  %v16566_v53 = vsel %vm179_vm1, %v22825_v37, 0.0  ;;  %v16574_v38 = vsel %vm179_vm1, %v22828_v43, 0.0  ;;  %v16552_v13 = vrot.slane %v16551_v35, 2 }
 0x409   : > { %v16545_v22 = vrot.slane %v16544_v34, 1  ;;  %v16559_v46 = vrot.slane %v16558_v54, 4  ;;  %v16567_v23 = vadd.f32 %v16566_v53, %v16565_v41  ;;  %v16575_v19 = vsel %vm179_vm1, %v22831_v50, 0.0 }
 0x40a   : > { %v16583_v21 = vsel %vm179_vm1, %v22834_v51, 0.0  ;;  %v16584_v47 = vsel %vm179_vm1, %v22837_v52, 0.0  ;;  %v16592_v36 = vsel %vm179_vm1, %v22840_v55, 0.0  ;;  %v16553_v60 = vadd.f32 %v16552_v13, %v16551_v35 }
 0x40b   : > { %v23021_v37 = vadd.f32 %v16545_v22, %v16544_v34  ;;  %v16560_v43 = vadd.f32 %v16559_v46, %v16558_v54  ;;  %v16568_v9 = vrot.slane %v16567_v23, 4  ;;  %v16576_v61 = vadd.f32 %v16575_v19, %v16574_v38 }
 0x40c   : > { %v16585_v42 = vadd.f32 %v16584_v47, %v16583_v21  ;;  %v16593_v26 = vsel %vm179_vm1, %v22843_v0, 0.0  ;;  %v16601_v50 = vsel %vm179_vm1, %v22846_v1, 0.0  ;;  %v16554_v51 = vrot.slane %v16553_v60, 1 }
 0x40d   : > { %v16561_v10 = vrot.slane %v16560_v43, 2  ;;  %v16569_v25 = vadd.f32 %v16568_v9, %v16567_v23  ;;  %v16594_v52 = vadd.f32 %v16593_v26, %v16592_v36  ;;  %v16577_v63 = vrot.slane %v16576_v61, 4 }
 0x40e   : > { %v16586_v4 = vrot.slane %v16585_v42, 4  ;;  %v16602_v55 = vsel %vm179_vm1, %v22849_v6, 0.0  ;;  %v16610_v5 = vsel %vm179_vm1, %v22852_v58, 0.0  ;;  %v23031_v11 = vadd.f32 %v16554_v51, %v16553_v60 }
 0x40f   : > { %v16562_v12 = vadd.f32 %v16561_v10, %v16560_v43  ;;  %v16570_v8 = vrot.slane %v16569_v25, 2  ;;  %v16595_v0 = vrot.slane %v16594_v52, 4  ;;  %v16578_v57 = vadd.f32 %v16577_v63, %v16576_v61 }
 0x410   : > { %v16587_v34 = vadd.f32 %v16586_v4, %v16585_v42  ;;  %v16603_v1 = vadd.f32 %v16602_v55, %v16601_v50  ;;  %v16611_v35 = vsel %vm179_vm1, %v22855_v59, 0.0  ;;  %v16619_v58 = vsel %vm179_vm1, %v22858_v48, 0.0 }
 0x411   : > { %v16563_v54 = vrot.slane %v16562_v12, 1  ;;  %v16571_v41 = vadd.f32 %v16570_v8, %v16569_v25  ;;  %v16596_v53 = vadd.f32 %v16595_v0, %v16594_v52  ;;  %v16612_v38 = vadd.f32 %v16611_v35, %v16610_v5 }
 0x412   : > { %v16579_v22 = vrot.slane %v16578_v57, 2  ;;  %v16588_v6 = vrot.slane %v16587_v34, 2  ;;  %v16604_v13 = vrot.slane %v16603_v1, 4  ;;  %v16620_v59 = vsel %vm179_vm1, %v22861_v49, 0.0 }
 0x413   : > { %v23037_v46 = vadd.f32 %v16563_v54, %v16562_v12  ;;  %v16572_v23 = vrot.slane %v16571_v41, 1  ;;  %v16597_v19 = vrot.slane %v16596_v53, 2  ;;  %v16613_v21 = vrot.slane %v16612_v38, 4 }
 0x414   : > { %v16580_v47 = vadd.f32 %v16579_v22, %v16578_v57  ;;  %v16589_v36 = vadd.f32 %v16588_v6, %v16587_v34  ;;  %v16605_v60 = vadd.f32 %v16604_v13, %v16603_v1  ;;  %v16621_v42 = vadd.f32 %v16620_v59, %v16619_v58  ;;  %v24756_v59 = vld [vmem:[#allocation8_spill] sm:$0xff] }
 0x415   : > { %v23041_v43 = vadd.f32 %v16572_v23, %v16571_v41  ;;  %v16598_v9 = vadd.f32 %v16597_v19, %v16596_v53  ;;  %v16614_v61 = vadd.f32 %v16613_v21, %v16612_v38  ;;  %v16628_v48 = vsel %vm179_vm1, %v22864_v29, 0.0 }
 0x416   : > { %v16581_v26 = vrot.slane %v16580_v47, 1  ;;  %v16590_v50 = vrot.slane %v16589_v36, 1  ;;  %v16606_v51 = vrot.slane %v16605_v60, 2  ;;  %v16622_v52 = vrot.slane %v16621_v42, 4 }
 0x417   : > { %v16599_v10 = vrot.slane %v16598_v9, 1  ;;  %v16615_v25 = vrot.slane %v16614_v61, 2  ;;  %v16629_v63 = vsel %vm179_vm1, %v22867_v16, 0.0  ;;  %v16637_v57 = vsel %vm179_vm1, %v22870_v17, 0.0 }
 0x418   : > { %v23047_v4 = vadd.f32 %v16581_v26, %v16580_v47  ;;  %v23049_v49 = vadd.f32 %v16590_v50, %v16589_v36  ;;  %v16607_v55 = vadd.f32 %v16606_v51, %v16605_v60  ;;  %v16630_v5 = vadd.f32 %v16629_v63, %v16628_v48  ;;  %v24757_v51 = vld [vmem:[#allocation9_spill] sm:$0xff] }
 0x419   : > { %v23051_v12 = vadd.f32 %v16599_v10, %v16598_v9  ;;  %v16616_v8 = vadd.f32 %v16615_v25, %v16614_v61  ;;  %v16623_v0 = vadd.f32 %v16622_v52, %v16621_v42  ;;  %v16638_v1 = vsel %vm179_vm1, %v22873_v24, 0.0 }
 0x41a   : > { %v16608_v29 = vrot.slane %v16607_v55, 1  ;;  %v16631_v34 = vrot.slane %v16630_v5, 4  ;;  %v16646_v16 = vsel %vm179_vm1, %v22876_v18, 0.0  ;;  %v16639_v41 = vadd.f32 %v16638_v1, %v16637_v57 }
 0x41b   : > { %v16617_v35 = vrot.slane %v16616_v8, 1  ;;  %v16624_v54 = vrot.slane %v16623_v0, 2  ;;  %v16647_v53 = vsel %vm179_vm1, %v22879_v20, 0.0  ;;  %v16655_v17 = vsel %vm179_vm1, %v22882_v30, 0.0 }
 0x41c   : > { %v23061_v38 = vadd.f32 %v16608_v29, %v16607_v55  ;;  %v16632_v22 = vadd.f32 %v16631_v34, %v16630_v5  ;;  %v16648_v6 = vadd.f32 %v16647_v53, %v16646_v16  ;;  %v16640_v24 = vrot.slane %v16639_v41, 4  ;;  %v24758_v5 = vld [vmem:[#allocation10_spill] sm:$0xff] }
 0x41d   : > { %v23065_v13 = vadd.f32 %v16617_v35, %v16616_v8  ;;  %v16625_v58 = vadd.f32 %v16624_v54, %v16623_v0  ;;  %v16656_v18 = vsel %vm179_vm1, %v22885_v31, 0.0  ;;  %v16664_v20 = vsel %vm179_vm1, %v22888_v39, 0.0  ;;  %v24759_v0 = vld [vmem:[#allocation11_spill] sm:$0xff] }
 0x41e   : > { %v16633_v23 = vrot.slane %v16632_v22, 2  ;;  %v16649_v19 = vrot.slane %v16648_v6, 4  ;;  %v16657_v21 = vadd.f32 %v16656_v18, %v16655_v17  ;;  %v16641_v36 = vadd.f32 %v16640_v24, %v16639_v41  ;;  %v24760_v41 = vld [vmem:[#allocation12_spill] sm:$0xff] }
 0x41f   : > { %v16626_v47 = vrot.slane %v16625_v58, 1  ;;  %v16665_v60 = vsel %vm179_vm1, %v22891_v40, 0.0  ;;  %v16673_v30 = vsel %vm179_vm1, %v24756_v59, 0.0  ;;  %v16674_v48 = vsel %vm179_vm1, %v24757_v51, 0.0 }
 0x420   : > { %v16634_v9 = vadd.f32 %v16633_v23, %v16632_v22  ;;  %v16650_v61 = vadd.f32 %v16649_v19, %v16648_v6  ;;  %v16658_v42 = vrot.slane %v16657_v21, 4  ;;  %v16666_v26 = vadd.f32 %v16665_v60, %v16664_v20 }
 0x421   : > { %v23075_v50 = vadd.f32 %v16626_v47, %v16625_v58  ;;  %v16642_v31 = vrot.slane %v16641_v36, 2  ;;  %v16682_v39 = vsel %vm179_vm1, %v22900_v56, 0.0  ;;  %v16675_v55 = vadd.f32 %v16674_v48, %v16673_v30  ;;  %v24761_v30 = vld [vmem:[#allocation13_spill] sm:$0xff] }
 0x422   : > { %v16635_v10 = vrot.slane %v16634_v9, 1  ;;  %v16651_v25 = vrot.slane %v16650_v61, 2  ;;  %v16659_v52 = vadd.f32 %v16658_v42, %v16657_v21  ;;  %v16667_v40 = vrot.slane %v16666_v26, 4 }
 0x423   : > { %v16643_v63 = vadd.f32 %v16642_v31, %v16641_v36  ;;  %v16683_v8 = vsel %vm179_vm1, %v24758_v5, 0.0  ;;  %v16691_v57 = vsel %vm179_vm1, %v24759_v0, 0.0  ;;  %v16676_v54 = vrot.slane %v16675_v55, 4 }
 0x424   : > { %v23085_v29 = vadd.f32 %v16635_v10, %v16634_v9  ;;  %v16652_v34 = vadd.f32 %v16651_v25, %v16650_v61  ;;  %v16660_v1 = vrot.slane %v16659_v52, 2  ;;  %v16668_v16 = vadd.f32 %v16667_v40, %v16666_v26  ;;  %v24762_v61 = vld [vmem:[#allocation14_spill] sm:$0xff]  ;;  %v24763_v10 = vld [vmem:[#allocation15_spill] sm:$0xff] }
 0x425   : > { %v16644_v35 = vrot.slane %v16643_v63, 1  ;;  %v16684_v56 = vadd.f32 %v16683_v8, %v16682_v39  ;;  %v16692_v53 = vsel %vm179_vm1, %v24760_v41, 0.0  ;;  %v16677_v18 = vadd.f32 %v16676_v54, %v16675_v55  ;;  %v24764_v41 = vld [vmem:[#allocation16_spill] sm:$0xff] }
 0x426   : > { %v16653_v22 = vrot.slane %v16652_v34, 1  ;;  %v16661_v6 = vadd.f32 %v16660_v1, %v16659_v52  ;;  %v16669_v17 = vrot.slane %v16668_v16, 2  ;;  %v16693_v58 = vadd.f32 %v16692_v53, %v16691_v57 }
 0x427   : > { %v23089_v24 = vadd.f32 %v16644_v35, %v16643_v63  ;;  %v16685_v23 = vrot.slane %v16684_v56, 4  ;;  %v16700_v19 = vsel %vm179_vm1, %v22912_v2, 0.0  ;;  %v16678_v60 = vrot.slane %v16677_v18, 2 }
 0x428   : > { %v23093_v21 = vadd.f32 %v16653_v22, %v16652_v34  ;;  %v16662_v20 = vrot.slane %v16661_v6, 1  ;;  %v16670_v47 = vadd.f32 %v16669_v17, %v16668_v16  ;;  %v16694_v36 = vrot.slane %v16693_v58, 4 }
 0x429   : > { %v16686_v59 = vadd.f32 %v16685_v23, %v16684_v56  ;;  %v16701_v9 = vsel %vm179_vm1, %v24761_v30, 0.0  ;;  %v16709_v42 = vsel %vm179_vm1, %v24762_v61, 0.0  ;;  %v16679_v39 = vadd.f32 %v16678_v60, %v16677_v18 }
 0x42a   : > { %v23099_v26 = vadd.f32 %v16662_v20, %v16661_v6  ;;  %v16671_v31 = vrot.slane %v16670_v47, 1  ;;  %v16695_v51 = vadd.f32 %v16694_v36, %v16693_v58  ;;  %v16702_v48 = vadd.f32 %v16701_v9, %v16700_v19  ;;  %v24765_v19 = vld [vmem:[#allocation17_spill] sm:$0xff]  ;;  %v24766_v9 = vld [vmem:[#allocation18_spill] sm:$0xff] }
 0x42b   : > { %v16687_v2 = vrot.slane %v16686_v59, 2  ;;  %v16710_v25 = vsel %vm179_vm1, %v24763_v10, 0.0  ;;  %v16718_v52 = vsel %vm179_vm1, %v22924_v28, 0.0  ;;  %v16680_v8 = vrot.slane %v16679_v39, 1 }
 0x42c   : > { %v23105_v40 = vadd.f32 %v16671_v31, %v16670_v47  ;;  %v16696_v63 = vrot.slane %v16695_v51, 2  ;;  %v16703_v55 = vrot.slane %v16702_v48, 4  ;;  %v16711_v5 = vadd.f32 %v16710_v25, %v16709_v42  ;;  %v24767_v42 = vld [vmem:[#allocation19_spill] sm:$0xff]  ;;  %v24768_v25 = vld [vmem:[#allocation20_spill] sm:$0xff] }
 0x42d   : > { %v16688_v0 = vadd.f32 %v16687_v2, %v16686_v59  ;;  %v16719_v57 = vsel %vm179_vm1, %v22927_v7, 0.0  ;;  %v16727_v34 = vsel %vm179_vm1, %v22930_v45, 0.0  ;;  %v23111_v56 = vadd.f32 %v16680_v8, %v16679_v39 }
 0x42e   : > { %v16697_v1 = vadd.f32 %v16696_v63, %v16695_v51  ;;  %v16704_v16 = vadd.f32 %v16703_v55, %v16702_v48  ;;  %v16712_v35 = vrot.slane %v16711_v5, 4  ;;  %v16720_v54 = vadd.f32 %v16719_v57, %v16718_v52  ;;  %v24769_v63 = vld [vmem:[#allocation21_spill] sm:$0xff] }
 0x42f   : > { %v16689_v28 = vrot.slane %v16688_v0, 1  ;;  %v16728_v53 = vsel %vm179_vm1, %v24764_v41, 0.0  ;;  %v16736_v22 = vsel %vm179_vm1, %v22936_v44, 0.0  ;;  %v16737_v23 = vsel %vm179_vm1, %v22939_v15, 0.0 }
 0x430   : > { %v16698_v6 = vrot.slane %v16697_v1, 1  ;;  %v16705_v7 = vrot.slane %v16704_v16, 2  ;;  %v16713_v17 = vadd.f32 %v16712_v35, %v16711_v5  ;;  %v16721_v58 = vrot.slane %v16720_v54, 4  ;;  %v24770_v35 = vld [vmem:[#allocation22_spill] sm:$0xff] }
 0x431   : > { %v23117_v45 = vadd.f32 %v16689_v28, %v16688_v0  ;;  %v16729_v18 = vadd.f32 %v16728_v53, %v16727_v34  ;;  %v16745_v20 = vsel %vm179_vm1, %v24765_v19, 0.0  ;;  %v16738_v30 = vadd.f32 %v16737_v23, %v16736_v22 }
 0x432   : > { %v23123_v47 = vadd.f32 %v16698_v6, %v16697_v1  ;;  %v16706_v36 = vadd.f32 %v16705_v7, %v16704_v16  ;;  %v16714_v44 = vrot.slane %v16713_v17, 2  ;;  %v16722_v60 = vadd.f32 %v16721_v58, %v16720_v54 }
 0x433   : > { %v16730_v59 = vrot.slane %v16729_v18, 4  ;;  %v16746_v61 = vsel %vm179_vm1, %v24766_v9, 0.0  ;;  %v16754_v31 = vsel %vm179_vm1, %v24767_v42, 0.0  ;;  %v16739_v10 = vrot.slane %v16738_v30, 4 }
 0x434   : > { %v16707_v15 = vrot.slane %v16706_v36, 1  ;;  %v16715_v51 = vadd.f32 %v16714_v44, %v16713_v17  ;;  %v16723_v48 = vrot.slane %v16722_v60, 2  ;;  %v16747_v39 = vadd.f32 %v16746_v61, %v16745_v20 }
 0x435   : > { %v16731_v2 = vadd.f32 %v16730_v59, %v16729_v18  ;;  %v16755_v52 = vsel %vm179_vm1, %v24768_v25, 0.0  ;;  %v16763_v55 = vsel %vm179_vm1, %v24769_v63, 0.0  ;;  %v16740_v1 = vadd.f32 %v16739_v10, %v16738_v30 }
 0x436   : > { %v23133_v5 = vadd.f32 %v16707_v15, %v16706_v36  ;;  %v16716_v8 = vrot.slane %v16715_v51, 1  ;;  %v16724_v0 = vadd.f32 %v16723_v48, %v16722_v60  ;;  %v16748_v57 = vrot.slane %v16747_v39, 4 }
 0x437   : > { %v16732_v34 = vrot.slane %v16731_v2, 2  ;;  %v16756_v16 = vadd.f32 %v16755_v52, %v16754_v31  ;;  %v16764_v54 = vsel %vm179_vm1, %v24770_v35, 0.0  ;;  %v16741_v7 = vrot.slane %v16740_v1, 2 }
 0x438   : > { %v23137_v28 = vadd.f32 %v16716_v8, %v16715_v51  ;;  %v16725_v41 = vrot.slane %v16724_v0, 1  ;;  %v16749_v53 = vadd.f32 %v16748_v57, %v16747_v39  ;;  %v16765_v22 = vadd.f32 %v16764_v54, %v16763_v55 }
 0x439   : > { %v16733_v6 = vadd.f32 %v16732_v34, %v16731_v2  ;;  %v16757_v17 = vrot.slane %v16756_v16, 4  ;;  %v16805_v58 = vsel %vm16804_vm3, %v22993_v32, %v22991_v27  ;;  %v16742_v44 = vadd.f32 %v16741_v7, %v16740_v1 }
 0x43a   : > { %v23142_v18 = vadd.f32 %v16725_v41, %v16724_v0  ;;  %v16750_v23 = vrot.slane %v16749_v53, 2  ;;  %v16766_v19 = vrot.slane %v16765_v22, 4  ;;  %v16807_v20 = vsel %vm16806_vm4, %v22995_v62, %v16805_v58 }
 0x43b   : > { %v16734_v36 = vrot.slane %v16733_v6, 1  ;;  %v16758_v60 = vadd.f32 %v16757_v17, %v16756_v16  ;;  %v16809_v59 = vsel %vm16808_vm5, %v22997_v33, %v16807_v20  ;;  %v16818_v42 = vsel %vm16804_vm3, %v23041_v43, %v23037_v46 }
 0x43c   : > { %v16751_v30 = vadd.f32 %v16750_v23, %v16749_v53  ;;  %v16767_v9 = vadd.f32 %v16766_v19, %v16765_v22  ;;  %v16811_v61 = vsel %vm16810_vm6, %v23003_v14, %v16809_v59  ;;  %v16743_v15 = vrot.slane %v16742_v44, 1 }
 0x43d   : > { %v23153_v31 = vadd.f32 %v16734_v36, %v16733_v6  ;;  %v16759_v51 = vrot.slane %v16758_v60, 2  ;;  %v16813_v48 = vsel %vm16812_vm7, %v23005_v3, %v16811_v61  ;;  %v16819_v25 = vsel %vm16806_vm4, %v23047_v4, %v16818_v42 }
 0x43e   : > { %v16752_v39 = vrot.slane %v16751_v30, 1  ;;  %v16768_v2 = vrot.slane %v16767_v9, 2  ;;  %v16815_v10 = vsel %vm16814_vm8, %v23021_v37, %v16813_v48  ;;  %v23161_v52 = vadd.f32 %v16743_v15, %v16742_v44 }
 0x43f   : > { %v16760_v63 = vadd.f32 %v16759_v51, %v16758_v60  ;;  %v16817_v55 = vsel %vm16816_vm9, %v23031_v11, %v16815_v10  ;;  %v16820_v8 = vsel %vm16808_vm5, %v23049_v49, %v16819_v25  ;;  %v16825_v1 = vsel %vm16804_vm3, %v23089_v24, %v23085_v29 }
 0x440   : > { %v23167_v0 = vadd.f32 %v16752_v39, %v16751_v30  ;;  %v16769_v57 = vadd.f32 %v16768_v2, %v16767_v9  ;;  %v16821_v34 = vsel %vm16810_vm6, %v23051_v12, %v16820_v8  ;;  %16843 = vst.msk [vmem:[#allocation4] sm:$0xff] %vm179_vm1, %v16817_v55  ;;  %v16826_v54 = vsel %vm16806_vm4, %v23093_v21, %v16825_v1 }
 0x441   : > { %v16761_v16 = vrot.slane %v16760_v63, 1  ;;  %v16822_v35 = vsel %vm16812_vm7, %v23061_v38, %v16821_v34  ;;  %v16832_v41 = vsel %vm16804_vm3, %v23137_v28, %v23133_v5  ;;  %v16827_v6 = vsel %vm16808_vm5, %v23099_v26, %v16826_v54 }
 0x442   : > { %v16770_v53 = vrot.slane %v16769_v57, 1  ;;  %v16823_v22 = vsel %vm16814_vm8, %v23065_v13, %v16822_v35  ;;  %v16833_v7 = vsel %vm16806_vm4, %v23142_v18, %v16832_v41  ;;  %v16828_v23 = vsel %vm16810_vm6, %v23105_v40, %v16827_v6 }
 0x443   : > { %v23188_v17 = vadd.f32 %v16761_v16, %v16760_v63  ;;  %v16824_v58 = vsel %vm16816_vm9, %v23075_v50, %v16823_v22  ;;  %v16834_v19 = vsel %vm16808_vm5, %v23153_v31, %v16833_v7  ;;  %v16829_v36 = vsel %vm16812_vm7, %v23111_v56, %v16828_v23 }
 0x444   : > { %v23196_v20 = vadd.f32 %v16770_v53, %v16769_v57  ;;  %v16835_v44 = vsel %vm16810_vm6, %v23161_v52, %v16834_v19  ;;  %16844 = vst.msk [vmem:[#allocation4 + $0x8] sm:$0xff] %vm179_vm1, %v16824_v58  ;;  %v16848_v60 = vsel %vm179_vm1, %v22991_v27, -inf  ;;  %v16830_v59 = vsel %vm16814_vm8, %v23117_v45, %v16829_v36 }
 0x445   : > { %v16836_v30 = vsel %vm16812_vm7, %v23167_v0, %v16835_v44  ;;  %v16849_v9 = vsel %vm179_vm1, %v22993_v32, -inf  ;;  %v16850_v61 = vsel %vm179_vm1, %v22995_v62, -inf  ;;  %v16831_v42 = vsel %vm16816_vm9, %v23123_v47, %v16830_v59 }
 0x446   : > { %v16837_v15 = vsel %vm16814_vm8, %v23188_v17, %v16836_v30  ;;  %v16851_v51 = vsel %vm179_vm1, %v22997_v33, -inf  ;;  %v16852_v48 = vsel %vm179_vm1, %v23003_v14, -inf  ;;  %16845 = vst.msk [vmem:[#allocation4 + $0x10] sm:$0xff] %vm179_vm1, %v16831_v42  ;;  %v16854_v10 = vsel %vm179_vm1, %v23005_v3, -inf }
 0x447   : > { %v16838_v39 = vsel %vm16816_vm9, %v23196_v20, %v16837_v15  ;;  %v16853_v2 = vmax.f32 %v16848_v60, %v16852_v48  ;;  %v16856_v25 = vsel %vm179_vm1, %v23021_v37, -inf  ;;  %v16855_v63 = vmax.f32 %v16849_v9, %v16854_v10 }
 0x448   : > { %16846 = vst.msk [vmem:[#allocation4 + $0x18] sm:$0xff] %vm179_vm1, %v16838_v39  ;;  %v16857_v55 = vmax.f32 %v16850_v61, %v16856_v25  ;;  %v16858_v8 = vsel %vm179_vm1, %v23031_v11, -inf  ;;  %v16860_v57 = vsel %vm179_vm1, %v23037_v46, -inf  ;;  %v16862_v16 = vsel %vm179_vm1, %v23041_v43, -inf }
 0x449   : > { %v16859_v34 = vmax.f32 %v16851_v51, %v16858_v8  ;;  %v16861_v1 = vmax.f32 %v16853_v2, %v16860_v57  ;;  %v16864_v35 = vsel %vm179_vm1, %v23047_v4, -inf  ;;  %v16863_v54 = vmax.f32 %v16855_v63, %v16862_v16 }
 0x44a   : > { %v16865_v41 = vmax.f32 %v16857_v55, %v16864_v35  ;;  %v16866_v53 = vsel %vm179_vm1, %v23049_v49, -inf  ;;  %v16868_v22 = vsel %vm179_vm1, %v23051_v12, -inf  ;;  %v16870_v58 = vsel %vm179_vm1, %v23061_v38, -inf }
 0x44b   : > { %v16867_v6 = vmax.f32 %v16859_v34, %v16866_v53  ;;  %v16869_v7 = vmax.f32 %v16861_v1, %v16868_v22  ;;  %v16872_v23 = vsel %vm179_vm1, %v23065_v13, -inf  ;;  %v16871_v19 = vmax.f32 %v16863_v54, %v16870_v58 }
 0x44c   : > { %v16873_v36 = vmax.f32 %v16865_v41, %v16872_v23  ;;  %v16874_v44 = vsel %vm179_vm1, %v23075_v50, -inf  ;;  %v16876_v60 = vsel %vm179_vm1, %v23085_v29, -inf  ;;  %v16878_v9 = vsel %vm179_vm1, %v23089_v24, -inf }
 0x44d   : > { %v16875_v59 = vmax.f32 %v16867_v6, %v16874_v44  ;;  %v16877_v30 = vmax.f32 %v16869_v7, %v16876_v60  ;;  %v16880_v61 = vsel %vm179_vm1, %v23093_v21, -inf  ;;  %v16879_v42 = vmax.f32 %v16871_v19, %v16878_v9 }
 0x44e   : > { %v16881_v15 = vmax.f32 %v16873_v36, %v16880_v61  ;;  %v16882_v51 = vsel %vm179_vm1, %v23099_v26, -inf  ;;  %v16884_v48 = vsel %vm179_vm1, %v23105_v40, -inf  ;;  %v16886_v10 = vsel %vm179_vm1, %v23111_v56, -inf }
 0x44f   : > { %v16883_v39 = vmax.f32 %v16875_v59, %v16882_v51  ;;  %v16885_v2 = vmax.f32 %v16877_v30, %v16884_v48  ;;  %v16888_v25 = vsel %vm179_vm1, %v23117_v45, -inf  ;;  %v16887_v63 = vmax.f32 %v16879_v42, %v16886_v10  ;;  %v23282_v42 = vld [vmem:[#allocation5] sm:$0x1] }
 0x450   : > { %v16889_v55 = vmax.f32 %v16881_v15, %v16888_v25  ;;  %v16890_v8 = vsel %vm179_vm1, %v23123_v47, -inf  ;;  %v16892_v57 = vsel %vm179_vm1, %v23133_v5, -inf  ;;  %v16894_v16 = vsel %vm179_vm1, %v23137_v28, -inf }
 0x451   : > { %v16891_v34 = vmax.f32 %v16883_v39, %v16890_v8  ;;  %v16893_v1 = vmax.f32 %v16885_v2, %v16892_v57  ;;  %v16896_v35 = vsel %vm179_vm1, %v23142_v18, -inf  ;;  %v16895_v54 = vmax.f32 %v16887_v63, %v16894_v16 }
 0x452   : > { %v16897_v41 = vmax.f32 %v16889_v55, %v16896_v35  ;;  %v16898_v53 = vsel %vm179_vm1, %v23153_v31, -inf  ;;  %v16900_v22 = vsel %vm179_vm1, %v23161_v52, -inf  ;;  %v16902_v58 = vsel %vm179_vm1, %v23167_v0, -inf }
 0x453   : > { %v16899_v6 = vmax.f32 %v16891_v34, %v16898_v53  ;;  %v16901_v7 = vmax.f32 %v16893_v1, %v16900_v22  ;;  %v16904_v23 = vsel %vm179_vm1, %v23188_v17, -inf  ;;  %v16903_v19 = vmax.f32 %v16895_v54, %v16902_v58 }
 0x454   : > { %v16905_v36 = vmax.f32 %v16897_v41, %v16904_v23  ;;  %v16906_v44 = vsel %vm179_vm1, %v23196_v20, -inf  ;;  %v24771_v9 = vlaneseq  ;;  %v24774_v39 = vmov -inf  }
 0x455   : > { %v16907_v60 = vmax.f32 %v16899_v6, %v16906_v44  ;;  %v16908_v59 = vmax.f32 %v16901_v7, %v16903_v19 }
 0x456   : > { %v23280_v61 = vshrl.u32 %v24771_v9, 7 }
 0x457   : > { %v16909_v30 = vmax.f32 %v16905_v36, %v16907_v60 }
 0x458   : > { %24772 = vst [vmem:[#allocation8_spill] sm:$0xff] %v23280_v61  ;;  %v23288_v48 = vsub.s32 0, %v23280_v61 }
 0x459   : > { %v16910_v15 = vmax.f32 %v16908_v59, %v16909_v30 }
 0x45a   : > { %24773 = vst [vmem:[#allocation9_spill] sm:$0xff] %v23288_v48 }
 0x45b   : > { %v23285_v51 = vmax.f32 %v23282_v42, %v16910_v15 }
 0x45d   : > { %17458 = vst.msk [vmem:[#allocation5] sm:$0x1] %vm16350_vm2, %v23285_v51  ;;  %v23296_v2 = vrot.slane %v23285_v51, %v23288_v48 }
 0x45e   : > { %17490 = vst.msk [vmem:[#allocation5] sm:$0x1] %vm16350_vm2, %v24774_v39 }
 0x45f   : > { %v16921_v10 = vsub.f32 %v22991_v27, %v23296_v2  ;;  %v16922_v25 = vsub.f32 %v22993_v32, %v23296_v2  ;;  %v16923_v63 = vsub.f32 %v22995_v62, %v23296_v2  ;;  %v16924_v55 = vsub.f32 %v22997_v33, %v23296_v2 }
 0x460   : > { %v16925_v8 = vsub.f32 %v23003_v14, %v23296_v2  ;;  %v16926_v57 = vsub.f32 %v23005_v3, %v23296_v2  ;;  %v16927_v34 = vsub.f32 %v23021_v37, %v23296_v2  ;;  %v16928_v32 = vsub.f32 %v23031_v11, %v23296_v2 }
 0x461   : > { %v16953_v1 = vmul.f32 1.442695, %v16921_v10  ;;  %v16955_v27 = vmul.f32 1.442695, %v16922_v25  ;;  %v16957_v16 = vmul.f32 1.442695, %v16923_v63  ;;  %v16929_v62 = vsub.f32 %v23037_v46, %v23296_v2 }
 0x462   : > { %v16959_v35 = vmul.f32 1.442695, %v16924_v55  ;;  %v16961_v33 = vmul.f32 1.442695, %v16925_v8  ;;  %v16930_v14 = vsub.f32 %v23041_v43, %v23296_v2  ;;  %v16963_v3 = vmul.f32 1.442695, %v16926_v57 }
 0x463   : > { %20613 = vpow2.f32 %v16953_v1  ;;  %v16931_v37 = vsub.f32 %v23047_v4, %v23296_v2  ;;  %v16965_v54 = vmul.f32 1.442695, %v16927_v34  ;;  %v16932_v11 = vsub.f32 %v23049_v49, %v23296_v2 }
 0x464   : > { %20615 = vpow2.f32 %v16955_v27  ;;  %v16967_v41 = vmul.f32 1.442695, %v16928_v32  ;;  %v16933_v46 = vsub.f32 %v23051_v12, %v23296_v2  ;;  %v16934_v53 = vsub.f32 %v23061_v38, %v23296_v2 }
 0x465   : > { %20617 = vpow2.f32 %v16957_v16  ;;  %v16969_v43 = vmul.f32 1.442695, %v16929_v62  ;;  %v16935_v22 = vsub.f32 %v23065_v13, %v23296_v2  ;;  %v16936_v4 = vsub.f32 %v23075_v50, %v23296_v2 }
 0x466   : > { %20619 = vpow2.f32 %v16959_v35  ;;  %v16971_v6 = vmul.f32 1.442695, %v16930_v14  ;;  %v16937_v49 = vsub.f32 %v23085_v29, %v23296_v2  ;;  %v16938_v7 = vsub.f32 %v23089_v24, %v23296_v2 }
 0x467   : > { %20621 = vpow2.f32 %v16961_v33  ;;  %v16973_v12 = vmul.f32 1.442695, %v16931_v37  ;;  %v16939_v38 = vsub.f32 %v23093_v21, %v23296_v2  ;;  %v16940_v58 = vsub.f32 %v23099_v26, %v23296_v2 }
 0x468   : > { %20623 = vpow2.f32 %v16963_v3  ;;  %v16975_v13 = vmul.f32 1.442695, %v16932_v11  ;;  %v16941_v50 = vsub.f32 %v23105_v40, %v23296_v2  ;;  %v16942_v23 = vsub.f32 %v23111_v56, %v23296_v2 }
 0x469   : > { %20625 = vpow2.f32 %v16965_v54  ;;  %v16977_v29 = vmul.f32 1.442695, %v16933_v46  ;;  %v16943_v24 = vsub.f32 %v23117_v45, %v23296_v2  ;;  %v16944_v19 = vsub.f32 %v23123_v47, %v23296_v2 }
 0x46a   : > { %20627 = vpow2.f32 %v16967_v41  ;;  %v16979_v21 = vmul.f32 1.442695, %v16934_v53  ;;  %v16945_v26 = vsub.f32 %v23133_v5, %v23296_v2  ;;  %v16946_v40 = vsub.f32 %v23137_v28, %v23296_v2 }
 0x46b   : > { %20629 = vpow2.f32 %v16969_v43  ;;  %v16981_v56 = vmul.f32 1.442695, %v16935_v22  ;;  %v16947_v45 = vsub.f32 %v23142_v18, %v23296_v2  ;;  %v16948_v47 = vsub.f32 %v23153_v31, %v23296_v2 }
 0x46c   : > { %20631 = vpow2.f32 %v16971_v6  ;;  %v16983_v60 = vmul.f32 1.442695, %v16936_v4  ;;  %v16949_v5 = vsub.f32 %v23161_v52, %v23296_v2  ;;  %v16985_v30 = vmul.f32 1.442695, %v16937_v49 }
 0x46d   : > { %v23346_v36 = vpop.eup %20613  ;;  %20633 = vpow2.f32 %v16973_v12  ;;  %v16950_v15 = vsub.f32 %v23167_v0, %v23296_v2  ;;  %v16987_v18 = vmul.f32 1.442695, %v16938_v7  ;;  %v16989_v10 = vmul.f32 1.442695, %v16939_v38 }
 0x46e   : > { %v23352_v44 = vpop.eup %20615  ;;  %20635 = vpow2.f32 %v16975_v13  ;;  %v16991_v55 = vmul.f32 1.442695, %v16940_v58  ;;  %v16993_v34 = vmul.f32 1.442695, %v16941_v50  ;;  %v16995_v16 = vmul.f32 1.442695, %v16942_v23 }
 0x46f   : > { %v23358_v59 = vpop.eup %20617  ;;  %20637 = vpow2.f32 %v16977_v29  ;;  %v17051_v28 = vrot.slane %v23352_v44, 7  ;;  %v16997_v14 = vmul.f32 1.442695, %v16943_v24  ;;  %v16951_v11 = vsub.f32 %v23188_v17, %v23296_v2 }
 0x470   : > { %v23363_v9 = vpop.eup %20619  ;;  %20639 = vpow2.f32 %v16979_v21  ;;  %v17053_v31 = vrot.slane %v23358_v59, 6  ;;  %v16999_v41 = vmul.f32 1.442695, %v16944_v19  ;;  %v17001_v43 = vmul.f32 1.442695, %v16945_v26 }
 0x471   : > { %v23368_v39 = vpop.eup %20621  ;;  %20641 = vpow2.f32 %v16981_v56  ;;  %v17052_v52 = vsel %vm16804_vm3, %v17051_v28, %v23346_v36  ;;  %v17055_v25 = vrot.slane %v23363_v9, 5  ;;  %v16952_v49 = vsub.f32 %v23196_v20, %v23296_v2 }
 0x472   : > { %v23373_v63 = vpop.eup %20623  ;;  %20643 = vpow2.f32 %v16983_v60  ;;  %v17054_v8 = vsel %vm16806_vm4, %v17053_v31, %v17052_v52  ;;  %v17057_v0 = vrot.slane %v23368_v39, 4  ;;  %v17003_v7 = vmul.f32 1.442695, %v16946_v40 }
 0x473   : > { %v23377_v57 = vpop.eup %20625  ;;  %20645 = vpow2.f32 %v16985_v30  ;;  %v17056_v1 = vsel %vm16808_vm5, %v17055_v25, %v17054_v8  ;;  %v17059_v27 = vrot.slane %v23373_v63, 3  ;;  %v17005_v38 = vmul.f32 1.442695, %v16947_v45 }
 0x474   : > { %v23381_v32 = vpop.eup %20627  ;;  %20647 = vpow2.f32 %v16987_v18  ;;  %v17058_v35 = vsel %vm16810_vm6, %v17057_v0, %v17056_v1  ;;  %v17061_v62 = vrot.slane %v23377_v57, 2  ;;  %v17007_v23 = vmul.f32 1.442695, %v16948_v47 }
 0x475   : > { %v23385_v33 = vpop.eup %20629  ;;  %20649 = vpow2.f32 %v16989_v10  ;;  %v17060_v3 = vsel %vm16812_vm7, %v17059_v27, %v17058_v35  ;;  %v17063_v37 = vrot.slane %v23381_v32, 1  ;;  %v17009_v24 = vmul.f32 1.442695, %v16949_v5 }
 0x476   : > { %v23389_v54 = vpop.eup %20631  ;;  %20651 = vpow2.f32 %v16991_v55  ;;  %v17062_v46 = vsel %vm16814_vm8, %v17061_v62, %v17060_v3  ;;  %v17011_v40 = vmul.f32 1.442695, %v16950_v15  ;;  %v17013_v60 = vmul.f32 1.442695, %v16951_v11 }
 0x477   : > { %v23394_v53 = vpop.eup %20633  ;;  %20653 = vpow2.f32 %v16993_v34  ;;  %v17064_v22 = vsel %vm16816_vm9, %v17063_v37, %v17062_v46  ;;  %v17065_v4 = vrot.slane %v23389_v54, 7  ;;  %v17015_v18 = vmul.f32 1.442695, %v16952_v49 }
 0x478   : > { %v23398_v6 = vpop.eup %20635  ;;  %20655 = vpow2.f32 %v16995_v16  ;;  %v17067_v17 = vrot.slane %v23394_v53, 6  ;;  %v17111_v15 = vsel %vm179_vm1, %v17064_v22, 0.0 }
 0x479   : > { %v23403_v12 = vpop.eup %20637  ;;  %20657 = vpow2.f32 %v16997_v14  ;;  %v17066_v58 = vsel %vm16804_vm3, %v17065_v4, %v23385_v33  ;;  %v17069_v13 = vrot.slane %v23398_v6, 5 }
 0x47a   : > { %v23408_v50 = vpop.eup %20639  ;;  %20659 = vpow2.f32 %v16999_v41  ;;  %v17068_v29 = vsel %vm16806_vm4, %v17067_v17, %v17066_v58  ;;  %v17071_v20 = vrot.slane %v23403_v12, 4 }
 0x47b   : > { %v23412_v2 = vpop.eup %20641  ;;  %20661 = vpow2.f32 %v17001_v43  ;;  %v17070_v19 = vsel %vm16808_vm5, %v17069_v13, %v17068_v29  ;;  %v17073_v21 = vrot.slane %v23408_v50, 3  ;;  %v23605_v61 = vrot.slane %v23408_v50, %v23288_v48 }
 0x47c   : > { %v23416_v26 = vpop.eup %20643  ;;  %20663 = vpow2.f32 %v17003_v7  ;;  %v17072_v56 = vsel %vm16810_vm6, %v17071_v20, %v17070_v19  ;;  %v17075_v45 = vrot.slane %v23412_v2, 2 }
 0x47d   : > { %v23420_v47 = vpop.eup %20645  ;;  %20665 = vpow2.f32 %v17005_v38  ;;  %v17074_v30 = vsel %vm16812_vm7, %v17073_v21, %v17072_v56  ;;  %v17077_v5 = vrot.slane %v23416_v26, 1  ;;  %v16912_v38 = vsub.f32 %v23282_v42, %v23285_v51 }
 0x47e   : > { %v23424_v28 = vpop.eup %20647  ;;  %20667 = vpow2.f32 %v17007_v23  ;;  %v17076_v31 = vsel %vm16814_vm8, %v17075_v45, %v17074_v30 }
 0x47f   : > { %v23428_v10 = vpop.eup %20649  ;;  %20669 = vpow2.f32 %v17009_v24  ;;  %v17078_v52 = vsel %vm16816_vm9, %v17077_v5, %v17076_v31  ;;  %v17079_v25 = vrot.slane %v23424_v28, 7  ;;  %v16913_v45 = vmul.f32 1.442695, %v16912_v38 }
 0x480   : > { %v23432_v55 = vpop.eup %20651  ;;  %20671 = vpow2.f32 %v17011_v40  ;;  %v17081_v8 = vrot.slane %v23428_v10, 6  ;;  %v17112_v0 = vsel %vm179_vm1, %v17078_v52, 0.0 }
 0x481   : > { %v23436_v34 = vpop.eup %20653  ;;  %20673 = vpow2.f32 %v17013_v60  ;;  %v17080_v1 = vsel %vm16804_vm3, %v17079_v25, %v23420_v47  ;;  %v17083_v27 = vrot.slane %v23432_v55, 5  ;;  %v17113_v16 = vadd.f32 %v17112_v0, %v17111_v15 }
 0x482   : > { %v23441_v35 = vpop.eup %20655  ;;  %20675 = vpow2.f32 %v17015_v18  ;;  %v17082_v62 = vsel %vm16806_vm4, %v17081_v8, %v17080_v1  ;;  %v17085_v14 = vrot.slane %v23436_v34, 4 }
 0x483   : > { %v23445_v3 = vpop.eup %20657  ;;  %v17084_v37 = vsel %vm16808_vm5, %v17083_v27, %v17082_v62  ;;  %v17087_v11 = vrot.slane %v23441_v35, 3  ;;  %20677 = vpow2.f32 %v16913_v45  ;;  %v23516_v45 = vld [vmem:[#allocation2 + $0x30] sm:$0xff] }
 0x484   : > { %v23449_v41 = vpop.eup %20659  ;;  %v17086_v46 = vsel %vm16810_vm6, %v17085_v14, %v17084_v37  ;;  %v17089_v43 = vrot.slane %v23445_v3, 2 }
 0x485   : > { %v23453_v22 = vpop.eup %20661  ;;  %v17088_v4 = vsel %vm16812_vm7, %v17087_v11, %v17086_v46  ;;  %v17091_v58 = vrot.slane %v23449_v41, 1  ;;  %v17139_v11 = vrot.slane %v23346_v36, %v23288_v48  ;;  %v17143_v46 = vrot.slane %v23352_v44, %v23288_v48 }
 0x486   : > { %v23456_v49 = vpop.eup %20663  ;;  %v17090_v7 = vsel %vm16814_vm8, %v17089_v43, %v17088_v4 }
 0x487   : > { %v23459_v17 = vpop.eup %20665  ;;  %v17093_v13 = vrot.slane %v23456_v49, 7  ;;  %v17092_v24 = vsel %vm16816_vm9, %v17091_v58, %v17090_v7  ;;  %v17017_v7 = vld [vmem:[#allocation6] sm:$0x1]  ;;  %v17151_v58 = vrot.slane %v23363_v9, %v23288_v48  ;;  %v17159_v9 = vrot.slane %v23373_v63, %v23288_v48 }
 0x488   : > { %v23465_v23 = vpop.eup %20667  ;;  %v17095_v29 = vrot.slane %v23459_v17, 6  ;;  %v17114_v15 = vsel %vm179_vm1, %v17092_v24, 0.0  ;;  %v23505_v24 = vld [vmem:[#allocation2 + $0x10] sm:$0xff] }
 0x489   : > { %v23468_v20 = vpop.eup %20669  ;;  %v17094_v19 = vsel %vm16804_vm3, %v17093_v13, %v23453_v22  ;;  %v17097_v21 = vrot.slane %v23465_v23, 5  ;;  %v17115_v8 = vadd.f32 %v17114_v15, %v17113_v16  ;;  %v17147_v16 = vrot.slane %v23358_v59, %v23288_v48  ;;  %v23502_v13 = vld [vmem:[#allocation2] sm:$0xff] }
 0x48a   : > { %v23474_v40 = vpop.eup %20671  ;;  %v17096_v42 = vsel %vm16806_vm4, %v17095_v29, %v17094_v19  ;;  %v17099_v51 = vrot.slane %v23468_v20, 4  ;;  %v17264_v29 = vmul.f32 %v23502_v13, %v17139_v11  ;;  %v17266_v36 = vmul.f32 %v23505_v24, %v17143_v46  ;;  %v23510_v59 = vld [vmem:[#allocation2 + $0x20] sm:$0xff] }
 0x48b   : > { %v23478_v56 = vpop.eup %20673  ;;  %v17098_v60 = vsel %vm16808_vm5, %v17097_v21, %v17096_v42  ;;  %v17101_v30 = vrot.slane %v23474_v40, 3  ;;  %v17155_v19 = vrot.slane %v23368_v39, %v23288_v48  ;;  %v17268_v21 = vmul.f32 %v23510_v59, %v17147_v16 }
 0x48c   : > { %v23482_v5 = vpop.eup %20675  ;;  %v17100_v18 = vsel %vm16810_vm6, %v17099_v51, %v17098_v60  ;;  %v17103_v31 = vrot.slane %v23478_v56, 2  ;;  %v17270_v60 = vmul.f32 %v23516_v45, %v17151_v58  ;;  %v17163_v15 = vrot.slane %v23377_v57, %v23288_v48 }
 0x48d   : > { %v17102_v52 = vsel %vm16812_vm7, %v17101_v30, %v17100_v18  ;;  %v17105_v25 = vrot.slane %v23482_v5, 1  ;;  %v23498_v4 = vpop.eup %20677  ;;  %v17328_v30 = vsel %vm179_vm1, %v17264_v29, 0.0  ;;  %v17329_v18 = vsel %vm179_vm1, %v17266_v36, 0.0 }
 0x48e   : > { %v17104_v0 = vsel %vm16814_vm8, %v17103_v31, %v17102_v52  ;;  %v17018_v42 = vmul.f32 %v23498_v4, %v17017_v7  ;;  %v17330_v31 = vadd.f32 %v17329_v18, %v17328_v30  ;;  %v23523_v52 = vld [vmem:[#allocation2 + $0x40] sm:$0xff]  ;;  %v17331_v63 = vsel %vm179_vm1, %v17268_v21, 0.0  ;;  %v23541_v7 = vld [vmem:[#allocation2 + $0x18] sm:$0xff] }
 0x48f   : > { %v17106_v1 = vsel %vm16816_vm9, %v17105_v25, %v17104_v0  ;;  %v17272_v25 = vmul.f32 %v23523_v52, %v17155_v19  ;;  %v17167_v0 = vrot.slane %v23381_v32, %v23288_v48  ;;  %v23544_v32 = vld [vmem:[#allocation2 + $0x60] sm:$0xff]  ;;  %v23550_v21 = vrot.slane %v23389_v54, %v23288_v48 }
 0x490   : > { %v17116_v27 = vsel %vm179_vm1, %v17106_v1, 0.0  ;;  %v23530_v1 = vld [vmem:[#allocation2 + $0x50] sm:$0xff]  ;;  %v17276_v29 = vmul.f32 %v23544_v32, %v17163_v15 }
 0x491   : > { %v17117_v62 = vadd.f32 %v17116_v27, %v17115_v8  ;;  %v17332_v8 = vadd.f32 %v17331_v63, %v17330_v31  ;;  %v17274_v27 = vmul.f32 %v23530_v1, %v17159_v9  ;;  %v17335_v36 = vsel %vm179_vm1, %v17272_v25, 0.0  ;;  %v23564_v31 = vld [vmem:[#allocation2 + $0x38] sm:$0xff] }
 0x492   : > { %v17271_v54 = vmul.f32 %v23564_v31, %v17151_v58  ;;  %v17339_v25 = vsel %vm179_vm1, %v17276_v29, 0.0 }
 0x493   : > { %v17118_v14 = vrot.slane %v17117_v62, 4 }
 0x495   : > { %v17119_v37 = vadd.f32 %v17118_v14, %v17117_v62  ;;  %v17333_v62 = vsel %vm179_vm1, %v17270_v60, 0.0  ;;  %v23534_v14 = vld [vmem:[#allocation2 + $0x8] sm:$0xff]  ;;  %v23561_v60 = vrot.slane %v23394_v53, %v23288_v48  ;;  %v23575_v53 = vrot.slane %v23398_v6, %v23288_v48 }
 0x496   : > { %v17265_v57 = vmul.f32 %v23534_v14, %v17139_v11  ;;  %v23552_v11 = vld [vmem:[#allocation2 + $0x28] sm:$0xff]  ;;  %v23592_v6 = vrot.slane %v23403_v12, %v23288_v48 }
 0x497   : > { %v17120_v43 = vrot.slane %v17119_v37, 2 }
 0x498   : > { %v17391_v18 = vsel %vm179_vm1, %v17265_v57, 0.0  ;;  %v23579_v57 = vld [vmem:[#allocation2 + $0x48] sm:$0xff] }
 0x499   : > { %v17121_v38 = vadd.f32 %v17120_v43, %v17119_v37  ;;  %v17334_v37 = vadd.f32 %v17333_v62, %v17332_v8  ;;  %v23539_v43 = vrot.slane %v23385_v33, %v23288_v48  ;;  %v17269_v33 = vmul.f32 %v23552_v11, %v17147_v16 }
 0x49a   : > { %v17273_v58 = vmul.f32 %v23579_v57, %v17155_v19 }
 0x49b   : > { %v17122_v44 = vrot.slane %v17121_v38, 1 }
 0x49d   : > { %v17123_v51 = vadd.f32 %v17122_v44, %v17121_v38  ;;  %v17267_v38 = vmul.f32 %v23541_v7, %v17143_v46  ;;  %v17336_v44 = vadd.f32 %v17335_v36, %v17334_v37  ;;  %v17337_v46 = vsel %vm179_vm1, %v17274_v27, 0.0  ;;  %v23582_v37 = vld [vmem:[#allocation2 + $0x90] sm:$0xff] }
 0x49e   : > { %v17282_v36 = vmul.f32 %v23582_v37, %v23550_v21 }
 0x49f   : > { %v17124_v39 = vadd.f32 %v17123_v51, %v17018_v42  ;;  %v23555_v42 = vld [vmem:[#allocation2 + $0x70] sm:$0xff]  ;;  %v17338_v30 = vadd.f32 %v17337_v46, %v17336_v44  ;;  %v17392_v63 = vsel %vm179_vm1, %v17267_v38, 0.0  ;;  %v17394_v38 = vsel %vm179_vm1, %v17269_v33, 0.0 }
 0x4a0   : > { %v17278_v51 = vmul.f32 %v23555_v42, %v17167_v0  ;;  %v17393_v27 = vadd.f32 %v17392_v63, %v17391_v18  ;;  %v24775_v44 = vmov 0.0   ;;  %v23594_v18 = vld [vmem:[#allocation2 + $0x58] sm:$0xff]  ;;  %v17396_v63 = vsel %vm179_vm1, %v17271_v54, 0.0 }
 0x4a1   : > { %17125 = vst.msk [vmem:[#allocation6] sm:$0x1] %vm16350_vm2, %v17124_v39  ;;  %v23567_v39 = vld [vmem:[#allocation2 + $0x80] sm:$0xff]  ;;  %v17340_v8 = vadd.f32 %v17339_v25, %v17338_v30  ;;  %v17275_v19 = vmul.f32 %v23594_v18, %v17159_v9  ;;  %v23610_v9 = vld [vmem:[#allocation2 + $0xb0] sm:$0xff]  ;;  %v23618_v54 = vrot.slane %v23412_v2, %v23288_v48 }
 0x4a2   : > { %v17280_v16 = vmul.f32 %v23567_v39, %v23539_v43  ;;  %v17341_v29 = vsel %vm179_vm1, %v17278_v51, 0.0  ;;  %v17395_v30 = vadd.f32 %v17394_v38, %v17393_v27  ;;  %v23597_v25 = vld [vmem:[#allocation2 + $0xa0] sm:$0xff]  ;;  %v23607_v27 = vld [vmem:[#allocation2 + $0x68] sm:$0xff]  ;;  %24777 = vst [vmem:[#allocation11_spill] sm:$0xff] %v23610_v9  ;;  %v17286_v38 = vmul.f32 %v23610_v9, %v23575_v53 }
 0x4a3   : > { %v17342_v46 = vadd.f32 %v17341_v29, %v17340_v8  ;;  %24776 = vst [vmem:[#allocation10_spill] sm:$0xff] %v23597_v25  ;;  %v17284_v51 = vmul.f32 %v23597_v25, %v23561_v60  ;;  %v17277_v29 = vmul.f32 %v23607_v27, %v17163_v15  ;;  %v17345_v25 = vsel %vm179_vm1, %v17282_v36, 0.0  ;;  %v23623_v15 = vld [vmem:[#allocation2 + $0xc0] sm:$0xff] }
 0x4a4   : > { %v17343_v33 = vsel %vm179_vm1, %v17280_v16, 0.0  ;;  %v17397_v8 = vadd.f32 %v17396_v63, %v17395_v30  ;;  %v17398_v16 = vsel %vm179_vm1, %v17273_v58, 0.0  ;;  %v23620_v30 = vld [vmem:[#allocation2 + $0x78] sm:$0xff]  ;;  %v17288_v63 = vmul.f32 %v23623_v15, %v23592_v6 }
 0x4a5   : > { %v17344_v12 = vadd.f32 %v17343_v33, %v17342_v46  ;;  %v17279_v33 = vmul.f32 %v23620_v30, %v17167_v0  ;;  %v17347_v9 = vsel %vm179_vm1, %v17284_v51, 0.0  ;;  %v17400_v36 = vsel %vm179_vm1, %v17275_v19, 0.0 }
 0x4a6   : > { %v17399_v46 = vadd.f32 %v17398_v16, %v17397_v8  ;;  %v23631_v58 = vrot.slane %v23416_v26, %v23288_v48  ;;  %v23637_v8 = vld [vmem:[#allocation2 + $0xd0] sm:$0xff]  ;;  %v17349_v51 = vsel %vm179_vm1, %v17286_v38, 0.0  ;;  %v17402_v19 = vsel %vm179_vm1, %v17277_v29, 0.0 }
 0x4a7   : > { %v17346_v50 = vadd.f32 %v17345_v25, %v17344_v12  ;;  %v23633_v12 = vld [vmem:[#allocation2 + $0x88] sm:$0xff]  ;;  %24778 = vst [vmem:[#allocation12_spill] sm:$0xff] %v23637_v8  ;;  %v17290_v16 = vmul.f32 %v23637_v8, %v23605_v61  ;;  %v23645_v26 = vrot.slane %v23420_v47, %v23288_v48  ;;  %v17351_v38 = vsel %vm179_vm1, %v17288_v63, 0.0 }
 0x4a8   : > { %v23577_v62 = vld [vmem:[#allocation6] ss:$0 sm:$0xff]  ;;  %v17401_v25 = vadd.f32 %v17400_v36, %v17399_v46  ;;  %v17281_v0 = vmul.f32 %v23633_v12, %v23539_v43  ;;  %v23647_v46 = vld [vmem:[#allocation2 + $0x98] sm:$0xff]  ;;  %v23651_v36 = vld [vmem:[#allocation2 + $0xe0] sm:$0xff]  ;;  %v17404_v29 = vsel %vm179_vm1, %v17279_v33, 0.0  ;;  %v23659_v47 = vrot.slane %v23424_v28, %v23288_v48 }
 0x4a9   : > { %17491 = vst.msk [vmem:[#allocation6] sm:$0x1] %vm16350_vm2, %v24775_v44  ;;  %v17348_v2 = vadd.f32 %v17347_v9, %v17346_v50  ;;  %v17283_v43 = vmul.f32 %v23647_v46, %v23550_v21  ;;  %24779 = vst [vmem:[#allocation13_spill] sm:$0xff] %v23651_v36  ;;  %v17292_v8 = vmul.f32 %v23651_v36, %v23618_v54  ;;  %v17353_v63 = vsel %vm179_vm1, %v17290_v16, 0.0 }
 0x4aa   : > { %v17403_v50 = vadd.f32 %v17402_v19, %v17401_v25  ;;  %v23665_v19 = vld [vmem:[#allocation2 + $0xf0] sm:$0xff]  ;;  %v17406_v33 = vsel %vm179_vm1, %v17281_v0, 0.0  ;;  %v23673_v28 = vrot.slane %v23428_v10, %v23288_v48  ;;  %v23687_v10 = vrot.slane %v23432_v55, %v23288_v48 }
 0x4ab   : > { %v17350_v9 = vadd.f32 %v17349_v51, %v17348_v2  ;;  %v23661_v51 = vld [vmem:[#allocation2 + $0xa8] sm:$0xff]  ;;  %24780 = vst [vmem:[#allocation14_spill] sm:$0xff] %v23665_v19  ;;  %v17294_v36 = vmul.f32 %v23665_v19, %v23631_v58  ;;  %v17355_v16 = vsel %vm179_vm1, %v17292_v8, 0.0  ;;  %v17408_v0 = vsel %vm179_vm1, %v17283_v43, 0.0 }
 0x4ac   : > { %v17405_v25 = vadd.f32 %v17404_v29, %v17403_v50  ;;  %v17285_v21 = vmul.f32 %v23661_v51, %v23561_v60  ;;  %v23679_v29 = vld [vmem:[#allocation2 + $0x100] sm:$0xff]  ;;  %v23701_v55 = vrot.slane %v23436_v34, %v23288_v48  ;;  %v23715_v34 = vrot.slane %v23441_v35, %v23288_v48 }
 0x4ad   : > { %v17352_v2 = vadd.f32 %v17351_v38, %v17350_v9  ;;  %v23675_v38 = vld [vmem:[#allocation2 + $0xb8] sm:$0xff]  ;;  %24781 = vst [vmem:[#allocation15_spill] sm:$0xff] %v23679_v29  ;;  %v17296_v19 = vmul.f32 %v23679_v29, %v23645_v26  ;;  %v17357_v8 = vsel %vm179_vm1, %v17294_v36, 0.0  ;;  %v23729_v35 = vrot.slane %v23445_v3, %v23288_v48 }
 0x4ae   : > { %v17407_v50 = vadd.f32 %v17406_v33, %v17405_v25  ;;  %v17287_v60 = vmul.f32 %v23675_v38, %v23575_v53  ;;  %v23693_v33 = vld [vmem:[#allocation2 + $0x110] sm:$0xff]  ;;  %v17410_v43 = vsel %vm179_vm1, %v17285_v21, 0.0  ;;  %v23743_v3 = vrot.slane %v23449_v41, %v23288_v48 }
 0x4af   : > { %v17354_v9 = vadd.f32 %v17353_v63, %v17352_v2  ;;  %v23689_v63 = vld [vmem:[#allocation2 + $0xc8] sm:$0xff]  ;;  %24782 = vst [vmem:[#allocation16_spill] sm:$0xff] %v23693_v33  ;;  %v17298_v29 = vmul.f32 %v23693_v33, %v23659_v47  ;;  %v17359_v36 = vsel %vm179_vm1, %v17296_v19, 0.0  ;;  %v23757_v41 = vrot.slane %v23453_v22, %v23288_v48 }
 0x4b0   : > { %v17409_v25 = vadd.f32 %v17408_v0, %v17407_v50  ;;  %v17289_v53 = vmul.f32 %v23689_v63, %v23592_v6  ;;  %v23707_v0 = vld [vmem:[#allocation2 + $0x120] sm:$0xff]  ;;  %v17412_v21 = vsel %vm179_vm1, %v17287_v60, 0.0  ;;  %v23771_v22 = vrot.slane %v23456_v49, %v23288_v48 }
 0x4b1   : > { %v17356_v2 = vadd.f32 %v17355_v16, %v17354_v9  ;;  %v23703_v16 = vld [vmem:[#allocation2 + $0xd8] sm:$0xff]  ;;  %24783 = vst [vmem:[#allocation17_spill] sm:$0xff] %v23707_v0  ;;  %v17300_v33 = vmul.f32 %v23707_v0, %v23673_v28  ;;  %v17361_v19 = vsel %vm179_vm1, %v17298_v29, 0.0  ;;  %v23785_v49 = vrot.slane %v23459_v17, %v23288_v48 }
 0x4b2   : > { %v17411_v50 = vadd.f32 %v17410_v43, %v17409_v25  ;;  %v17291_v6 = vmul.f32 %v23703_v16, %v23605_v61  ;;  %v23721_v43 = vld [vmem:[#allocation2 + $0x130] sm:$0xff]  ;;  %v17414_v60 = vsel %vm179_vm1, %v17289_v53, 0.0  ;;  %v23799_v17 = vrot.slane %v23465_v23, %v23288_v48 }
 0x4b3   : > { %v17358_v9 = vadd.f32 %v17357_v8, %v17356_v2  ;;  %v23717_v8 = vld [vmem:[#allocation2 + $0xe8] sm:$0xff]  ;;  %24784 = vst [vmem:[#allocation18_spill] sm:$0xff] %v23721_v43  ;;  %v17302_v0 = vmul.f32 %v23721_v43, %v23687_v10  ;;  %v17363_v29 = vsel %vm179_vm1, %v17300_v33, 0.0  ;;  %v23813_v23 = vrot.slane %v23468_v20, %v23288_v48 }
 0x4b4   : > { %v17413_v25 = vadd.f32 %v17412_v21, %v17411_v50  ;;  %v17293_v61 = vmul.f32 %v23717_v8, %v23618_v54  ;;  %v23735_v21 = vld [vmem:[#allocation2 + $0x140] sm:$0xff]  ;;  %v17416_v53 = vsel %vm179_vm1, %v17291_v6, 0.0  ;;  %v17255_v20 = vrot.slane %v23474_v40, %v23288_v48 }
 0x4b5   : > { %v17360_v2 = vadd.f32 %v17359_v36, %v17358_v9  ;;  %v23731_v36 = vld [vmem:[#allocation2 + $0xf8] sm:$0xff]  ;;  %24785 = vst [vmem:[#allocation19_spill] sm:$0xff] %v23735_v21  ;;  %v17304_v43 = vmul.f32 %v23735_v21, %v23701_v55  ;;  %v17365_v33 = vsel %vm179_vm1, %v17302_v0, 0.0  ;;  %20679 = vrcp.f32 %v23577_v62 }
 0x4b6   : > { %v17415_v50 = vadd.f32 %v17414_v60, %v17413_v25  ;;  %v17295_v54 = vmul.f32 %v23731_v36, %v23631_v58  ;;  %v23749_v60 = vld [vmem:[#allocation2 + $0x150] sm:$0xff]  ;;  %v17418_v6 = vsel %vm179_vm1, %v17293_v61, 0.0 }
 0x4b7   : > { %v17362_v9 = vadd.f32 %v17361_v19, %v17360_v2  ;;  %v23745_v19 = vld [vmem:[#allocation2 + $0x108] sm:$0xff]  ;;  %24786 = vst [vmem:[#allocation20_spill] sm:$0xff] %v23749_v60  ;;  %v17306_v21 = vmul.f32 %v23749_v60, %v23715_v34  ;;  %v17367_v0 = vsel %vm179_vm1, %v17304_v43, 0.0 }
 0x4b8   : > { %v17417_v25 = vadd.f32 %v17416_v53, %v17415_v50  ;;  %v17297_v58 = vmul.f32 %v23745_v19, %v23645_v26  ;;  %v23763_v53 = vld [vmem:[#allocation2 + $0x160] sm:$0xff]  ;;  %v17420_v61 = vsel %vm179_vm1, %v17295_v54, 0.0 }
 0x4b9   : > { %v17364_v2 = vadd.f32 %v17363_v29, %v17362_v9  ;;  %v23759_v29 = vld [vmem:[#allocation2 + $0x118] sm:$0xff]  ;;  %24787 = vst [vmem:[#allocation21_spill] sm:$0xff] %v23763_v53  ;;  %v17308_v60 = vmul.f32 %v23763_v53, %v23729_v35  ;;  %v17369_v43 = vsel %vm179_vm1, %v17306_v21, 0.0 }
 0x4ba   : > { %v17419_v50 = vadd.f32 %v17418_v6, %v17417_v25  ;;  %v17299_v26 = vmul.f32 %v23759_v29, %v23659_v47  ;;  %v23777_v6 = vld [vmem:[#allocation2 + $0x170] sm:$0xff]  ;;  %v17422_v54 = vsel %vm179_vm1, %v17297_v58, 0.0 }
 0x4bb   : > { %v17366_v9 = vadd.f32 %v17365_v33, %v17364_v2  ;;  %v23773_v33 = vld [vmem:[#allocation2 + $0x128] sm:$0xff]  ;;  %24788 = vst [vmem:[#allocation22_spill] sm:$0xff] %v23777_v6  ;;  %v17310_v53 = vmul.f32 %v23777_v6, %v23743_v3  ;;  %v17371_v21 = vsel %vm179_vm1, %v17308_v60, 0.0 }
 0x4bc   : > { %v17421_v25 = vadd.f32 %v17420_v61, %v17419_v50  ;;  %v17301_v47 = vmul.f32 %v23773_v33, %v23673_v28  ;;  %v23791_v61 = vld [vmem:[#allocation2 + $0x180] sm:$0xff]  ;;  %v17424_v58 = vsel %vm179_vm1, %v17299_v26, 0.0 }
 0x4bd   : > { %v17368_v2 = vadd.f32 %v17367_v0, %v17366_v9  ;;  %v23787_v0 = vld [vmem:[#allocation2 + $0x138] sm:$0xff]  ;;  %24789 = vst [vmem:[#allocation23_spill] sm:$0xff] %v23791_v61  ;;  %v17312_v6 = vmul.f32 %v23791_v61, %v23757_v41  ;;  %v17373_v60 = vsel %vm179_vm1, %v17310_v53, 0.0 }
 0x4be   : > { %v17423_v50 = vadd.f32 %v17422_v54, %v17421_v25  ;;  %v17303_v28 = vmul.f32 %v23787_v0, %v23687_v10  ;;  %v23805_v54 = vld [vmem:[#allocation2 + $0x190] sm:$0xff]  ;;  %v17426_v26 = vsel %vm179_vm1, %v17301_v47, 0.0 }
 0x4bf   : > { %v17370_v9 = vadd.f32 %v17369_v43, %v17368_v2  ;;  %v23801_v43 = vld [vmem:[#allocation2 + $0x148] sm:$0xff]  ;;  %24791 = vst [vmem:[#allocation25_spill] sm:$0xff] %v23805_v54  ;;  %v17314_v61 = vmul.f32 %v23805_v54, %v23771_v22  ;;  %v17375_v53 = vsel %vm179_vm1, %v17312_v6, 0.0 }
 0x4c0   : > { %v17425_v25 = vadd.f32 %v17424_v58, %v17423_v50  ;;  %24790 = vst [vmem:[#allocation24_spill] sm:$0xff] %v23801_v43  ;;  %v17305_v10 = vmul.f32 %v23801_v43, %v23701_v55  ;;  %v23819_v58 = vld [vmem:[#allocation2 + $0x1a0] sm:$0xff]  ;;  %v17428_v47 = vsel %vm179_vm1, %v17303_v28, 0.0  ;;  %v17259_v28 = vrot.slane %v23478_v56, %v23288_v48 }
 0x4c1   : > { %v17372_v2 = vadd.f32 %v17371_v21, %v17370_v9  ;;  %v23815_v21 = vld [vmem:[#allocation2 + $0x158] sm:$0xff]  ;;  %24792 = vst [vmem:[#allocation26_spill] sm:$0xff] %v23819_v58  ;;  %v17316_v54 = vmul.f32 %v23819_v58, %v23785_v49  ;;  %v17377_v58 = vsel %vm179_vm1, %v17314_v61, 0.0 }
 0x4c2   : > { %v17427_v50 = vadd.f32 %v17426_v26, %v17425_v25  ;;  %v17307_v55 = vmul.f32 %v23815_v21, %v23715_v34  ;;  %v23827_v25 = vld [vmem:[#allocation2 + $0x168] sm:$0xff]  ;;  %v23831_v34 = vld [vmem:[#allocation2 + $0x1b0] sm:$0xff]  ;;  %v17430_v6 = vsel %vm179_vm1, %v17305_v10, 0.0  ;;  %v17263_v10 = vrot.slane %v23482_v5, %v23288_v48 }
 0x4c3   : > { %v17374_v9 = vadd.f32 %v17373_v60, %v17372_v2  ;;  %24793 = vst [vmem:[#allocation27_spill] sm:$0xff] %v23827_v25  ;;  %v17309_v60 = vmul.f32 %v23827_v25, %v23729_v35  ;;  %24794 = vst [vmem:[#allocation28_spill] sm:$0xff] %v23831_v34  ;;  %v17318_v26 = vmul.f32 %v23831_v34, %v23799_v17  ;;  %v23843_v35 = vld [vmem:[#allocation2 + $0x1c0] sm:$0xff]  ;;  %v17379_v34 = vsel %vm179_vm1, %v17316_v54, 0.0  ;;  %v23860_v25 = vld [vmem:[#allocation2 + $0x198] sm:$0xff] }
 0x4c4   : > { %v17429_v2 = vadd.f32 %v17428_v47, %v17427_v50  ;;  %v23839_v50 = vld [vmem:[#allocation2 + $0x178] sm:$0xff]  ;;  %24796 = vst [vmem:[#allocation30_spill] sm:$0xff] %v23843_v35  ;;  %v17320_v47 = vmul.f32 %v23843_v35, %v23813_v23  ;;  %v17432_v61 = vsel %vm179_vm1, %v17307_v55, 0.0  ;;  %24798 = vst [vmem:[#allocation32_spill] sm:$0xff] %v23860_v25  ;;  %v17315_v5 = vmul.f32 %v23860_v25, %v23771_v22 }
 0x4c5   : > { %v17376_v43 = vadd.f32 %v17375_v53, %v17374_v9  ;;  %24795 = vst [vmem:[#allocation29_spill] sm:$0xff] %v23839_v50  ;;  %v17311_v53 = vmul.f32 %v23839_v50, %v23743_v3  ;;  %v23855_v3 = vld [vmem:[#allocation2 + $0x1d0] sm:$0xff]  ;;  %v17381_v35 = vsel %vm179_vm1, %v17318_v26, 0.0  ;;  %v17434_v54 = vsel %vm179_vm1, %v17309_v60, 0.0  ;;  %v23869_v26 = vld [vmem:[#allocation2 + $0x1a8] sm:$0xff] }
 0x4c6   : > { %v17431_v9 = vadd.f32 %v17430_v6, %v17429_v2  ;;  %24797 = vst [vmem:[#allocation31_spill] sm:$0xff] %v23855_v3  ;;  %v17322_v6 = vmul.f32 %v23855_v3, %v17255_v20  ;;  %v17317_v60 = vmul.f32 %v23869_v26, %v23785_v49  ;;  %v17126_v25 = vld [vmem:[#allocation7] sm:$0xff]  ;;  %v17440_v49 = vsel %vm179_vm1, %v17315_v5, 0.0 }
 0x4c7   : > { %v17378_v40 = vadd.f32 %v17377_v58, %v17376_v43  ;;  %v23851_v58 = vld [vmem:[#allocation2 + $0x188] sm:$0xff] }
 0x4c8   : > { %v17433_v43 = vadd.f32 %v17432_v61, %v17431_v9  ;;  %v17313_v2 = vmul.f32 %v23851_v58, %v23757_v41  ;;  %v17383_v41 = vsel %vm179_vm1, %v17320_v47, 0.0  ;;  %v17436_v9 = vsel %vm179_vm1, %v17311_v53, 0.0  ;;  %v23877_v53 = vld [vmem:[#allocation2 + $0x1b8] sm:$0xff] }
 0x4c9   : > { %v17380_v56 = vadd.f32 %v17379_v34, %v17378_v40  ;;  %v23864_v34 = vld [vmem:[#allocation2 + $0x1e0] sm:$0xff] }
 0x4ca   : > { %v17435_v55 = vadd.f32 %v17434_v54, %v17433_v43  ;;  %24799 = vst [vmem:[#allocation33_spill] sm:$0xff] %v23864_v34  ;;  %v17324_v40 = vmul.f32 %v23864_v34, %v17259_v28  ;;  %v17385_v43 = vsel %vm179_vm1, %v17322_v6, 0.0  ;;  %v17438_v22 = vsel %vm179_vm1, %v17313_v2, 0.0  ;;  %v23883_v6 = vld [vmem:[#allocation2 + $0x1c8] sm:$0xff] }
 0x4cb   : > { %v17382_v50 = vadd.f32 %v17381_v35, %v17380_v56  ;;  %v20759_v35 = vld [vmem:[#allocation2 + $0x1f0] sm:$0xff]  ;;  %v17132_v54 = vrot.slane %v23498_v4, %v23288_v48  ;;  %v17321_v2 = vmul.f32 %v23883_v6, %v23813_v23 }
 0x4cc   : > { %v17437_v3 = vadd.f32 %v17436_v9, %v17435_v55  ;;  %v17326_v56 = vmul.f32 %v20759_v35, %v17263_v10  ;;  %v17387_v55 = vsel %vm179_vm1, %v17324_v40, 0.0  ;;  %v24821_v48 = vld [vmem:[#allocation25_spill] sm:$0xff] }
 0x4cd   : > { %v17384_v61 = vadd.f32 %v17383_v41, %v17382_v50  ;;  %v17319_v50 = vmul.f32 %v23877_v53, %v23799_v17  ;;  %v17446_v23 = vsel %vm179_vm1, %v17321_v2, 0.0 }
 0x4ce   : > { %v17439_v47 = vadd.f32 %v17438_v22, %v17437_v3  ;;  %v17389_v4 = vsel %vm179_vm1, %v17326_v56, 0.0  ;;  %v17442_v3 = vsel %vm179_vm1, %v17317_v60, 0.0  ;;  %v23889_v22 = vld [vmem:[#allocation2 + $0x1d8] sm:$0xff] }
 0x4cf   : > { %v17386_v34 = vadd.f32 %v17385_v43, %v17384_v61  ;;  %v17134_v61 = vmul.f32 %v17132_v54, %v17126_v25  ;;  %v17323_v17 = vmul.f32 %v23889_v22, %v17255_v20  ;;  %v17444_v5 = vsel %vm179_vm1, %v17319_v50, 0.0  ;;  %v23898_v25 = vld [vmem:[#allocation2 + $0x1f8] sm:$0xff] }
 0x4d0   : > { %v17441_v9 = vadd.f32 %v17440_v49, %v17439_v47  ;;  %v23893_v47 = vld [vmem:[#allocation2 + $0x1e8] sm:$0xff]  ;;  %v17327_v60 = vmul.f32 %v23898_v25, %v17263_v10  ;;  %v17127_v50 = vld [vmem:[#allocation7 + $0x8] sm:$0xff]  ;;  %v20680_v10 = vpop.eup %20679 }
 0x4d1   : > { %v17388_v41 = vadd.f32 %v17387_v55, %v17386_v34  ;;  %v17325_v55 = vmul.f32 %v23893_v47, %v17259_v28  ;;  %v17448_v49 = vsel %vm179_vm1, %v17323_v17, 0.0 }
 0x4d2   : > { %v17443_v43 = vadd.f32 %v17442_v3, %v17441_v9  ;;  %v17452_v28 = vsel %vm179_vm1, %v17327_v60, 0.0 }
 0x4d3   : > { %v17390_v35 = vadd.f32 %v17389_v4, %v17388_v41  ;;  %v17450_v41 = vsel %vm179_vm1, %v17325_v55, 0.0  ;;  %v17135_v4 = vmul.f32 %v17132_v54, %v17127_v50 }
 0x4d4   : > { %v17445_v34 = vadd.f32 %v17444_v5, %v17443_v43 }
 0x4d5   : > { %v17454_v40 = vadd.f32 %v17390_v35, %v17134_v61 }
 0x4d6   : > { %v17447_v56 = vadd.f32 %v17446_v23, %v17445_v34 }
 0x4d7   : > { %17456 = vst.msk [vmem:[#allocation7] sm:$0xff] %vm179_vm1, %v17454_v40 }
 0x4d8   : > { %v17449_v20 = vadd.f32 %v17448_v49, %v17447_v56 }
 0x4da   : > { %v17451_v9 = vadd.f32 %v17450_v41, %v17449_v20 }
 0x4dc   : > { %v17453_v2 = vadd.f32 %v17452_v28, %v17451_v9 }
 0x4de   : > { %v17459_v3 = vld [vmem:[#allocation7] sm:$0xff]  ;;  %v17455_v61 = vadd.f32 %v17453_v2, %v17135_v4 }
 0x4df   : > { %17492 = vst.msk [vmem:[#allocation7] sm:$0xff] %vm179_vm1, %v24775_v44  ;;  %v17469_v35 = vmul.f32 %v20680_v10, %v17459_v3 }
 0x4e0   : > { %17457 = vst.msk [vmem:[#allocation7 + $0x8] sm:$0xff] %vm179_vm1, %v17455_v61 }
 0x4e1   : > { %v17471_v43 = vmul.f32 %v17469_v35, %v17469_v35 }
 0x4e3   : > { %v17473_v34 = vsel %vm179_vm1, %v17471_v43, 0.0 }
 0x4e7   : > { %v17460_v62 = vld [vmem:[#allocation7 + $0x8] sm:$0xff] }
 0x4e8   : > { %v17470_v17 = vmul.f32 %v20680_v10, %v17460_v62  ;;  %17493 = vst.msk [vmem:[#allocation7 + $0x8] sm:$0xff] %vm179_vm1, %v24775_v44 }
 0x4ea   : > { %v17472_v5 = vmul.f32 %v17470_v17, %v17470_v17 }
 0x4ec   : > { %v17474_v54 = vsel %vm179_vm1, %v17472_v5, 0.0  ;;  %v24801_v5 = vld [vmem:[#allocation11_spill] sm:$0xff] }
 0x4ed   : > { %v17475_v40 = vadd.f32 %v17474_v54, %v17473_v34  ;;  %v24802_v54 = vld [vmem:[#allocation12_spill] sm:$0xff] }
 0x4ef   : > { %v17476_v55 = vrot.slane %v17475_v40, 4 }
 0x4f1   : > { %v17477_v23 = vadd.f32 %v17476_v55, %v17475_v40  ;;  %v24803_v55 = vld [vmem:[#allocation13_spill] sm:$0xff] }
 0x4f3   : > { %v17478_v56 = vrot.slane %v17477_v23, 2 }
 0x4f5   : > { %v17479_v60 = vadd.f32 %v17478_v56, %v17477_v23  ;;  %v24804_v23 = vld [vmem:[#allocation14_spill] sm:$0xff] }
 0x4f7   : > { %v17480_v49 = vrot.slane %v17479_v60, 1 }
 0x4f9   : > { %v17481_v20 = vadd.f32 %v17480_v49, %v17479_v60  ;;  %v24805_v60 = vld [vmem:[#allocation15_spill] sm:$0xff] }
 0x4fb   : > { %v17482_v50 = vadd.f32 1.0, %v17481_v20 }
 0x4fd   : > { %20681 = vrcp.f32 %v17482_v50 }
 0x4fe   : > { %20683 = vrsqrt.f32 %v17481_v20 }
 0x507   : > { %v20682_v41 = vpop.eup %20681 }
 0x508   : > { %v17484_v9 = vmul.f32 %v20682_v41, %v17481_v20  ;;  %v20684_v44 = vpop.eup %20683  ;;  %v24806_v20 = vld [vmem:[#allocation16_spill] sm:$0xff]  ;;  %v24807_v41 = vld [vmem:[#allocation17_spill] sm:$0xff] }
 0x50a   : > { %v17485_v28 = vmul.f32 %v17484_v9, %v17469_v35  ;;  %v17486_v4 = vmul.f32 %v17484_v9, %v17470_v17  ;;  %v24800_v17 = vld [vmem:[#allocation10_spill] sm:$0xff] }
 0x50c   : > { %v23912_v2 = vmul.f32 %v20684_v44, %v17485_v28  ;;  %v23914_v3 = vmul.f32 %v20684_v44, %v17486_v4  ;;  %v24808_v28 = vld [vmem:[#allocation18_spill] sm:$0xff]  ;;  %v24809_v44 = vld [vmem:[#allocation19_spill] sm:$0xff] }
 0x50e   : > { %v23918_v61 = vmul.f32 %v23502_v13, %v23912_v2  ;;  %v23922_v10 = vmul.f32 %v23534_v14, %v23914_v3  ;;  %v23926_v43 = vmul.f32 %v23505_v24, %v23912_v2  ;;  %v23930_v35 = vmul.f32 %v23541_v7, %v23914_v3 }
 0x50f   : > { %v23934_v62 = vmul.f32 %v23510_v59, %v23912_v2  ;;  %v23938_v13 = vmul.f32 %v23552_v11, %v23914_v3  ;;  %v23942_v14 = vmul.f32 %v23516_v45, %v23912_v2  ;;  %v23946_v24 = vmul.f32 %v23564_v31, %v23914_v3 }
 0x510   : > { %v23950_v7 = vmul.f32 %v23523_v52, %v23912_v2  ;;  %v23954_v59 = vmul.f32 %v23579_v57, %v23914_v3  ;;  %v23958_v11 = vmul.f32 %v23530_v1, %v23912_v2  ;;  %v23962_v45 = vmul.f32 %v23594_v18, %v23914_v3 }
 0x511   : > { %v23966_v31 = vmul.f32 %v23544_v32, %v23912_v2  ;;  %v23970_v52 = vmul.f32 %v23607_v27, %v23914_v3  ;;  %v23974_v57 = vmul.f32 %v23555_v42, %v23912_v2  ;;  %v23978_v1 = vmul.f32 %v23620_v30, %v23914_v3 }
 0x512   : > { %v23982_v18 = vmul.f32 %v23567_v39, %v23912_v2  ;;  %v23986_v32 = vmul.f32 %v23633_v12, %v23914_v3  ;;  %v23990_v27 = vmul.f32 %v23582_v37, %v23912_v2  ;;  %v23994_v42 = vmul.f32 %v23647_v46, %v23914_v3 }
 0x513   : > { %v23998_v30 = vmul.f32 %v24800_v17, %v23912_v2  ;;  %v24002_v39 = vmul.f32 %v23661_v51, %v23914_v3  ;;  %v24006_v12 = vmul.f32 %v24801_v5, %v23912_v2  ;;  %v24010_v37 = vmul.f32 %v23675_v38, %v23914_v3  ;;  %v24810_v17 = vld [vmem:[#allocation24_spill] sm:$0xff] }
 0x514   : > { %v24014_v46 = vmul.f32 %v23623_v15, %v23912_v2  ;;  %v24018_v34 = vmul.f32 %v23689_v63, %v23914_v3  ;;  %v24022_v51 = vmul.f32 %v24802_v54, %v23912_v2  ;;  %v24026_v40 = vmul.f32 %v23703_v16, %v23914_v3  ;;  %v24811_v54 = vld [vmem:[#allocation20_spill] sm:$0xff] }
 0x515   : > { %v24030_v38 = vmul.f32 %v24803_v55, %v23912_v2  ;;  %v24034_v15 = vmul.f32 %v23717_v8, %v23914_v3  ;;  %v24038_v63 = vmul.f32 %v24804_v23, %v23912_v2  ;;  %v24042_v56 = vmul.f32 %v23731_v36, %v23914_v3  ;;  %v24812_v23 = vld [vmem:[#allocation21_spill] sm:$0xff] }
 0x516   : > { %v24046_v16 = vmul.f32 %v24805_v60, %v23912_v2  ;;  %v24050_v49 = vmul.f32 %v23745_v19, %v23914_v3  ;;  %v24054_v8 = vmul.f32 %v24806_v20, %v23912_v2  ;;  %v24058_v50 = vmul.f32 %v23759_v29, %v23914_v3  ;;  %v24813_v60 = vld [vmem:[#allocation27_spill] sm:$0xff] }
 0x517   : > { %v24062_v36 = vmul.f32 %v24807_v41, %v23912_v2  ;;  %v24066_v9 = vmul.f32 %v23773_v33, %v23914_v3  ;;  %v24070_v19 = vmul.f32 %v24808_v28, %v23912_v2  ;;  %v24074_v4 = vmul.f32 %v23787_v0, %v23914_v3  ;;  %v24815_v41 = vld [vmem:[#allocation22_spill] sm:$0xff] }
 0x518   : > { %v24078_v29 = vmul.f32 %v24809_v44, %v23912_v2  ;;  %v24082_v5 = vmul.f32 %v24810_v17, %v23914_v3  ;;  %v24086_v33 = vmul.f32 %v24811_v54, %v23912_v2  ;;  %v24090_v55 = vmul.f32 %v23815_v21, %v23914_v3  ;;  %v24817_v44 = vld [vmem:[#allocation29_spill] sm:$0xff]  ;;  %v24818_v54 = vld [vmem:[#allocation23_spill] sm:$0xff] }
 0x519   : > { %v24094_v0 = vmul.f32 %v24812_v23, %v23912_v2  ;;  %v24098_v20 = vmul.f32 %v24813_v60, %v23914_v3  ;;  %v24102_v28 = vmul.f32 %v24815_v41, %v23912_v2  ;;  %v24106_v17 = vmul.f32 %v24817_v44, %v23914_v3 }
 0x51a   : > { %v24110_v21 = vmul.f32 %v24818_v54, %v23912_v2  ;;  %v24114_v23 = vmul.f32 %v23851_v58, %v23914_v3  ;;  %v24118_v60 = vmul.f32 %v24821_v48, %v23912_v2  ;;  %v24130_v54 = vmul.f32 %v23869_v26, %v23914_v3  ;;  %v24833_v26 = vld [vmem:[#allocation31_spill] sm:$0xff] }
 0x51b   : > { %24814 = vst [vmem:[#allocation10_spill] sm:$0xff] %v24098_v20  ;;  %24816 = vst [vmem:[#allocation11_spill] sm:$0xff] %v24102_v28  ;;  %v24822_v20 = vld [vmem:[#allocation32_spill] sm:$0xff]  ;;  %v24824_v28 = vld [vmem:[#allocation26_spill] sm:$0xff]  ;;  %v24138_v48 = vmul.f32 %v23877_v53, %v23914_v3 }
 0x51c   : > { %24819 = vst [vmem:[#allocation12_spill] sm:$0xff] %v24110_v21  ;;  %24820 = vst [vmem:[#allocation13_spill] sm:$0xff] %v24114_v23  ;;  %v24122_v41 = vmul.f32 %v24822_v20, %v23914_v3  ;;  %v24126_v44 = vmul.f32 %v24824_v28, %v23912_v2  ;;  %v24827_v21 = vld [vmem:[#allocation28_spill] sm:$0xff]  ;;  %v17556_v23 = vld [vmem:[#allocation2 + $0x1f0] sm:$0xff]  ;;  %v24146_v28 = vmul.f32 %v23883_v6, %v23914_v3  ;;  %v17622_v6 = vsel %vm179_vm1, %v23918_v61, 0.0 }
 0x51d   : > { %24826 = vst [vmem:[#allocation16_spill] sm:$0xff] %v24130_v54  ;;  %v24134_v58 = vmul.f32 %v24827_v21, %v23912_v2  ;;  %24829 = vst [vmem:[#allocation18_spill] sm:$0xff] %v24138_v48  ;;  %v24830_v20 = vld [vmem:[#allocation30_spill] sm:$0xff]  ;;  %v24150_v54 = vmul.f32 %v24833_v26, %v23912_v2  ;;  %v24154_v21 = vmul.f32 %v23889_v22, %v23914_v3  ;;  %v17623_v26 = vsel %vm179_vm1, %v23922_v10, 0.0 }
 0x51e   : > { %24823 = vst [vmem:[#allocation14_spill] sm:$0xff] %v24122_v41  ;;  %24825 = vst [vmem:[#allocation15_spill] sm:$0xff] %v24126_v44  ;;  %v24142_v41 = vmul.f32 %v24830_v20, %v23912_v2  ;;  %v24162_v20 = vmul.f32 %v23893_v47, %v23914_v3  ;;  %v17631_v22 = vsel %vm179_vm1, %v23926_v43, 0.0  ;;  %v17640_v47 = vsel %vm179_vm1, %v23934_v62, 0.0 }
 0x51f   : > { %24828 = vst [vmem:[#allocation17_spill] sm:$0xff] %v24134_v58  ;;  %24832 = vst [vmem:[#allocation24_spill] sm:$0xff] %v24146_v28  ;;  %v24836_v58 = vld [vmem:[#allocation33_spill] sm:$0xff]  ;;  %v17649_v61 = vsel %vm179_vm1, %v23942_v14, 0.0  ;;  %v17650_v10 = vsel %vm179_vm1, %v23946_v24, 0.0  ;;  %v17658_v43 = vsel %vm179_vm1, %v23950_v7, 0.0 }
 0x520   : > { %24831 = vst [vmem:[#allocation19_spill] sm:$0xff] %v24142_v41  ;;  %24834 = vst [vmem:[#allocation20_spill] sm:$0xff] %v24150_v54  ;;  %v24158_v53 = vmul.f32 %v24836_v58, %v23912_v2  ;;  %v24165_v41 = vmul.f32 %v17556_v23, %v23912_v2  ;;  %v17632_v58 = vsel %vm179_vm1, %v23930_v35, 0.0  ;;  %v17641_v2 = vsel %vm179_vm1, %v23938_v13, 0.0 }
 0x521   : > { %24835 = vst [vmem:[#allocation21_spill] sm:$0xff] %v24154_v21  ;;  %24838 = vst [vmem:[#allocation22_spill] sm:$0xff] %v24162_v20  ;;  %v17633_v21 = vadd.f32 %v17632_v58, %v17631_v22  ;;  %v17642_v23 = vadd.f32 %v17641_v2, %v17640_v47  ;;  %v17667_v13 = vsel %vm179_vm1, %v23958_v11, 0.0  ;;  %v17668_v14 = vsel %vm179_vm1, %v23962_v45, 0.0 }
 0x522   : > { %24837 = vst [vmem:[#allocation27_spill] sm:$0xff] %v24158_v53  ;;  %24839 = vst [vmem:[#allocation29_spill] sm:$0xff] %v24165_v41  ;;  %v17624_v53 = vadd.f32 %v17623_v26, %v17622_v6  ;;  %v17651_v6 = vadd.f32 %v17650_v10, %v17649_v61  ;;  %v17659_v26 = vsel %vm179_vm1, %v23954_v59, 0.0  ;;  %v17669_v2 = vadd.f32 %v17668_v14, %v17667_v13 }
 0x523   : > { %v17634_v35 = vrot.slane %v17633_v21, 4  ;;  %v17643_v62 = vrot.slane %v17642_v23, 4  ;;  %v17660_v22 = vadd.f32 %v17659_v26, %v17658_v43  ;;  %v17676_v61 = vsel %vm179_vm1, %v23966_v31, 0.0 }
 0x524   : > { %v17625_v41 = vrot.slane %v17624_v53, 4  ;;  %v17652_v24 = vrot.slane %v17651_v6, 4  ;;  %v17677_v59 = vsel %vm179_vm1, %v23970_v52, 0.0  ;;  %v17670_v54 = vrot.slane %v17669_v2, 4 }
 0x525   : > { %v17635_v47 = vadd.f32 %v17634_v35, %v17633_v21  ;;  %v17644_v20 = vadd.f32 %v17643_v62, %v17642_v23  ;;  %v17661_v7 = vrot.slane %v17660_v22, 4  ;;  %v17678_v48 = vadd.f32 %v17677_v59, %v17676_v61 }
 0x526   : > { %v17626_v58 = vadd.f32 %v17625_v41, %v17624_v53  ;;  %v17653_v26 = vadd.f32 %v17652_v24, %v17651_v6  ;;  %v17685_v45 = vsel %vm179_vm1, %v23974_v57, 0.0  ;;  %v17671_v23 = vadd.f32 %v17670_v54, %v17669_v2 }
 0x527   : > { %v17636_v43 = vrot.slane %v17635_v47, 2  ;;  %v17645_v11 = vrot.slane %v17644_v20, 2  ;;  %v17662_v28 = vadd.f32 %v17661_v7, %v17660_v22  ;;  %v17679_v31 = vrot.slane %v17678_v48, 4 }
 0x528   : > { %v17627_v10 = vrot.slane %v17626_v58, 2  ;;  %v17654_v53 = vrot.slane %v17653_v26, 2  ;;  %v17686_v52 = vsel %vm179_vm1, %v23978_v1, 0.0  ;;  %v17672_v24 = vrot.slane %v17671_v23, 2 }
 0x529   : > { %v17637_v21 = vadd.f32 %v17636_v43, %v17635_v47  ;;  %v17646_v35 = vadd.f32 %v17645_v11, %v17644_v20  ;;  %v17663_v62 = vrot.slane %v17662_v28, 2  ;;  %v17680_v7 = vadd.f32 %v17679_v31, %v17678_v48 }
 0x52a   : > { %v17628_v41 = vadd.f32 %v17627_v10, %v17626_v58  ;;  %v17655_v6 = vadd.f32 %v17654_v53, %v17653_v26  ;;  %v17687_v61 = vadd.f32 %v17686_v52, %v17685_v45  ;;  %v24201_v57 = vmul.f32 %v23898_v25, %v23914_v3 }
 0x52b   : > { %v17638_v14 = vrot.slane %v17637_v21, 1  ;;  %v17647_v44 = vrot.slane %v17646_v35, 1  ;;  %v17664_v22 = vadd.f32 %v17663_v62, %v17662_v28  ;;  %v17673_v20 = vadd.f32 %v17672_v24, %v17671_v23 }
 0x52c   : > { %v17629_v13 = vrot.slane %v17628_v41, 1  ;;  %v17656_v54 = vrot.slane %v17655_v6, 1  ;;  %v17681_v1 = vrot.slane %v17680_v7, 2  ;;  %v17688_v59 = vrot.slane %v17687_v61, 4 }
 0x52d   : > { %v24205_v47 = vadd.f32 %v17638_v14, %v17637_v21  ;;  %v17665_v2 = vrot.slane %v17664_v22, 1  ;;  %v24207_v10 = vadd.f32 %v17647_v44, %v17646_v35  ;;  %v17694_v48 = vsel %vm179_vm1, %v23982_v18, 0.0 }
 0x52e   : > { %v24203_v58 = vadd.f32 %v17629_v13, %v17628_v41  ;;  %v24209_v43 = vadd.f32 %v17656_v54, %v17655_v6  ;;  %v17695_v25 = vsel %vm179_vm1, %v23986_v32, 0.0  ;;  %v17674_v3 = vrot.slane %v17673_v20, 1 }
 0x52f   : > { %v17682_v28 = vadd.f32 %v17681_v1, %v17680_v7  ;;  %v17689_v26 = vadd.f32 %v17688_v59, %v17687_v61  ;;  %v17696_v11 = vadd.f32 %v17695_v25, %v17694_v48  ;;  %v24215_v45 = vadd.f32 %v17665_v2, %v17664_v22 }
 0x530   : > { %v17703_v41 = vsel %vm179_vm1, %v23990_v27, 0.0  ;;  %v17704_v44 = vsel %vm179_vm1, %v23994_v42, 0.0  ;;  %v17712_v21 = vsel %vm179_vm1, %v23998_v30, 0.0  ;;  %v17713_v32 = vsel %vm179_vm1, %v24002_v39, 0.0 }
 0x531   : > { %v17683_v53 = vrot.slane %v17682_v28, 1  ;;  %v17690_v18 = vrot.slane %v17689_v26, 2  ;;  %v17697_v23 = vrot.slane %v17696_v11, 4  ;;  %v17705_v35 = vadd.f32 %v17704_v44, %v17703_v41 }
 0x532   : > { %v17721_v62 = vsel %vm179_vm1, %v24006_v12, 0.0  ;;  %v17722_v31 = vsel %vm179_vm1, %v24010_v37, 0.0  ;;  %v17730_v27 = vsel %vm179_vm1, %v24014_v46, 0.0  ;;  %v24231_v42 = vadd.f32 %v17674_v3, %v17673_v20 }
 0x533   : > { %v17691_v52 = vadd.f32 %v17690_v18, %v17689_v26  ;;  %v17698_v30 = vadd.f32 %v17697_v23, %v17696_v11  ;;  %v17706_v13 = vrot.slane %v17705_v35, 4  ;;  %v24233_v14 = vadd.f32 %v17683_v53, %v17682_v28 }
 0x534   : > { %v17714_v6 = vadd.f32 %v17713_v32, %v17712_v21  ;;  %v17723_v24 = vadd.f32 %v17722_v31, %v17721_v62  ;;  %v17731_v39 = vsel %vm179_vm1, %v24018_v34, 0.0  ;;  %v17739_v37 = vsel %vm179_vm1, %v24022_v51, 0.0 }
 0x535   : > { %v17699_v22 = vrot.slane %v17698_v30, 2  ;;  %v17707_v12 = vadd.f32 %v17706_v13, %v17705_v35  ;;  %v17732_v7 = vadd.f32 %v17731_v39, %v17730_v27  ;;  %v17740_v54 = vsel %vm179_vm1, %v24026_v40, 0.0 }
 0x536   : > { %v17715_v61 = vrot.slane %v17714_v6, 4  ;;  %v17724_v46 = vrot.slane %v17723_v24, 4  ;;  %v17748_v20 = vsel %vm179_vm1, %v24030_v38, 0.0  ;;  %v17692_v2 = vrot.slane %v17691_v52, 1 }
 0x537   : > { %v17700_v1 = vadd.f32 %v17699_v22, %v17698_v30  ;;  %v17708_v59 = vrot.slane %v17707_v12, 2  ;;  %v17733_v48 = vrot.slane %v17732_v7, 4  ;;  %v17741_v3 = vadd.f32 %v17740_v54, %v17739_v37 }
 0x538   : > { %v17716_v25 = vadd.f32 %v17715_v61, %v17714_v6  ;;  %v17725_v34 = vadd.f32 %v17724_v46, %v17723_v24  ;;  %v17749_v28 = vsel %vm179_vm1, %v24034_v15, 0.0  ;;  %v17757_v38 = vsel %vm179_vm1, %v24038_v63, 0.0 }
 0x539   : > { %v17701_v26 = vrot.slane %v17700_v1, 1  ;;  %v17709_v51 = vadd.f32 %v17708_v59, %v17707_v12  ;;  %v17734_v11 = vadd.f32 %v17733_v48, %v17732_v7  ;;  %v17750_v41 = vadd.f32 %v17749_v28, %v17748_v20 }
 0x53a   : > { %v17717_v44 = vrot.slane %v17716_v25, 2  ;;  %v17726_v21 = vrot.slane %v17725_v34, 2  ;;  %v17742_v40 = vrot.slane %v17741_v3, 4  ;;  %v24247_v53 = vadd.f32 %v17692_v2, %v17691_v52 }
 0x53b   : > { %v17710_v18 = vrot.slane %v17709_v51, 1  ;;  %v17735_v23 = vrot.slane %v17734_v11, 2  ;;  %v17751_v35 = vrot.slane %v17750_v41, 4  ;;  %v17758_v15 = vsel %vm179_vm1, %v24042_v56, 0.0 }
 0x53c   : > { %v17718_v32 = vadd.f32 %v17717_v44, %v17716_v25  ;;  %v17727_v62 = vadd.f32 %v17726_v21, %v17725_v34  ;;  %v17743_v31 = vadd.f32 %v17742_v40, %v17741_v3  ;;  %v24251_v27 = vadd.f32 %v17701_v26, %v17700_v1 }
 0x53d   : > { %v17736_v30 = vadd.f32 %v17735_v23, %v17734_v11  ;;  %v17752_v13 = vadd.f32 %v17751_v35, %v17750_v41  ;;  %v17759_v6 = vadd.f32 %v17758_v15, %v17757_v38  ;;  %v17766_v63 = vsel %vm179_vm1, %v24046_v16, 0.0 }
 0x53e   : > { %v17719_v24 = vrot.slane %v17718_v32, 1  ;;  %v17728_v39 = vrot.slane %v17727_v62, 1  ;;  %v17744_v22 = vrot.slane %v17743_v31, 2  ;;  %v17767_v37 = vsel %vm179_vm1, %v24050_v49, 0.0 }
 0x53f   : > { %v17737_v52 = vrot.slane %v17736_v30, 1  ;;  %v17753_v12 = vrot.slane %v17752_v13, 2  ;;  %v17760_v7 = vrot.slane %v17759_v6, 4  ;;  %v24257_v61 = vadd.f32 %v17710_v18, %v17709_v51 }
 0x540   : > { %v24259_v56 = vadd.f32 %v17719_v24, %v17718_v32  ;;  %v17745_v46 = vadd.f32 %v17744_v22, %v17743_v31  ;;  %v17768_v54 = vadd.f32 %v17767_v37, %v17766_v63  ;;  %v24261_v20 = vadd.f32 %v17728_v39, %v17727_v62 }
 0x541   : > { %v17754_v2 = vadd.f32 %v17753_v12, %v17752_v13  ;;  %v17761_v1 = vadd.f32 %v17760_v7, %v17759_v6  ;;  %v17775_v59 = vsel %vm179_vm1, %v24054_v8, 0.0  ;;  %v17776_v25 = vsel %vm179_vm1, %v24058_v50, 0.0  ;;  %v24841_v7 = vld [vmem:[#allocation11_spill] sm:$0xff] }
 0x542   : > { %v17746_v16 = vrot.slane %v17745_v46, 1  ;;  %v17769_v48 = vrot.slane %v17768_v54, 4  ;;  %v17784_v49 = vsel %vm179_vm1, %v24062_v36, 0.0  ;;  %v24269_v34 = vadd.f32 %v17737_v52, %v17736_v30 }
 0x543   : > { %v17762_v3 = vrot.slane %v17761_v1, 2  ;;  %v17777_v28 = vadd.f32 %v17776_v25, %v17775_v59  ;;  %v17785_v26 = vsel %vm179_vm1, %v24066_v9, 0.0  ;;  %v17755_v51 = vrot.slane %v17754_v2, 1 }
 0x544   : > { %v17770_v11 = vadd.f32 %v17769_v48, %v17768_v54  ;;  %v17786_v41 = vadd.f32 %v17785_v26, %v17784_v49  ;;  %v17793_v8 = vsel %vm179_vm1, %v24070_v19, 0.0  ;;  %v24275_v44 = vadd.f32 %v17746_v16, %v17745_v46 }
 0x545   : > { %v17763_v21 = vadd.f32 %v17762_v3, %v17761_v1  ;;  %v17778_v50 = vrot.slane %v17777_v28, 4  ;;  %v17794_v36 = vsel %vm179_vm1, %v24074_v4, 0.0  ;;  %v17802_v23 = vsel %vm179_vm1, %v24078_v29, 0.0 }
 0x546   : > { %v17771_v40 = vrot.slane %v17770_v11, 2  ;;  %v17787_v38 = vrot.slane %v17786_v41, 4  ;;  %v17795_v18 = vadd.f32 %v17794_v36, %v17793_v8  ;;  %v17803_v32 = vsel %vm179_vm1, %v24082_v5, 0.0 }
 0x547   : > { %v17764_v9 = vrot.slane %v17763_v21, 1  ;;  %v17779_v35 = vadd.f32 %v17778_v50, %v17777_v28  ;;  %v17811_v19 = vsel %vm179_vm1, %v24086_v33, 0.0  ;;  %v17804_v30 = vadd.f32 %v17803_v32, %v17802_v23  ;;  %v24840_v33 = vld [vmem:[#allocation10_spill] sm:$0xff] }
 0x548   : > { %v17772_v62 = vadd.f32 %v17771_v40, %v17770_v11  ;;  %v17788_v31 = vadd.f32 %v17787_v38, %v17786_v41  ;;  %v17796_v15 = vrot.slane %v17795_v18, 4  ;;  %v24285_v13 = vadd.f32 %v17755_v51, %v17754_v2  ;;  %v24842_v11 = vld [vmem:[#allocation12_spill] sm:$0xff] }
 0x549   : > { %v17780_v4 = vrot.slane %v17779_v35, 2  ;;  %v17812_v6 = vsel %vm179_vm1, %v24090_v55, 0.0  ;;  %v17820_v29 = vsel %vm179_vm1, %v24094_v0, 0.0  ;;  %v17805_v5 = vrot.slane %v17804_v30, 4 }
 0x54a   : > { %v17773_v24 = vrot.slane %v17772_v62, 1  ;;  %v17789_v39 = vrot.slane %v17788_v31, 2  ;;  %v17797_v22 = vadd.f32 %v17796_v15, %v17795_v18  ;;  %v17813_v52 = vadd.f32 %v17812_v6, %v17811_v19  ;;  %v24843_v18 = vld [vmem:[#allocation13_spill] sm:$0xff]  ;;  %v24844_v15 = vld [vmem:[#allocation14_spill] sm:$0xff] }
 0x54b   : > { %v17781_v63 = vadd.f32 %v17780_v4, %v17779_v35  ;;  %v17821_v12 = vsel %vm179_vm1, %v24840_v33, 0.0  ;;  %v17829_v37 = vsel %vm179_vm1, %v24841_v7, 0.0  ;;  %v24295_v46 = vadd.f32 %v17764_v9, %v17763_v21  ;;  %v24845_v4 = vld [vmem:[#allocation15_spill] sm:$0xff]  ;;  %v24847_v33 = vld [vmem:[#allocation17_spill] sm:$0xff] }
 0x54c   : > { %v17790_v54 = vadd.f32 %v17789_v39, %v17788_v31  ;;  %v17798_v2 = vrot.slane %v17797_v22, 2  ;;  %v17806_v55 = vadd.f32 %v17805_v5, %v17804_v30  ;;  %v17814_v59 = vrot.slane %v17813_v52, 4 }
 0x54d   : > { %v17782_v1 = vrot.slane %v17781_v63, 1  ;;  %v17822_v0 = vadd.f32 %v17821_v12, %v17820_v29  ;;  %v17830_v16 = vsel %vm179_vm1, %v24106_v17, 0.0  ;;  %v24299_v28 = vadd.f32 %v17773_v24, %v17772_v62 }
 0x54e   : > { %v17791_v48 = vrot.slane %v17790_v54, 1  ;;  %v17799_v25 = vadd.f32 %v17798_v2, %v17797_v22  ;;  %v17807_v49 = vrot.slane %v17806_v55, 2  ;;  %v17831_v3 = vadd.f32 %v17830_v16, %v17829_v37 }
 0x54f   : > { %v17815_v26 = vadd.f32 %v17814_v59, %v17813_v52  ;;  %v17823_v51 = vrot.slane %v17822_v0, 4  ;;  %v17838_v41 = vsel %vm179_vm1, %v24842_v11, 0.0  ;;  %v24303_v8 = vadd.f32 %v17782_v1, %v17781_v63  ;;  %v24846_v63 = vld [vmem:[#allocation16_spill] sm:$0xff] }
 0x550   : > { %v17800_v21 = vrot.slane %v17799_v25, 1  ;;  %v17808_v50 = vadd.f32 %v17807_v49, %v17806_v55  ;;  %v17832_v36 = vrot.slane %v17831_v3, 4  ;;  %v17839_v17 = vsel %vm179_vm1, %v24843_v18, 0.0 }
 0x551   : > { %v17816_v40 = vrot.slane %v17815_v26, 2  ;;  %v17824_v38 = vadd.f32 %v17823_v51, %v17822_v0  ;;  %v17847_v23 = vsel %vm179_vm1, %v24118_v60, 0.0  ;;  %v24309_v9 = vadd.f32 %v17791_v48, %v17790_v54  ;;  %v24848_v0 = vld [vmem:[#allocation18_spill] sm:$0xff] }
 0x552   : > { %v17809_v35 = vrot.slane %v17808_v50, 1  ;;  %v17833_v32 = vadd.f32 %v17832_v36, %v17831_v3  ;;  %v17840_v19 = vadd.f32 %v17839_v17, %v17838_v41  ;;  %v17848_v30 = vsel %vm179_vm1, %v24844_v15, 0.0  ;;  %v24849_v3 = vld [vmem:[#allocation19_spill] sm:$0xff]  ;;  %v24850_v41 = vld [vmem:[#allocation24_spill] sm:$0xff] }
 0x553   : > { %v17817_v62 = vadd.f32 %v17816_v40, %v17815_v26  ;;  %v17825_v31 = vrot.slane %v17824_v38, 2  ;;  %v17856_v6 = vsel %vm179_vm1, %v24845_v4, 0.0  ;;  %v24315_v29 = vadd.f32 %v17800_v21, %v17799_v25  ;;  %v24851_v36 = vld [vmem:[#allocation20_spill] sm:$0xff] }
 0x554   : > { %v17834_v24 = vrot.slane %v17833_v32, 2  ;;  %v17841_v39 = vrot.slane %v17840_v19, 4  ;;  %v17849_v22 = vadd.f32 %v17848_v30, %v17847_v23  ;;  %v17857_v52 = vsel %vm179_vm1, %v24846_v63, 0.0 }
 0x555   : > { %v17818_v5 = vrot.slane %v17817_v62, 1  ;;  %v17826_v60 = vadd.f32 %v17825_v31, %v17824_v38  ;;  %v17865_v12 = vsel %vm179_vm1, %v24847_v33, 0.0  ;;  %v17858_v2 = vadd.f32 %v17857_v52, %v17856_v6 }
 0x556   : > { %v17835_v7 = vadd.f32 %v17834_v24, %v17833_v32  ;;  %v17842_v37 = vadd.f32 %v17841_v39, %v17840_v19  ;;  %v17850_v54 = vrot.slane %v17849_v22, 4  ;;  %v24321_v55 = vadd.f32 %v17809_v35, %v17808_v50  ;;  %v24852_v32 = vld [vmem:[#allocation21_spill] sm:$0xff] }
 0x557   : > { %v24323_v1 = vadd.f32 %v17818_v5, %v17817_v62  ;;  %v17827_v59 = vrot.slane %v17826_v60, 1  ;;  %v17866_v16 = vsel %vm179_vm1, %v24848_v0, 0.0  ;;  %v17859_v49 = vrot.slane %v17858_v2, 4  ;;  %v24853_v62 = vld [vmem:[#allocation27_spill] sm:$0xff] }
 0x558   : > { %v17843_v48 = vrot.slane %v17842_v37, 2  ;;  %v17851_v25 = vadd.f32 %v17850_v54, %v17849_v22  ;;  %v17874_v26 = vsel %vm179_vm1, %v24849_v3, 0.0  ;;  %v17836_v51 = vrot.slane %v17835_v7, 1  ;;  %v24854_v22 = vld [vmem:[#allocation22_spill] sm:$0xff] }
 0x559   : > { %v17867_v11 = vadd.f32 %v17866_v16, %v17865_v12  ;;  %v17875_v21 = vsel %vm179_vm1, %v24850_v41, 0.0  ;;  %v17883_v50 = vsel %vm179_vm1, %v24851_v36, 0.0  ;;  %v24333_v40 = vadd.f32 %v17827_v59, %v17826_v60  ;;  %v24855_v60 = vld [vmem:[#allocation29_spill] sm:$0xff] }
 0x55a   : > { %v17844_v38 = vadd.f32 %v17843_v48, %v17842_v37  ;;  %v17852_v18 = vrot.slane %v17851_v25, 2  ;;  %v17860_v17 = vadd.f32 %v17859_v49, %v17858_v2  ;;  %v17876_v35 = vadd.f32 %v17875_v21, %v17874_v26 }
 0x55b   : > { %v17868_v23 = vrot.slane %v17867_v11, 4  ;;  %v17884_v19 = vsel %vm179_vm1, %v24852_v32, 0.0  ;;  %v17892_v31 = vsel %vm179_vm1, %v24853_v62, 0.0  ;;  %v17893_v5 = vsel %vm179_vm1, %v24854_v22, 0.0 }
 0x55c   : > { %v17845_v15 = vrot.slane %v17844_v38, 1  ;;  %v17853_v30 = vadd.f32 %v17852_v18, %v17851_v25  ;;  %v17861_v4 = vrot.slane %v17860_v17, 2  ;;  %v17885_v6 = vadd.f32 %v17884_v19, %v17883_v50 }
 0x55d   : > { %v17869_v24 = vadd.f32 %v17868_v23, %v17867_v11  ;;  %v17877_v39 = vrot.slane %v17876_v35, 4  ;;  %v17901_v63 = vsel %vm179_vm1, %v24855_v60, 0.0  ;;  %v24343_v52 = vadd.f32 %v17836_v51, %v17835_v7 }
 0x55e   : > { %v17854_v33 = vrot.slane %v17853_v30, 1  ;;  %v17862_v12 = vadd.f32 %v17861_v4, %v17860_v17  ;;  %v17886_v37 = vrot.slane %v17885_v6, 4  ;;  %v17894_v59 = vadd.f32 %v17893_v5, %v17892_v31 }
 0x55f   : > { %v17870_v54 = vrot.slane %v17869_v24, 2  ;;  %v17878_v2 = vadd.f32 %v17877_v39, %v17876_v35  ;;  %v17902_v0 = vsel %vm179_vm1, %v24201_v57, 0.0  ;;  %v17846_v16 = vadd.f32 %v17845_v15, %v17844_v38 }
 0x560   : > { %v17863_v48 = vrot.slane %v17862_v12, 1  ;;  %v17887_v25 = vadd.f32 %v17886_v37, %v17885_v6  ;;  %v17903_v49 = vadd.f32 %v17902_v0, %v17901_v63  ;;  %v17895_v11 = vrot.slane %v17894_v59, 4 }
 0x561   : > { %v17871_v3 = vadd.f32 %v17870_v54, %v17869_v24  ;;  %v17879_v26 = vrot.slane %v17878_v2, 2  ;;  %v17946_v7 = vsel %vm16804_vm3, %v24205_v47, %v24203_v58  ;;  %v17855_v51 = vadd.f32 %v17854_v33, %v17853_v30  ;;  %v17911_v33 = vld [vmem:[#allocation4 + $0x8] sm:$0xff] }
 0x562   : > { %v17888_v41 = vrot.slane %v17887_v25, 2  ;;  %v17904_v21 = vrot.slane %v17903_v49, 4  ;;  %v17947_v36 = vsel %vm16806_vm4, %v24207_v10, %v17946_v7  ;;  %v17896_v57 = vadd.f32 %v17895_v11, %v17894_v59  ;;  %v17912_v59 = vld [vmem:[#allocation4 + $0x10] sm:$0xff] }
 0x563   : > { %v17872_v50 = vrot.slane %v17871_v3, 1  ;;  %v17880_v18 = vadd.f32 %v17879_v26, %v17878_v2  ;;  %v17948_v38 = vsel %vm16808_vm5, %v24209_v43, %v17947_v36  ;;  %v17953_v58 = vsel %vm16804_vm3, %v24257_v61, %v24251_v27 }
 0x564   : > { %v17889_v17 = vadd.f32 %v17888_v41, %v17887_v25  ;;  %v17905_v23 = vadd.f32 %v17904_v21, %v17903_v49  ;;  %v17949_v35 = vsel %vm16810_vm6, %v24215_v45, %v17948_v38  ;;  %v17864_v47 = vadd.f32 %v17863_v48, %v17862_v12  ;;  %v17913_v48 = vld [vmem:[#allocation4 + $0x18] sm:$0xff] }
 0x565   : > { %v17881_v32 = vrot.slane %v17880_v18, 1  ;;  %v17897_v19 = vrot.slane %v17896_v57, 2  ;;  %v17950_v10 = vsel %vm16812_vm7, %v24231_v42, %v17949_v35  ;;  %v17873_v62 = vadd.f32 %v17872_v50, %v17871_v3 }
 0x566   : > { %v17906_v31 = vrot.slane %v17905_v23, 2  ;;  %v17951_v43 = vsel %vm16814_vm8, %v24233_v14, %v17950_v10  ;;  %v17954_v15 = vsel %vm16806_vm4, %v24259_v56, %v17953_v58  ;;  %v17890_v30 = vrot.slane %v17889_v17, 1 }
 0x567   : > { %v17898_v45 = vadd.f32 %v17897_v19, %v17896_v57  ;;  %v17952_v4 = vsel %vm16816_vm9, %v24247_v53, %v17951_v43  ;;  %v17955_v27 = vsel %vm16808_vm5, %v24261_v20, %v17954_v15  ;;  %v17882_v61 = vadd.f32 %v17881_v32, %v17880_v18  ;;  %v17982_v18 = vld [vmem:[#allocation5] sm:$0x1] }
 0x568   : > { %v17907_v6 = vadd.f32 %v17906_v31, %v17905_v23  ;;  %v17956_v42 = vsel %vm16810_vm6, %v24269_v34, %v17955_v27  ;;  %v17960_v14 = vsel %vm16804_vm3, %v24303_v8, %v24299_v28  ;;  %v17967_v53 = vsel %vm16804_vm3, %v17855_v51, %v17846_v16  ;;  %v17910_v28 = vld [vmem:[#allocation4] sm:$0xff] }
 0x569   : > { %v17899_v24 = vrot.slane %v17898_v45, 1  ;;  %v17957_v56 = vsel %vm16812_vm7, %v24275_v44, %v17956_v42  ;;  %v17961_v39 = vsel %vm16806_vm4, %v24309_v9, %v17960_v14  ;;  %v17968_v5 = vsel %vm16806_vm4, %v17864_v47, %v17967_v53 }
 0x56a   : > { %v17908_v22 = vrot.slane %v17907_v6, 1  ;;  %v17958_v20 = vsel %vm16814_vm8, %v24285_v13, %v17957_v56  ;;  %v17962_v34 = vsel %vm16808_vm5, %v24315_v29, %v17961_v39  ;;  %v17891_v60 = vadd.f32 %v17890_v30, %v17889_v17  ;;  %v24856_v17 = vld [vmem:[#allocation9_spill] sm:$0xff] }
 0x56b   : > { %v17959_v8 = vsel %vm16816_vm9, %v24295_v46, %v17958_v20  ;;  %v17963_v44 = vsel %vm16810_vm6, %v24321_v55, %v17962_v34  ;;  %v17969_v9 = vsel %vm16808_vm5, %v17873_v62, %v17968_v5  ;;  %v17900_v63 = vadd.f32 %v17899_v24, %v17898_v45 }
 0x56c   : > { %v17964_v13 = vsel %vm16812_vm7, %v24323_v1, %v17963_v44  ;;  %v17970_v12 = vsel %vm16810_vm6, %v17882_v61, %v17969_v9  ;;  %v17978_v29 = vadd.f32 %v17952_v4, %v17910_v28  ;;  %v17909_v37 = vadd.f32 %v17908_v22, %v17907_v6  ;;  %v18018_v44 = vld [vmem:[#allocation6] sm:$0x1] }
 0x56d   : > { %v17965_v54 = vsel %vm16814_vm8, %v24333_v40, %v17964_v13  ;;  %v17971_v2 = vsel %vm16812_vm7, %v17891_v60, %v17970_v12  ;;  %v17979_v46 = vadd.f32 %v17959_v8, %v17911_v33  ;;  %v20855_v22 = vmov 1966171168  }
 0x56e   : > { %v17966_v55 = vsel %vm16816_vm9, %v24343_v52, %v17965_v54  ;;  %v17972_v0 = vsel %vm16814_vm8, %v17900_v63, %v17971_v2  ;;  %v17983_v16 = vsel %vm179_vm1, %v17978_v29, -inf  ;;  %v18051_v20 = vunpack.c.l.s4 %v20855_v22  ;;  %v24857_v63 = vld [vmem:[#allocation8_spill] sm:$0xff] }
 0x56f   : > { %v17973_v1 = vsel %vm16816_vm9, %v17909_v37, %v17972_v0  ;;  %v17980_v25 = vadd.f32 %v17966_v55, %v17912_v59  ;;  %v17984_v49 = vsel %vm179_vm1, %v17979_v46, -inf }
 0x570   : > { %v17981_v3 = vadd.f32 %v17973_v1, %v17913_v48  ;;  %v17987_v26 = vmax.f32 %v17983_v16, %v17984_v49  ;;  %v18052_v60 = vunpack.c.0.s8 %v18051_v20 }
 0x571   : > { %v17985_v40 = vsel %vm179_vm1, %v17980_v25, -inf }
 0x572   : > { %v17986_v11 = vsel %vm179_vm1, %v17981_v3, -inf  ;;  %v24418_v33 = vsub.s32 %v18052_v60, %v24857_v63  ;;  %v20770_v60 = vld [vmem:[#allocation2 + $0x50] sm:$0xff]  ;;  %v20771_v63 = vld [vmem:[#allocation2 + $0x8] sm:$0xff] }
 0x573   : > { %v17988_v7 = vmax.f32 %v17985_v40, %v17986_v11 }
 0x575   : > { %v17989_v51 = vmax.f32 %v17987_v26, %v17988_v7 }
 0x577   : > { %v17990_v41 = vrot.slane %v17989_v51, 4 }
 0x579   : > { %v17991_v52 = vmax.f32 %v17989_v51, %v17990_v41 }
 0x57b   : > { %v17992_v21 = vrot.slane %v17991_v52, 2 }
 0x57d   : > { %v17993_v36 = vmax.f32 %v17991_v52, %v17992_v21  ;;  %v20765_v21 = vld [vmem:[#allocation2] sm:$0xff] }
 0x57f   : > { %v17994_v50 = vrot.slane %v17993_v36, 1 }
 0x581   : > { %v17995_v57 = vmax.f32 %v17993_v36, %v17994_v50  ;;  %v20766_v50 = vld [vmem:[#allocation2 + $0x10] sm:$0xff] }
 0x583   : > { %v17996_v38 = vmax.f32 %v17982_v18, %v17995_v57 }
 0x585   : > { %v18004_v23 = vrot.slane %v17996_v38, %v24856_v17  ;;  %18599 = vst.msk [vmem:[#allocation5] sm:$0x1] %vm16350_vm2, %v17996_v38  ;;  %v17997_v43 = vsub.f32 %v17982_v18, %v17996_v38 }
 0x587   : > { %v18006_v35 = vsub.f32 %v17978_v29, %v18004_v23  ;;  %v18007_v58 = vsub.f32 %v17979_v46, %v18004_v23  ;;  %v18008_v47 = vsub.f32 %v17980_v25, %v18004_v23  ;;  %v18009_v32 = vsub.f32 %v17981_v3, %v18004_v23 }
 0x588   : > { %v17998_v27 = vmul.f32 1.442695, %v17997_v43 }
 0x589   : > { %v18010_v19 = vmul.f32 1.442695, %v18006_v35  ;;  %v18012_v10 = vmul.f32 1.442695, %v18007_v58  ;;  %v18014_v62 = vmul.f32 1.442695, %v18008_v47 }
 0x58a   : > { %v18016_v31 = vmul.f32 1.442695, %v18009_v32  ;;  %v20767_v35 = vld [vmem:[#allocation2 + $0x20] sm:$0xff] }
 0x58b   : > { %20685 = vpow2.f32 %v18010_v19 }
 0x58c   : > { %20687 = vpow2.f32 %v18012_v10 }
 0x58d   : > { %20689 = vpow2.f32 %v18014_v62 }
 0x58e   : > { %20691 = vpow2.f32 %v18016_v31  ;;  %v20768_v31 = vld [vmem:[#allocation2 + $0x30] sm:$0xff] }
 0x58f   : > { %20693 = vpow2.f32 %v17998_v27 }
 0x595   : > { %v20686_v15 = vpop.eup %20685 }
 0x596   : > { %v20688_v30 = vpop.eup %20687  ;;  %v18020_v45 = vsel %vm179_vm1, %v20686_v15, 0.0  ;;  %v18056_v37 = vrot.slane %v20686_v15, %v24418_v33  ;;  %v18049_v54 = vcombine.high %v20686_v15, %v20686_v15 }
 0x597   : > { %v24406_v4 = vpop.eup %20689  ;;  %v18021_v61 = vsel %vm179_vm1, %v20688_v30, 0.0  ;;  %v18098_v55 = vcombine.high %v20688_v30, %v20688_v30  ;;  %v18105_v1 = vrot.slane %v20688_v30, %v24418_v33 }
 0x598   : > { %v24409_v6 = vpop.eup %20691  ;;  %v18022_v42 = vadd.f32 %v18021_v61, %v18020_v45  ;;  %v18023_v14 = vsel %vm179_vm1, %v24406_v4, 0.0  ;;  %v18064_v2 = vcombine.high %v18056_v37, %v18056_v37  ;;  %v18072_v46 = vrot.slane %v18056_v37, %v24418_v33 }
 0x599   : > { %v18025_v56 = vsel %vm179_vm1, %v24409_v6, 0.0  ;;  %v24415_v8 = vpop.eup %20693  ;;  %v18063_v59 = vrot.slane %v18049_v54, %v24418_v33  ;;  %v18112_v25 = vrot.slane %v18098_v55, %v24418_v33  ;;  %v18113_v51 = vcombine.high %v18105_v1, %v18105_v1 }
 0x59a   : > { %v18024_v24 = vadd.f32 %v18023_v14, %v18022_v42  ;;  %v18019_v13 = vmul.f32 %v24415_v8, %v18018_v44  ;;  %v18086_v0 = vrot.slane %v18064_v2, %v24418_v33  ;;  %v18094_v16 = vcombine.high %v18072_v46, %v18072_v46  ;;  %v20769_v14 = vld [vmem:[#allocation2 + $0x40] sm:$0xff] }
 0x59b   : > { %v18065_v48 = vcombine.high %v18063_v59, %v18063_v59  ;;  %v18248_v3 = vrot.slane %v18072_v46, %v24856_v17  ;;  %v18079_v40 = vrot.slane %v18063_v59, %v24418_v33  ;;  %v18114_v41 = vcombine.high %v18112_v25, %v18112_v25  ;;  %v20773_v2 = vld [vmem:[#allocation2 + $0x60] sm:$0xff] }
 0x59c   : > { %v18026_v39 = vadd.f32 %v18025_v56, %v18024_v24  ;;  %v18096_v49 = vcombine.high %v18086_v0, %v18086_v0  ;;  %v18252_v26 = vrot.slane %v18086_v0, %v24856_v17  ;;  %v18256_v11 = vrot.slane %v18094_v16, %v24856_v17  ;;  %v20774_v16 = vld [vmem:[#allocation2 + $0x28] sm:$0xff] }
 0x59d   : > { %v18093_v7 = vrot.slane %v18065_v48, %v24418_v33  ;;  %v18405_v36 = vmul.f32 %v20765_v21, %v18248_v3  ;;  %v18095_v57 = vcombine.high %v18079_v40, %v18079_v40  ;;  %v18121_v38 = vrot.slane %v18105_v1, %v24418_v33 }
 0x59e   : > { %v18027_v53 = vrot.slane %v18026_v39, 4  ;;  %v18260_v52 = vrot.slane %v18096_v49, %v24856_v17  ;;  %v18407_v18 = vmul.f32 %v20766_v50, %v18252_v26  ;;  %v18264_v23 = vrot.slane %v18079_v40, %v24856_v17 }
 0x59f   : > { %v18409_v58 = vmul.f32 %v20767_v35, %v18256_v11  ;;  %v18097_v47 = vcombine.high %v18093_v7, %v18093_v7  ;;  %v24437_v32 = vrot.slane %v18112_v25, %v24418_v33  ;;  %v18135_v19 = vrot.slane %v18113_v51, %v24418_v33  ;;  %v20778_v35 = vld [vmem:[#allocation2 + $0x48] sm:$0xff] }
 0x5a0   : > { %v18028_v34 = vadd.f32 %v18027_v53, %v18026_v39  ;;  %v24441_v10 = vrot.slane %v18114_v41, %v24418_v33  ;;  %v24444_v62 = vrot.slane %v18093_v7, %v24856_v17  ;;  %v18411_v43 = vmul.f32 %v20768_v31, %v18260_v52  ;;  %v20776_v7 = vld [vmem:[#allocation2 + $0x38] sm:$0xff]  ;;  %v20779_v31 = vld [vmem:[#allocation2 + $0x90] sm:$0xff] }
 0x5a1   : > { %v18469_v15 = vsel %vm179_vm1, %v18405_v36, 0.0  ;;  %v18470_v30 = vsel %vm179_vm1, %v18407_v18, 0.0  ;;  %v18147_v45 = vcombine.high %v24406_v4, %v24406_v4  ;;  %v18143_v61 = vcombine.high %v18121_v38, %v18121_v38 }
 0x5a2   : > { %v18029_v5 = vrot.slane %v18028_v34, 2  ;;  %v18471_v27 = vadd.f32 %v18470_v30, %v18469_v15  ;;  %v24451_v42 = vrot.slane %v18095_v57, %v24856_v17  ;;  %v18413_v24 = vmul.f32 %v20769_v14, %v18264_v23 }
 0x5a3   : > { %v18472_v56 = vsel %vm179_vm1, %v18409_v58, 0.0  ;;  %v18144_v39 = vcombine.high %v24437_v32, %v24437_v32  ;;  %v18145_v53 = vcombine.high %v18135_v19, %v18135_v19  ;;  %v24458_v22 = vrot.slane %v24406_v4, %v24418_v33 }
 0x5a4   : > { %v18030_v28 = vadd.f32 %v18029_v5, %v18028_v34  ;;  %v18473_v20 = vadd.f32 %v18472_v56, %v18471_v27  ;;  %v18146_v34 = vcombine.high %v24441_v10, %v24441_v10  ;;  %v24463_v5 = vrot.slane %v18097_v47, %v24856_v17  ;;  %v20780_v27 = vld [vmem:[#allocation2 + $0x58] sm:$0xff]  ;;  %v20781_v56 = vld [vmem:[#allocation2 + $0xa0] sm:$0xff] }
 0x5a5   : > { %v18474_v44 = vsel %vm179_vm1, %v18411_v43, 0.0  ;;  %v18196_v37 = vcombine.high %v24409_v6, %v24409_v6  ;;  %v24473_v54 = vrot.slane %v18121_v38, %v24856_v17  ;;  %v18417_v46 = vmul.f32 %v20773_v2, %v24451_v42 }
 0x5a6   : > { %v18031_v9 = vrot.slane %v18030_v28, 1  ;;  %v18476_v59 = vsel %vm179_vm1, %v18413_v24, 0.0  ;;  %v18162_v55 = vcombine.high %v24458_v22, %v24458_v22  ;;  %v24481_v0 = vrot.slane %v24458_v22, %v24418_v33 }
 0x5a7   : > { %v18410_v48 = vmul.f32 %v20774_v16, %v18256_v11  ;;  %v24485_v25 = vrot.slane %v24409_v6, %v24418_v33  ;;  %v24488_v49 = vrot.slane %v18135_v19, %v24856_v17  ;;  %v18412_v51 = vmul.f32 %v20776_v7, %v18260_v52  ;;  %v20777_v6 = vld [vmem:[#allocation2 + $0x80] sm:$0xff]  ;;  %v20786_v7 = vld [vmem:[#allocation2 + $0x88] sm:$0xff] }
 0x5a8   : > { %v18032_v12 = vadd.f32 %v18031_v9, %v18030_v28  ;;  %v18415_v28 = vmul.f32 %v20770_v60, %v24444_v62  ;;  %v24468_v9 = vrot.slane %v18147_v45, %v24418_v33  ;;  %v24495_v36 = vrot.slane %v18143_v61, %v24856_v17 }
 0x5a9   : > { %v18421_v50 = vmul.f32 %v20777_v6, %v24473_v54  ;;  %v18480_v18 = vsel %vm179_vm1, %v18417_v46, 0.0  ;;  %v18414_v58 = vmul.f32 %v20778_v35, %v18264_v23  ;;  %v18535_v47 = vsel %vm179_vm1, %v18410_v48, 0.0 }
 0x5aa   : > { %v18033_v29 = vadd.f32 %v18032_v12, %v18019_v13  ;;  %v18406_v13 = vmul.f32 %v20771_v63, %v18248_v3  ;;  %v20772_v12 = vld [vmem:[#allocation2 + $0x18] sm:$0xff]  ;;  %v20775_v3 = vld [vmem:[#allocation2 + $0x70] sm:$0xff]  ;;  %v18478_v40 = vsel %vm179_vm1, %v18415_v28, 0.0  ;;  %v18163_v38 = vcombine.high %v24468_v9, %v24468_v9  ;;  %v20782_v28 = vld [vmem:[#allocation2 + $0x68] sm:$0xff] }
 0x5ab   : > { %v18408_v4 = vmul.f32 %v20772_v12, %v18252_v26  ;;  %v18419_v26 = vmul.f32 %v20775_v3, %v24463_v5  ;;  %v24503_v19 = vrot.slane %v18145_v53, %v24856_v17  ;;  %v18423_v43 = vmul.f32 %v20779_v31, %v24488_v49  ;;  %v20783_v12 = vld [vmem:[#allocation2 + $0xb0] sm:$0xff] }
 0x5ac   : > { %18034 = vst.msk [vmem:[#allocation6] sm:$0x1] %vm16350_vm2, %v18033_v29  ;;  %v18475_v29 = vadd.f32 %v18474_v44, %v18473_v20  ;;  %v18532_v21 = vsel %vm179_vm1, %v18406_v13, 0.0  ;;  %v24509_v45 = vrot.slane %v24468_v9, %v24418_v33  ;;  %v18416_v61 = vmul.f32 %v20780_v27, %v24444_v62  ;;  %v20794_v9 = vld [vmem:[#allocation2 + $0xc8] sm:$0xff] }
 0x5ad   : > { %v18533_v11 = vsel %vm179_vm1, %v18408_v4, 0.0  ;;  %v18482_v15 = vsel %vm179_vm1, %v18419_v26, 0.0  ;;  %v18537_v14 = vsel %vm179_vm1, %v18412_v51, 0.0  ;;  %v24515_v24 = vrot.slane %v24437_v32, %v24856_v17 }
 0x5ae   : > { %v18477_v1 = vadd.f32 %v18476_v59, %v18475_v29  ;;  %v18534_v57 = vadd.f32 %v18533_v11, %v18532_v21  ;;  %v18425_v53 = vmul.f32 %v20781_v56, %v24495_v36  ;;  %v18484_v22 = vsel %vm179_vm1, %v18421_v50, 0.0 }
 0x5af   : > { %v24520_v60 = vrot.slane %v18196_v37, %v24418_v33  ;;  %v18418_v44 = vmul.f32 %v20782_v28, %v24451_v42  ;;  %v18539_v63 = vsel %vm179_vm1, %v18414_v58, 0.0  ;;  %v24526_v13 = vrot.slane %v24441_v10, %v24856_v17  ;;  %v20784_v37 = vld [vmem:[#allocation2 + $0x78] sm:$0xff] }
 0x5b0   : > { %v18479_v41 = vadd.f32 %v18478_v40, %v18477_v1  ;;  %v18536_v30 = vadd.f32 %v18535_v47, %v18534_v57  ;;  %v18427_v4 = vmul.f32 %v20783_v12, %v24503_v19  ;;  %v18486_v29 = vsel %vm179_vm1, %v18423_v43, 0.0  ;;  %v20785_v1 = vld [vmem:[#allocation2 + $0xc0] sm:$0xff]  ;;  %v20790_v43 = vld [vmem:[#allocation2 + $0xa8] sm:$0xff] }
 0x5b1   : > { %v18184_v46 = vrot.slane %v18162_v55, %v24418_v33  ;;  %v18420_v59 = vmul.f32 %v20784_v37, %v24463_v5  ;;  %v18541_v42 = vsel %vm179_vm1, %v18416_v61, 0.0  ;;  %v24537_v48 = vrot.slane %v18144_v39, %v24856_v17  ;;  %v20787_v39 = vld [vmem:[#allocation2 + $0xd0] sm:$0xff] }
 0x5b2   : > { %v18481_v52 = vadd.f32 %v18480_v18, %v18479_v41  ;;  %v18538_v20 = vadd.f32 %v18537_v14, %v18536_v30  ;;  %v18429_v3 = vmul.f32 %v20785_v1, %v24515_v24  ;;  %v18488_v26 = vsel %vm179_vm1, %v18425_v53, 0.0  ;;  %v20788_v18 = vld [vmem:[#allocation2 + $0x98] sm:$0xff]  ;;  %v20791_v61 = vld [vmem:[#allocation2 + $0xf0] sm:$0xff] }
 0x5b3   : > { %v18192_v55 = vcombine.high %v24481_v0, %v24481_v0  ;;  %v18422_v5 = vmul.f32 %v20786_v7, %v24473_v54  ;;  %v18543_v41 = vsel %vm179_vm1, %v18418_v44, 0.0  ;;  %v24549_v32 = vrot.slane %v18146_v34, %v24856_v17  ;;  %v20789_v34 = vld [vmem:[#allocation2 + $0xe0] sm:$0xff]  ;;  %v20792_v53 = vld [vmem:[#allocation2 + $0xb8] sm:$0xff] }
 0x5b4   : > { %v18483_v23 = vadd.f32 %v18482_v15, %v18481_v52  ;;  %v18540_v2 = vadd.f32 %v18539_v63, %v18538_v20  ;;  %v18431_v21 = vmul.f32 %v20787_v39, %v24526_v13  ;;  %v18490_v11 = vsel %vm179_vm1, %v18427_v4, 0.0  ;;  %v20793_v44 = vld [vmem:[#allocation2 + $0x100] sm:$0xff]  ;;  %v20796_v1 = vld [vmem:[#allocation2 + $0xd8] sm:$0xff]  ;;  %v20798_v39 = vld [vmem:[#allocation2 + $0xe8] sm:$0xff] }
 0x5b5   : > { %v18211_v50 = vcombine.high %v24485_v25, %v24485_v25  ;;  %v18424_v54 = vmul.f32 %v20788_v18, %v24488_v49  ;;  %v18545_v35 = vsel %vm179_vm1, %v18420_v59, 0.0  ;;  %v24559_v10 = vrot.slane %v24481_v0, %v24856_v17  ;;  %v20799_v18 = vld [vmem:[#allocation2 + $0x130] sm:$0xff] }
 0x5b6   : > { %v18485_v62 = vadd.f32 %v18484_v22, %v18483_v23  ;;  %v18542_v40 = vadd.f32 %v18541_v42, %v18540_v2  ;;  %v18433_v58 = vmul.f32 %v20789_v34, %v24537_v48  ;;  %v18492_v52 = vsel %vm179_vm1, %v18429_v3, 0.0  ;;  %v20800_v34 = vld [vmem:[#allocation2 + $0xf8] sm:$0xff] }
 0x5b7   : > { %v18194_v31 = vcombine.high %v18184_v46, %v18184_v46  ;;  %v18426_v15 = vmul.f32 %v20790_v43, %v24495_v36  ;;  %v18547_v49 = vsel %vm179_vm1, %v18422_v5, 0.0  ;;  %v24566_v27 = vrot.slane %v18184_v46, %v24856_v17  ;;  %v20795_v46 = vld [vmem:[#allocation2 + $0x110] sm:$0xff] }
 0x5b8   : > { %v18487_v16 = vadd.f32 %v18486_v29, %v18485_v62  ;;  %v18544_v6 = vadd.f32 %v18543_v41, %v18542_v40  ;;  %v18435_v0 = vmul.f32 %v20791_v61, %v24549_v32  ;;  %v18494_v23 = vsel %vm179_vm1, %v18431_v21, 0.0  ;;  %v20802_v61 = vld [vmem:[#allocation2 + $0x108] sm:$0xff] }
 0x5b9   : > { %v18191_v56 = vrot.slane %v18163_v38, %v24418_v33  ;;  %v18428_v36 = vmul.f32 %v20792_v53, %v24503_v19  ;;  %v18549_v20 = vsel %vm179_vm1, %v18424_v54, 0.0  ;;  %v24577_v28 = vrot.slane %v18192_v55, %v24856_v17  ;;  %v20797_v55 = vld [vmem:[#allocation2 + $0x120] sm:$0xff] }
 0x5ba   : > { %v18489_v51 = vadd.f32 %v18488_v26, %v18487_v16  ;;  %v18546_v47 = vadd.f32 %v18545_v35, %v18544_v6  ;;  %v18437_v62 = vmul.f32 %v20793_v44, %v24559_v10  ;;  %v18496_v63 = vsel %vm179_vm1, %v18433_v58, 0.0  ;;  %v20804_v44 = vld [vmem:[#allocation2 + $0x118] sm:$0xff] }
 0x5bb   : > { %v18193_v4 = vcombine.high %v24509_v45, %v24509_v45  ;;  %v18430_v38 = vmul.f32 %v20794_v9, %v24515_v24  ;;  %v18551_v19 = vsel %vm179_vm1, %v18426_v15, 0.0  ;;  %v24586_v2 = vrot.slane %v18194_v31, %v24856_v17  ;;  %v20801_v31 = vld [vmem:[#allocation2 + $0x140] sm:$0xff] }
 0x5bc   : > { %v18491_v57 = vadd.f32 %v18490_v11, %v18489_v51  ;;  %v18548_v14 = vadd.f32 %v18547_v49, %v18546_v47  ;;  %v18439_v37 = vmul.f32 %v20795_v46, %v24566_v27  ;;  %v18498_v59 = vsel %vm179_vm1, %v18435_v0, 0.0 }
 0x5bd   : > { %v18212_v42 = vcombine.high %v24520_v60, %v24520_v60  ;;  %v18432_v3 = vmul.f32 %v20796_v1, %v24526_v13  ;;  %v18553_v24 = vsel %vm179_vm1, %v18428_v36, 0.0  ;;  %v24596_v40 = vrot.slane %v24509_v45, %v24856_v17 }
 0x5be   : > { %v18493_v30 = vadd.f32 %v18492_v52, %v18491_v57  ;;  %v18550_v12 = vadd.f32 %v18549_v20, %v18548_v14  ;;  %v18441_v7 = vmul.f32 %v20797_v55, %v24577_v28  ;;  %v18500_v5 = vsel %vm179_vm1, %v18437_v62, 0.0 }
 0x5bf   : > { %v18195_v41 = vcombine.high %v18191_v56, %v18191_v56  ;;  %v18434_v21 = vmul.f32 %v20798_v39, %v24537_v48  ;;  %v18555_v13 = vsel %vm179_vm1, %v18430_v38, 0.0  ;;  %v24603_v6 = vrot.slane %v18191_v56, %v24856_v17  ;;  %v20803_v56 = vld [vmem:[#allocation2 + $0x150] sm:$0xff] }
 0x5c0   : > { %v18495_v22 = vadd.f32 %v18494_v23, %v18493_v30  ;;  %v18552_v16 = vadd.f32 %v18551_v19, %v18550_v12  ;;  %v18443_v45 = vmul.f32 %v20799_v18, %v24586_v2  ;;  %v18502_v54 = vsel %vm179_vm1, %v18439_v37, 0.0 }
 0x5c1   : > { %v18219_v35 = vrot.slane %v24485_v25, %v24418_v33  ;;  %v18436_v58 = vmul.f32 %v20800_v34, %v24549_v32  ;;  %v18557_v48 = vsel %vm179_vm1, %v18432_v3, 0.0  ;;  %v24612_v47 = vrot.slane %v18193_v4, %v24856_v17 }
 0x5c2   : > { %v18497_v29 = vadd.f32 %v18496_v63, %v18495_v22  ;;  %v18554_v51 = vadd.f32 %v18553_v24, %v18552_v16  ;;  %v18445_v43 = vmul.f32 %v20801_v31, %v24596_v40  ;;  %v18504_v15 = vsel %vm179_vm1, %v18441_v7, 0.0  ;;  %v20805_v63 = vld [vmem:[#allocation2 + $0x160] sm:$0xff]  ;;  %v20808_v24 = vld [vmem:[#allocation2 + $0x138] sm:$0xff] }
 0x5c3   : > { %v18233_v49 = vrot.slane %v18211_v50, %v24418_v33  ;;  %v18438_v32 = vmul.f32 %v20802_v61, %v24559_v10  ;;  %v18559_v23 = vsel %vm179_vm1, %v18434_v21, 0.0  ;;  %v24623_v14 = vrot.slane %v18195_v41, %v24856_v17  ;;  %v20814_v61 = vld [vmem:[#allocation2 + $0x168] sm:$0xff] }
 0x5c4   : > { %v18499_v26 = vadd.f32 %v18498_v59, %v18497_v29  ;;  %v18556_v57 = vadd.f32 %v18555_v13, %v18554_v51  ;;  %v18447_v53 = vmul.f32 %v20803_v56, %v24603_v6  ;;  %v18506_v36 = vsel %vm179_vm1, %v18443_v45, 0.0  ;;  %v20806_v29 = vld [vmem:[#allocation2 + $0x128] sm:$0xff]  ;;  %v20807_v59 = vld [vmem:[#allocation2 + $0x170] sm:$0xff]  ;;  %v20809_v51 = vld [vmem:[#allocation2 + $0x180] sm:$0xff] }
 0x5c5   : > { %v18241_v20 = vcombine.high %v18219_v35, %v18219_v35  ;;  %v18440_v25 = vmul.f32 %v20804_v44, %v24566_v27  ;;  %v18561_v62 = vsel %vm179_vm1, %v18436_v58, 0.0  ;;  %v24630_v10 = vrot.slane %v18219_v35, %v24856_v17  ;;  %v20810_v13 = vld [vmem:[#allocation2 + $0x148] sm:$0xff] }
 0x5c6   : > { %v18501_v11 = vadd.f32 %v18500_v5, %v18499_v26  ;;  %v18558_v30 = vadd.f32 %v18557_v48, %v18556_v57  ;;  %v18449_v12 = vmul.f32 %v20805_v63, %v24612_v47  ;;  %v18508_v4 = vsel %vm179_vm1, %v18445_v43, 0.0  ;;  %v20811_v57 = vld [vmem:[#allocation2 + $0x190] sm:$0xff]  ;;  %v20812_v48 = vld [vmem:[#allocation2 + $0x158] sm:$0xff]  ;;  %v20817_v63 = vld [vmem:[#allocation2 + $0x1c0] sm:$0xff] }
 0x5c7   : > { %v18243_v38 = vcombine.high %v18233_v49, %v18233_v49  ;;  %v18442_v19 = vmul.f32 %v20806_v29, %v24577_v28  ;;  %v18563_v37 = vsel %vm179_vm1, %v18438_v32, 0.0  ;;  %v24637_v27 = vrot.slane %v18233_v49, %v24856_v17 }
 0x5c8   : > { %v18503_v52 = vadd.f32 %v18502_v54, %v18501_v11  ;;  %v18560_v22 = vadd.f32 %v18559_v23, %v18558_v30  ;;  %v18451_v16 = vmul.f32 %v20807_v59, %v24623_v14  ;;  %v18510_v1 = vsel %vm179_vm1, %v18447_v53, 0.0 }
 0x5c9   : > { %v18226_v26 = vrot.slane %v24520_v60, %v24418_v33  ;;  %v18444_v55 = vmul.f32 %v20808_v24, %v24586_v2  ;;  %v18565_v28 = vsel %vm179_vm1, %v18440_v25, 0.0  ;;  %v18352_v5 = vrot.slane %v18241_v20, %v24856_v17  ;;  %v20816_v20 = vld [vmem:[#allocation2 + $0x178] sm:$0xff] }
 0x5ca   : > { %v18505_v0 = vadd.f32 %v18504_v15, %v18503_v52  ;;  %v18562_v9 = vadd.f32 %v18561_v62, %v18560_v22  ;;  %v18453_v41 = vmul.f32 %v20809_v51, %v24630_v10  ;;  %v18512_v39 = vsel %vm179_vm1, %v18449_v12, 0.0  ;;  %v20822_v51 = vld [vmem:[#allocation2 + $0x1a8] sm:$0xff] }
 0x5cb   : > { %v18240_v11 = vrot.slane %v18212_v42, %v24418_v33  ;;  %v18446_v18 = vmul.f32 %v20810_v13, %v24596_v40  ;;  %v18567_v45 = vsel %vm179_vm1, %v18442_v19, 0.0  ;;  %v18356_v54 = vrot.slane %v18243_v38, %v24856_v17  ;;  %v20813_v40 = vld [vmem:[#allocation2 + $0x1a0] sm:$0xff] }
 0x5cc   : > { %v18507_v50 = vadd.f32 %v18506_v36, %v18505_v0  ;;  %v18564_v3 = vadd.f32 %v18563_v37, %v18562_v9  ;;  %v18455_v35 = vmul.f32 %v20811_v57, %v24637_v27  ;;  %v18514_v34 = vsel %vm179_vm1, %v18451_v16, 0.0  ;;  %v20818_v9 = vld [vmem:[#allocation2 + $0x188] sm:$0xff]  ;;  %v20819_v37 = vld [vmem:[#allocation2 + $0x1d0] sm:$0xff] }
 0x5cd   : > { %v18242_v52 = vcombine.high %v18226_v26, %v18226_v26  ;;  %v18448_v31 = vmul.f32 %v20812_v48, %v24603_v6  ;;  %v18569_v33 = vsel %vm179_vm1, %v18444_v55, 0.0  ;;  %v18360_v42 = vrot.slane %v18226_v26, %v24856_v17  ;;  %v20815_v6 = vld [vmem:[#allocation2 + $0x1b0] sm:$0xff]  ;;  %v20821_v55 = vld [vmem:[#allocation2 + $0x1e0] sm:$0xff]  ;;  %v20825_v48 = vld [vmem:[#allocation2 + $0x1c8] sm:$0xff] }
 0x5ce   : > { %v18509_v46 = vadd.f32 %v18508_v4, %v18507_v50  ;;  %v18566_v21 = vadd.f32 %v18565_v28, %v18564_v3  ;;  %v18457_v43 = vmul.f32 %v20813_v40, %v18352_v5  ;;  %v18516_v15 = vsel %vm179_vm1, %v18453_v41, 0.0 }
 0x5cf   : > { %v18244_v49 = vcombine.high %v18240_v11, %v18240_v11  ;;  %v18450_v32 = vmul.f32 %v20814_v61, %v24612_v47  ;;  %v18571_v23 = vsel %vm179_vm1, %v18446_v18, 0.0  ;;  %v18364_v56 = vrot.slane %v18240_v11, %v24856_v17  ;;  %v20823_v11 = vld [vmem:[#allocation2 + $0x1f0] sm:$0xff] }
 0x5d0   : > { %v18511_v7 = vadd.f32 %v18510_v1, %v18509_v46  ;;  %v18568_v58 = vadd.f32 %v18567_v45, %v18566_v21  ;;  %v18459_v53 = vmul.f32 %v20815_v6, %v18356_v54  ;;  %v18518_v36 = vsel %vm179_vm1, %v18455_v35, 0.0  ;;  %v20820_v1 = vld [vmem:[#allocation2 + $0x198] sm:$0xff]  ;;  %v18721_v61 = vld [vmem:[#allocation6] ss:$0 sm:$0xff] }
 0x5d1   : > { %v18452_v44 = vmul.f32 %v20816_v20, %v24623_v14  ;;  %v18573_v50 = vsel %vm179_vm1, %v18448_v31, 0.0  ;;  %v18368_v62 = vrot.slane %v18242_v52, %v24856_v17  ;;  %v18461_v47 = vmul.f32 %v20817_v63, %v18360_v42  ;;  %v20824_v45 = vld [vmem:[#allocation2 + $0x1b8] sm:$0xff] }
 0x5d2   : > { %v18513_v2 = vadd.f32 %v18512_v39, %v18511_v7  ;;  %v18570_v30 = vadd.f32 %v18569_v33, %v18568_v58  ;;  %v18520_v12 = vsel %vm179_vm1, %v18457_v43, 0.0  ;;  %v18454_v38 = vmul.f32 %v20818_v9, %v24630_v10  ;;  %v18035_v58 = vld [vmem:[#allocation7] sm:$0xff] }
 0x5d3   : > { %v18575_v19 = vsel %vm179_vm1, %v18450_v32, 0.0  ;;  %v18372_v46 = vrot.slane %v18244_v49, %v24856_v17  ;;  %v18463_v14 = vmul.f32 %v20819_v37, %v18364_v56  ;;  %v18522_v59 = vsel %vm179_vm1, %v18459_v53, 0.0  ;;  %v20827_v32 = vld [vmem:[#allocation2 + $0x1e8] sm:$0xff]  ;;  %v20828_v53 = vld [vmem:[#allocation2 + $0x1f8] sm:$0xff] }
 0x5d4   : > { %v18515_v60 = vadd.f32 %v18514_v34, %v18513_v2  ;;  %v18572_v22 = vadd.f32 %v18571_v23, %v18570_v30  ;;  %v18456_v3 = vmul.f32 %v20820_v1, %v24637_v27  ;;  %v18577_v24 = vsel %vm179_vm1, %v18452_v44, 0.0  ;;  %v20826_v30 = vld [vmem:[#allocation2 + $0x1d8] sm:$0xff] }
 0x5d5   : > { %v18465_v7 = vmul.f32 %v20821_v55, %v18368_v62  ;;  %v18524_v10 = vsel %vm179_vm1, %v18461_v47, 0.0  ;;  %v18458_v41 = vmul.f32 %v20822_v51, %v18352_v5  ;;  %v18579_v21 = vsel %vm179_vm1, %v18454_v38, 0.0 }
 0x5d6   : > { %v18517_v0 = vadd.f32 %v18516_v15, %v18515_v60  ;;  %v18574_v4 = vadd.f32 %v18573_v50, %v18572_v22  ;;  %v18467_v13 = vmul.f32 %v20823_v11, %v18372_v46  ;;  %v18526_v18 = vsel %vm179_vm1, %v18463_v14, 0.0 }
 0x5d7   : > { %v18041_v27 = vrot.slane %v24415_v8, %v24856_v17  ;;  %v18460_v57 = vmul.f32 %v20824_v45, %v18356_v54  ;;  %v18581_v34 = vsel %vm179_vm1, %v18456_v3, 0.0  ;;  %v18528_v52 = vsel %vm179_vm1, %v18465_v7, 0.0 }
 0x5d8   : > { %v18519_v25 = vadd.f32 %v18518_v36, %v18517_v0  ;;  %v18576_v16 = vadd.f32 %v18575_v19, %v18574_v4  ;;  %v18462_v31 = vmul.f32 %v20825_v48, %v18360_v42  ;;  %v18583_v33 = vsel %vm179_vm1, %v18458_v41, 0.0 }
 0x5d9   : > { %v18530_v40 = vsel %vm179_vm1, %v18467_v13, 0.0  ;;  %v18043_v15 = vmul.f32 %v18041_v27, %v18035_v58  ;;  %v18464_v17 = vmul.f32 %v20826_v30, %v18364_v56  ;;  %v18585_v54 = vsel %vm179_vm1, %v18460_v57, 0.0  ;;  %v18036_v56 = vld [vmem:[#allocation7 + $0x8] sm:$0xff] }
 0x5da   : > { %v18521_v29 = vadd.f32 %v18520_v12, %v18519_v25  ;;  %v18578_v28 = vadd.f32 %v18577_v24, %v18576_v16  ;;  %v18466_v0 = vmul.f32 %v20827_v32, %v18368_v62  ;;  %v18587_v23 = vsel %vm179_vm1, %v18462_v31, 0.0 }
 0x5db   : > { %v18468_v36 = vmul.f32 %v20828_v53, %v18372_v46  ;;  %v18589_v22 = vsel %vm179_vm1, %v18464_v17, 0.0  ;;  %20695 = vrcp.f32 %v18721_v61  ;;  %v18044_v63 = vmul.f32 %v18041_v27, %v18036_v56 }
 0x5dc   : > { %v18523_v26 = vadd.f32 %v18522_v59, %v18521_v29  ;;  %v18580_v2 = vadd.f32 %v18579_v21, %v18578_v28  ;;  %v18591_v44 = vsel %vm179_vm1, %v18466_v0, 0.0 }
 0x5dd   : > { %v18593_v50 = vsel %vm179_vm1, %v18468_v36, 0.0 }
 0x5de   : > { %v18525_v39 = vadd.f32 %v18524_v10, %v18523_v26  ;;  %v18582_v5 = vadd.f32 %v18581_v34, %v18580_v2 }
 0x5e0   : > { %v18527_v35 = vadd.f32 %v18526_v18, %v18525_v39  ;;  %v18584_v43 = vadd.f32 %v18583_v33, %v18582_v5 }
 0x5e2   : > { %v18529_v60 = vadd.f32 %v18528_v52, %v18527_v35  ;;  %v18586_v49 = vadd.f32 %v18585_v54, %v18584_v43 }
 0x5e4   : > { %v18531_v8 = vadd.f32 %v18530_v40, %v18529_v60  ;;  %v18588_v42 = vadd.f32 %v18587_v23, %v18586_v49 }
 0x5e5   : > { %v20696_v4 = vpop.eup %20695 }
 0x5e6   : > { %v18595_v6 = vadd.f32 %v18531_v8, %v18043_v15  ;;  %v18590_v20 = vadd.f32 %v18589_v22, %v18588_v42 }
 0x5e8   : > { %18597 = vst.msk [vmem:[#allocation7] sm:$0xff] %vm179_vm1, %v18595_v6  ;;  %v18592_v25 = vadd.f32 %v18591_v44, %v18590_v20 }
 0x5ea   : > { %v18594_v62 = vadd.f32 %v18593_v50, %v18592_v25 }
 0x5ec   : > { %v18596_v47 = vadd.f32 %v18594_v62, %v18044_v63 }
 0x5ee   : > { %18598 = vst.msk [vmem:[#allocation7 + $0x8] sm:$0xff] %vm179_vm1, %v18596_v47 }
 0x5ef   : > { %v18600_v12 = vld [vmem:[#allocation7] sm:$0xff] }
 0x5f0   : > { %v18610_v9 = vmul.f32 %v20696_v4, %v18600_v12 }
 0x5f2   : > { %v18612_v38 = vmul.f32 %v18610_v9, %v18610_v9 }
 0x5f4   : > { %v18614_v37 = vsel %vm179_vm1, %v18612_v38, 0.0 }
 0x5f5   : > { %v18601_v29 = vld [vmem:[#allocation7 + $0x8] sm:$0xff] }
 0x5f6   : > { %v18611_v19 = vmul.f32 %v20696_v4, %v18601_v29 }
 0x5f8   : > { %v18613_v46 = vmul.f32 %v18611_v19, %v18611_v19 }
 0x5fa   : > { %v18615_v14 = vsel %vm179_vm1, %v18613_v46, 0.0 }
 0x5fb   : > { %v18616_v59 = vadd.f32 %v18615_v14, %v18614_v37 }
 0x5fd   : > { %v18617_v16 = vrot.slane %v18616_v59, 4 }
 0x5ff   : > { %v18618_v1 = vadd.f32 %v18617_v16, %v18616_v59 }
 0x601   : > { %v18619_v3 = vrot.slane %v18618_v1, 2 }
 0x603   : > { %v18620_v26 = vadd.f32 %v18619_v3, %v18618_v1 }
 0x605   : > { %v18621_v24 = vrot.slane %v18620_v26, 1 }
 0x607   : > { %v18622_v55 = vadd.f32 %v18621_v24, %v18620_v26 }
 0x609   : > { %v18623_v7 = vadd.f32 1.0, %v18622_v55 }
 0x60b   : > { %20697 = vrcp.f32 %v18623_v7 }
 0x60c   : > { %20699 = vrsqrt.f32 %v18622_v55 }
 0x615   : > { %v20698_v10 = vpop.eup %20697 }
 0x616   : > { %v18625_v28 = vmul.f32 %v20698_v10, %v18622_v55  ;;  %v20700_v39 = vpop.eup %20699 }
 0x618   : > { %v18626_v51 = vmul.f32 %v18625_v28, %v18610_v9  ;;  %v18627_v41 = vmul.f32 %v18625_v28, %v18611_v19 }
 0x61a   : > { %v18629_v21 = vmul.f32 %v20700_v39, %v18626_v51  ;;  %v18630_v11 = vmul.f32 %v20700_v39, %v18627_v41 }
 0x61c   : > { %18631 = vst.msk [vmem:[%s174_s13] sm:$0xff] %vm179_vm1, %v18629_v21  ;;  %18632 = vst.msk [vmem:[%s174_s13 + $0x8] sm:$0xff] %vm179_vm1, %v18630_v11 }
 0x61d PF: > { %s12_s11 = sadd.s32 1, %s20851_s11   ;;  %s24858_s9 = smov %s20847_s10 }
 0x61e   : > { %p9_p5 = scmp.ge.s32.totalorder %s12_s11, 6   ;;  %s24859_s10 = smov %s24861_s12 }
 0x620   :  { %11 = sbr.rel (!%p9_p5) target bundleno = 2 (0x2), region = 70 }

</bundles_post_ra>
